<compile_context>
chip_gen: v6e
topology: v6e:2x2x1
jax: 0.10.0
libtpu: 0.0.40
codegen_flags: <defaults>
</compile_context>

<pallas_src>
import functools

import jax
import jax.numpy as jnp
from jax.experimental import pallas as pl
from jax.experimental.pallas import tpu as pltpu


def _batch_conv2d_kernel(x_ref, w_ref, b_ref, o_ref, *, kh, kw, stride,
                         dilation, h_out, w_out):
    """One weight-set (one b_i slice) of the batched conv.

    x_ref: (1, b_j, H_p, W_p, C)   spatially padded input, channels-last
    w_ref: (1, kh, kw, C, O)
    b_ref: (1, 1, O)
    o_ref: (1, b_j, h_out, w_out, O)
    """
    x = x_ref[0]                      # (b_j, H_p, W_p, C)
    wgt = w_ref[0]                    # (kh, kw, C, O)
    b_j = x.shape[0]
    c = x.shape[-1]
    out_c = wgt.shape[-1]
    m = b_j * h_out * w_out

    acc = jnp.zeros((m, out_c), jnp.float32)
    # Static kh*kw loop: unrolled into kh*kw accumulating MXU matmuls.
    for ki in range(kh):
        for kj in range(kw):
            hs = ki * dilation
            ws = kj * dilation
            if stride == 1:
                xs = x[:, hs:hs + h_out, ws:ws + w_out, :]
            else:
                xs = jax.lax.slice(
                    x,
                    (0, hs, ws, 0),
                    (b_j, hs + (h_out - 1) * stride + 1,
                     ws + (w_out - 1) * stride + 1, c),
                    (1, stride, stride, 1))
            xs = xs.reshape(m, c)                      # lane dim (C) unchanged
            acc = acc + jnp.dot(xs, wgt[ki, kj],
                                preferred_element_type=jnp.float32)
    acc = acc + b_ref[0]                               # (1, O) broadcast over M
    o_ref[0] = acc.reshape(b_j, h_out, w_out, out_c).astype(o_ref.dtype)


def batch_conv2d(x, weight, bias=None, *, stride=1, padding=0, dilation=1):
    """BatchConv2DLayer.forward.

    x: (b_i, b_j, C, H, W); weight: (b_i, O, C, kh, kw); bias: (b_i, 1, O)|None
    returns: (b_i, b_j, O, H_out, W_out) float32
    """
    b_i, b_j, c, h, w = x.shape
    assert weight.shape[0] == b_i, "dim=0 of x must equal dim=0 of weight"
    _, out_c, c_w, kh, kw = weight.shape
    assert c_w == c, "in_channels mismatch"
    if bias is not None:
        assert bias.shape[0] == b_i, "dim=0 of bias must equal dim=0 of weight"

    # Layout plumbing (channels-last + spatial zero padding) done once on the
    # wrapper side so the kernel's contraction/output dims sit on the lane axis.
    x_cl = jnp.transpose(x, (0, 1, 3, 4, 2)).astype(jnp.float32)  # (b_i,b_j,H,W,C)
    if padding:
        x_cl = jnp.pad(x_cl, ((0, 0), (0, 0), (padding, padding),
                              (padding, padding), (0, 0)))
    h_p = h + 2 * padding
    w_p = w + 2 * padding
    h_out = (h_p - dilation * (kh - 1) - 1) // stride + 1
    w_out = (w_p - dilation * (kw - 1) - 1) // stride + 1

    w_cl = jnp.transpose(weight, (0, 3, 4, 2, 1)).astype(jnp.float32)  # (b_i,kh,kw,C,O)
    b_arr = (bias if bias is not None
             else jnp.zeros((b_i, 1, out_c), jnp.float32)).astype(jnp.float32)

    kernel = functools.partial(
        _batch_conv2d_kernel, kh=kh, kw=kw, stride=stride,
        dilation=dilation, h_out=h_out, w_out=w_out)

    out_cl = pl.pallas_call(
        kernel,
        out_shape=jax.ShapeDtypeStruct((b_i, b_j, h_out, w_out, out_c),
                                       jnp.float32),
        grid=(b_i,),
        in_specs=[
            pl.BlockSpec((1, b_j, h_p, w_p, c), lambda i: (i, 0, 0, 0, 0)),
            pl.BlockSpec((1, kh, kw, c, out_c), lambda i: (i, 0, 0, 0, 0)),
            pl.BlockSpec((1, 1, out_c), lambda i: (i, 0, 0)),
        ],
        out_specs=pl.BlockSpec((1, b_j, h_out, w_out, out_c),
                               lambda i: (i, 0, 0, 0, 0)),
        compiler_params=pltpu.CompilerParams(
            dimension_semantics=("parallel",)),
    )(x_cl, w_cl, b_arr)

    # Back to the module's (b_i, b_j, O, H_out, W_out) output layout.
    return jnp.transpose(out_cl, (0, 1, 4, 2, 3))


def batch_conv2d_reference(x, weight, bias=None, *, stride=1, padding=0,
                           dilation=1):
    """Pure-JAX reference of BatchConv2DLayer.forward."""
    def conv_one(xi, wi):
        return jax.lax.conv_general_dilated(
            xi, wi,
            window_strides=(stride, stride),
            padding=((padding, padding), (padding, padding)),
            rhs_dilation=(dilation, dilation),
            dimension_numbers=("NCHW", "OIHW", "NCHW"),
            precision=jax.lax.Precision.HIGHEST)
    out = jax.vmap(conv_one)(x.astype(jnp.float32), weight.astype(jnp.float32))
    if bias is not None:
        out = out + bias[:, :, :, None, None]          # == unsqueeze(3).unsqueeze(3)
    return out


if __name__ == "__main__":
    # Small shapes consistent with the module: b_i=2 weight sets, b_j=2 images,
    # C=4, H=W=16, O=8, 3x3 kernel, stride=1, padding=1, dilation=1.
    b_i, b_j, c, h, w = 2, 2, 4, 16, 16
    out_c, kh, kw = 8, 3, 3
    stride, padding, dilation = 1, 1, 1

    key = jax.random.PRNGKey(0)
    kx, kwt, kb = jax.random.split(key, 3)
    x = jax.random.normal(kx, (b_i, b_j, c, h, w), jnp.float32)
    weight = jax.random.normal(kwt, (b_i, out_c, c, kh, kw), jnp.float32) * 0.1
    bias = jax.random.normal(kb, (b_i, 1, out_c), jnp.float32) * 0.1

    out = batch_conv2d(x, weight, bias, stride=stride, padding=padding,
                       dilation=dilation)
    out = jax.block_until_ready(out)

    ref = batch_conv2d_reference(x, weight, bias, stride=stride,
                                 padding=padding, dilation=dilation)
    assert out.shape == (b_i, b_j, out_c, h, w), out.shape
    assert jnp.allclose(out, ref, atol=1e-3, rtol=1e-3), "mismatch vs reference"

    print("KERNEL_OK")
</pallas_src>

<mosaic_0001>
module attributes {stable_mosaic.version = 11 : i64} {
  func.func @_batch_conv2d_kernel(%arg0: i32, %arg1: memref<1x2x18x18x4xf32, #tpu.memory_space<vmem>>, %arg2: memref<1x3x3x4x8xf32, #tpu.memory_space<vmem>>, %arg3: memref<1x1x8xf32, #tpu.memory_space<vmem>>, %arg4: memref<1x2x16x16x8xf32, #tpu.memory_space<vmem>>) attributes {dimension_semantics = [#tpu.dimension_semantics<parallel>], iteration_bounds = array<i64: 2>, scalar_prefetch = 0 : i64, scratch_operands = 0 : i64, tpu.core_type = #tpu.core_type<tc>, window_params = [{transform_indices = @transform_0, window_bounds = array<i64: 1, 2, 18, 18, 4>}, {transform_indices = @transform_1, window_bounds = array<i64: 1, 3, 3, 4, 8>}, {transform_indices = @transform_2, window_bounds = array<i64: 1, 1, 8>}, {transform_indices = @transform_3, window_bounds = array<i64: 1, 2, 16, 16, 8>}]} {
    %c0 = arith.constant 0 : index
    %c0_0 = arith.constant 0 : index
    %c0_1 = arith.constant 0 : index
    %c0_2 = arith.constant 0 : index
    %c0_3 = arith.constant 0 : index
    %0 = vector.load %arg1[%c0, %c0_0, %c0_1, %c0_2, %c0_3] : memref<1x2x18x18x4xf32, #tpu.memory_space<vmem>>, vector<1x2x18x18x4xf32>
    %1 = vector.shape_cast %0 : vector<1x2x18x18x4xf32> to vector<2x18x18x4xf32>
    %c0_4 = arith.constant 0 : index
    %c0_5 = arith.constant 0 : index
    %c0_6 = arith.constant 0 : index
    %c0_7 = arith.constant 0 : index
    %c0_8 = arith.constant 0 : index
    %2 = vector.load %arg2[%c0_4, %c0_5, %c0_6, %c0_7, %c0_8] : memref<1x3x3x4x8xf32, #tpu.memory_space<vmem>>, vector<1x3x3x4x8xf32>
    %3 = vector.shape_cast %2 : vector<1x3x3x4x8xf32> to vector<3x3x4x8xf32>
    %cst = arith.constant 0.000000e+00 : f32
    %4 = vector.broadcast %cst : f32 to vector<512x8xf32>
    %5 = vector.extract_strided_slice %1 {offsets = [0, 0, 0, 0], sizes = [2, 16, 16, 4], strides = [1, 1, 1, 1]} : vector<2x18x18x4xf32> to vector<2x16x16x4xf32>
    %6 = vector.shape_cast %5 : vector<2x16x16x4xf32> to vector<512x4xf32>
    %7 = vector.extract_strided_slice %3 {offsets = [0, 0, 0, 0], sizes = [1, 1, 4, 8], strides = [1, 1, 1, 1]} : vector<3x3x4x8xf32> to vector<1x1x4x8xf32>
    %8 = vector.shape_cast %7 : vector<1x1x4x8xf32> to vector<4x8xf32>
    %cst_9 = arith.constant dense<0.000000e+00> : vector<512x8xf32>
    %9 = tpu.matmul %6, %8, %cst_9 {dimension_numbers = #tpu.dot_dimension_numbers<[1], [0], [0], [1], [0, 0, 1, 1], [], []>} : vector<512x4xf32>, vector<4x8xf32>, vector<512x8xf32> -> vector<512x8xf32>
    %10 = arith.addf %4, %9 : vector<512x8xf32>
    %11 = vector.extract_strided_slice %1 {offsets = [0, 0, 1, 0], sizes = [2, 16, 16, 4], strides = [1, 1, 1, 1]} : vector<2x18x18x4xf32> to vector<2x16x16x4xf32>
    %12 = vector.shape_cast %11 : vector<2x16x16x4xf32> to vector<512x4xf32>
    %13 = vector.extract_strided_slice %3 {offsets = [0, 1, 0, 0], sizes = [1, 1, 4, 8], strides = [1, 1, 1, 1]} : vector<3x3x4x8xf32> to vector<1x1x4x8xf32>
    %14 = vector.shape_cast %13 : vector<1x1x4x8xf32> to vector<4x8xf32>
    %cst_10 = arith.constant dense<0.000000e+00> : vector<512x8xf32>
    %15 = tpu.matmul %12, %14, %cst_10 {dimension_numbers = #tpu.dot_dimension_numbers<[1], [0], [0], [1], [0, 0, 1, 1], [], []>} : vector<512x4xf32>, vector<4x8xf32>, vector<512x8xf32> -> vector<512x8xf32>
    %16 = arith.addf %10, %15 : vector<512x8xf32>
    %17 = vector.extract_strided_slice %1 {offsets = [0, 0, 2, 0], sizes = [2, 16, 16, 4], strides = [1, 1, 1, 1]} : vector<2x18x18x4xf32> to vector<2x16x16x4xf32>
    %18 = vector.shape_cast %17 : vector<2x16x16x4xf32> to vector<512x4xf32>
    %19 = vector.extract_strided_slice %3 {offsets = [0, 2, 0, 0], sizes = [1, 1, 4, 8], strides = [1, 1, 1, 1]} : vector<3x3x4x8xf32> to vector<1x1x4x8xf32>
    %20 = vector.shape_cast %19 : vector<1x1x4x8xf32> to vector<4x8xf32>
    %cst_11 = arith.constant dense<0.000000e+00> : vector<512x8xf32>
    %21 = tpu.matmul %18, %20, %cst_11 {dimension_numbers = #tpu.dot_dimension_numbers<[1], [0], [0], [1], [0, 0, 1, 1], [], []>} : vector<512x4xf32>, vector<4x8xf32>, vector<512x8xf32> -> vector<512x8xf32>
    %22 = arith.addf %16, %21 : vector<512x8xf32>
    %23 = vector.extract_strided_slice %1 {offsets = [0, 1, 0, 0], sizes = [2, 16, 16, 4], strides = [1, 1, 1, 1]} : vector<2x18x18x4xf32> to vector<2x16x16x4xf32>
    %24 = vector.shape_cast %23 : vector<2x16x16x4xf32> to vector<512x4xf32>
    %25 = vector.extract_strided_slice %3 {offsets = [1, 0, 0, 0], sizes = [1, 1, 4, 8], strides = [1, 1, 1, 1]} : vector<3x3x4x8xf32> to vector<1x1x4x8xf32>
    %26 = vector.shape_cast %25 : vector<1x1x4x8xf32> to vector<4x8xf32>
    %cst_12 = arith.constant dense<0.000000e+00> : vector<512x8xf32>
    %27 = tpu.matmul %24, %26, %cst_12 {dimension_numbers = #tpu.dot_dimension_numbers<[1], [0], [0], [1], [0, 0, 1, 1], [], []>} : vector<512x4xf32>, vector<4x8xf32>, vector<512x8xf32> -> vector<512x8xf32>
    %28 = arith.addf %22, %27 : vector<512x8xf32>
    %29 = vector.extract_strided_slice %1 {offsets = [0, 1, 1, 0], sizes = [2, 16, 16, 4], strides = [1, 1, 1, 1]} : vector<2x18x18x4xf32> to vector<2x16x16x4xf32>
    %30 = vector.shape_cast %29 : vector<2x16x16x4xf32> to vector<512x4xf32>
    %31 = vector.extract_strided_slice %3 {offsets = [1, 1, 0, 0], sizes = [1, 1, 4, 8], strides = [1, 1, 1, 1]} : vector<3x3x4x8xf32> to vector<1x1x4x8xf32>
    %32 = vector.shape_cast %31 : vector<1x1x4x8xf32> to vector<4x8xf32>
    %cst_13 = arith.constant dense<0.000000e+00> : vector<512x8xf32>
    %33 = tpu.matmul %30, %32, %cst_13 {dimension_numbers = #tpu.dot_dimension_numbers<[1], [0], [0], [1], [0, 0, 1, 1], [], []>} : vector<512x4xf32>, vector<4x8xf32>, vector<512x8xf32> -> vector<512x8xf32>
    %34 = arith.addf %28, %33 : vector<512x8xf32>
    %35 = vector.extract_strided_slice %1 {offsets = [0, 1, 2, 0], sizes = [2, 16, 16, 4], strides = [1, 1, 1, 1]} : vector<2x18x18x4xf32> to vector<2x16x16x4xf32>
    %36 = vector.shape_cast %35 : vector<2x16x16x4xf32> to vector<512x4xf32>
    %37 = vector.extract_strided_slice %3 {offsets = [1, 2, 0, 0], sizes = [1, 1, 4, 8], strides = [1, 1, 1, 1]} : vector<3x3x4x8xf32> to vector<1x1x4x8xf32>
    %38 = vector.shape_cast %37 : vector<1x1x4x8xf32> to vector<4x8xf32>
    %cst_14 = arith.constant dense<0.000000e+00> : vector<512x8xf32>
    %39 = tpu.matmul %36, %38, %cst_14 {dimension_numbers = #tpu.dot_dimension_numbers<[1], [0], [0], [1], [0, 0, 1, 1], [], []>} : vector<512x4xf32>, vector<4x8xf32>, vector<512x8xf32> -> vector<512x8xf32>
    %40 = arith.addf %34, %39 : vector<512x8xf32>
    %41 = vector.extract_strided_slice %1 {offsets = [0, 2, 0, 0], sizes = [2, 16, 16, 4], strides = [1, 1, 1, 1]} : vector<2x18x18x4xf32> to vector<2x16x16x4xf32>
    %42 = vector.shape_cast %41 : vector<2x16x16x4xf32> to vector<512x4xf32>
    %43 = vector.extract_strided_slice %3 {offsets = [2, 0, 0, 0], sizes = [1, 1, 4, 8], strides = [1, 1, 1, 1]} : vector<3x3x4x8xf32> to vector<1x1x4x8xf32>
    %44 = vector.shape_cast %43 : vector<1x1x4x8xf32> to vector<4x8xf32>
    %cst_15 = arith.constant dense<0.000000e+00> : vector<512x8xf32>
    %45 = tpu.matmul %42, %44, %cst_15 {dimension_numbers = #tpu.dot_dimension_numbers<[1], [0], [0], [1], [0, 0, 1, 1], [], []>} : vector<512x4xf32>, vector<4x8xf32>, vector<512x8xf32> -> vector<512x8xf32>
    %46 = arith.addf %40, %45 : vector<512x8xf32>
    %47 = vector.extract_strided_slice %1 {offsets = [0, 2, 1, 0], sizes = [2, 16, 16, 4], strides = [1, 1, 1, 1]} : vector<2x18x18x4xf32> to vector<2x16x16x4xf32>
    %48 = vector.shape_cast %47 : vector<2x16x16x4xf32> to vector<512x4xf32>
    %49 = vector.extract_strided_slice %3 {offsets = [2, 1, 0, 0], sizes = [1, 1, 4, 8], strides = [1, 1, 1, 1]} : vector<3x3x4x8xf32> to vector<1x1x4x8xf32>
    %50 = vector.shape_cast %49 : vector<1x1x4x8xf32> to vector<4x8xf32>
    %cst_16 = arith.constant dense<0.000000e+00> : vector<512x8xf32>
    %51 = tpu.matmul %48, %50, %cst_16 {dimension_numbers = #tpu.dot_dimension_numbers<[1], [0], [0], [1], [0, 0, 1, 1], [], []>} : vector<512x4xf32>, vector<4x8xf32>, vector<512x8xf32> -> vector<512x8xf32>
    %52 = arith.addf %46, %51 : vector<512x8xf32>
    %53 = vector.extract_strided_slice %1 {offsets = [0, 2, 2, 0], sizes = [2, 16, 16, 4], strides = [1, 1, 1, 1]} : vector<2x18x18x4xf32> to vector<2x16x16x4xf32>
    %54 = vector.shape_cast %53 : vector<2x16x16x4xf32> to vector<512x4xf32>
    %55 = vector.extract_strided_slice %3 {offsets = [2, 2, 0, 0], sizes = [1, 1, 4, 8], strides = [1, 1, 1, 1]} : vector<3x3x4x8xf32> to vector<1x1x4x8xf32>
    %56 = vector.shape_cast %55 : vector<1x1x4x8xf32> to vector<4x8xf32>
    %cst_17 = arith.constant dense<0.000000e+00> : vector<512x8xf32>
    %57 = tpu.matmul %54, %56, %cst_17 {dimension_numbers = #tpu.dot_dimension_numbers<[1], [0], [0], [1], [0, 0, 1, 1], [], []>} : vector<512x4xf32>, vector<4x8xf32>, vector<512x8xf32> -> vector<512x8xf32>
    %58 = arith.addf %52, %57 : vector<512x8xf32>
    %c0_18 = arith.constant 0 : index
    %c0_19 = arith.constant 0 : index
    %c0_20 = arith.constant 0 : index
    %59 = vector.load %arg3[%c0_18, %c0_19, %c0_20] : memref<1x1x8xf32, #tpu.memory_space<vmem>>, vector<1x1x8xf32>
    %60 = vector.shape_cast %59 : vector<1x1x8xf32> to vector<1x8xf32>
    %61 = vector.broadcast %60 : vector<1x8xf32> to vector<512x8xf32>
    %62 = arith.addf %58, %61 : vector<512x8xf32>
    %63 = vector.shape_cast %62 : vector<512x8xf32> to vector<2x16x16x8xf32>
    %c0_21 = arith.constant 0 : index
    %c0_22 = arith.constant 0 : index
    %c0_23 = arith.constant 0 : index
    %c0_24 = arith.constant 0 : index
    %c0_25 = arith.constant 0 : index
    %64 = vector.load %arg4[%c0_21, %c0_22, %c0_23, %c0_24, %c0_25] : memref<1x2x16x16x8xf32, #tpu.memory_space<vmem>>, vector<1x2x16x16x8xf32>
    %65 = vector.shape_cast %64 : vector<1x2x16x16x8xf32> to vector<2x16x16x8xf32>
    %66 = vector.shape_cast %63 : vector<2x16x16x8xf32> to vector<1x2x16x16x8xf32>
    tpu.vector_store %arg4[%c0_21, %c0_22, %c0_23, %c0_24, %c0_25], %66 {strides = array<i32>} : memref<1x2x16x16x8xf32, #tpu.memory_space<vmem>>, vector<1x2x16x16x8xf32>,
    return
  }
  func.func @transform_0(%arg0: i32) -> (i32, i32, i32, i32, i32) {
    %c0_i32 = arith.constant 0 : i32
    %c0_i32_0 = arith.constant 0 : i32
    %c0_i32_1 = arith.constant 0 : i32
    %c0_i32_2 = arith.constant 0 : i32
    %c0_i32_3 = arith.constant 0 : i32
    return %arg0, %c0_i32, %c0_i32_0, %c0_i32_1, %c0_i32_2 : i32, i32, i32, i32, i32
  }
  func.func @transform_1(%arg0: i32) -> (i32, i32, i32, i32, i32) {
    %c0_i32 = arith.constant 0 : i32
    %c0_i32_0 = arith.constant 0 : i32
    %c0_i32_1 = arith.constant 0 : i32
    %c0_i32_2 = arith.constant 0 : i32
    %c0_i32_3 = arith.constant 0 : i32
    return %arg0, %c0_i32, %c0_i32_0, %c0_i32_1, %c0_i32_2 : i32, i32, i32, i32, i32
  }
  func.func @transform_2(%arg0: i32) -> (i32, i32, i32) {
    %c0_i32 = arith.constant 0 : i32
    %c0_i32_0 = arith.constant 0 : i32
    %c0_i32_1 = arith.constant 0 : i32
    return %arg0, %c0_i32, %c0_i32_0 : i32, i32, i32
  }
  func.func @transform_3(%arg0: i32) -> (i32, i32, i32, i32, i32) {
    %c0_i32 = arith.constant 0 : i32
    %c0_i32_0 = arith.constant 0 : i32
    %c0_i32_1 = arith.constant 0 : i32
    %c0_i32_2 = arith.constant 0 : i32
    %c0_i32_3 = arith.constant 0 : i32
    return %arg0, %c0_i32, %c0_i32_0, %c0_i32_1, %c0_i32_2 : i32, i32, i32, i32, i32
  }
}

</mosaic_0001>

<bundles_post_ra>
// kernel: tpu_custom_call.1
= control target key start
LH: loop header
LB: loop body
LE: loop exit
PB: predicated region body
PF: predicated region fallthrough
CT: control target
= control target key end

     0   :  { %s7543_s12 = smov 0   ;;  %s10799_s0 = inlined_call_operand.vmem [shape: f32[2,2,18,18,4], index: 0, kind: input, shape index: {}]   ;;  %s10800_s1 = inlined_call_operand.vmem [shape: f32[2,3,3,4,8], index: 1, kind: input, shape index: {}]   ;;  %s10801_s2 = inlined_call_operand.vmem [shape: f32[2,1,8], index: 2, kind: input, shape index: {}]   ;;  %s10802_s3 = inlined_call_operand.vmem [shape: f32[2,2,16,16,8], index: 3, kind: output, shape index: {}]  }
   0x1 LB: > { %s5378_s13 = sadd.s32 4294967295, %s7521_s12   ;;  %p5382_p0 = scmp.ge.s32.totalorder %s7521_s12, 1  ;;  %s7521_s12 = sphi %s7543_s12, %s13_s12  }
   0x2   : > { %p155_p1 = scmp.lt.s32.totalorder %s7521_s12, 3 }
   0x4   : > { %p156_p2 = pnand %p5382_p0, %p155_p1 }
   0x6   : > { %159 = sbr.rel (%p156_p2) target bundleno = 798 (0x31e), region = 32 }
   0xb   : > { %p187_p3 = scmp.lt.s32.totalorder %s5378_s13, 1  ;;  %vm708_vm0 = vcmask 1043456   ;;  %vm418_vm1 = vcmask 1046528   ;;  %vm579_vm2 = vcmask 31744   ;;  %vm1613_vm3 = vcmask 1045504  }
   0xc   : > { %vm5237_vm4 = vcmask 64512  }
   0xd   : > { %s11881_s13 = smov (!%p187_p3, %s5378_s13), 1 }
   0xe   : > { %s7446_s14 = smul.u32 36, %s11881_s13  ;;  %s199_s24 = scalar_lea.vmem %s10801_s2, %s11881_s13 }
   0xf   : > { %s7445_s15 = smul.u32 864, %s11881_s13  ;;  %s5975_s25 = sshll.u32 %s11881_s13, 9 }
  0x10   : > { %s7558_s18 = scalar_lea.vmem %s10800_s1, %s7446_s14  ;;  %s10540_s28 = scalar_lea.vmem %s10802_s3, %s5975_s25 }
  0x11   : > { %v314_v0 = vld [vmem:[%s7558_s18 + $0x4] sm:$0xf]  ;;  %s7564_s21 = scalar_lea.vmem %s10799_s0, %s7445_s15  ;;  %v313_v1 = vld [vmem:[%s7558_s18] sm:$0xf]  ;;  %v315_v2 = vld [vmem:[%s7558_s18 + $0x8] sm:$0xf] }
  0x12   : > { %7443 = vmatprep.subr.msk.mxu1 %vm708_vm0, %v314_v0  ;;  %6561 = vmatprep.subr.msk.mxu0 %vm708_vm0, %v314_v0  ;;  %v7571_v3 = vld [vmem:[%s7564_s21] sm:$0xff]  ;;  %v7574_v4 = vld [vmem:[%s7564_s21 + $0x8] sm:$0xff]  ;;  %v7577_v5 = vld [vmem:[%s7564_s21 + $0x1b0] sm:$0xff] }
  0x13   : > { %11146 = vst [vmem:[#allocation2_spill] sm:$0xff] %v7577_v5  ;;  %7444 = vmatpush3.msk.msra.mxu1 %vm708_vm0, %v314_v0  ;;  %6562 = vmatpush3.msk.msra.mxu0 %vm708_vm0, %v314_v0  ;;  %v419_v6 = vrot.slane %v7571_v3, 1  ;;  %v420_v7 = vrot.slane %v7574_v4, 1  ;;  %v7584_v8 = vld [vmem:[%s7564_s21 + $0x1b8] sm:$0xff]  ;;  %v499_v9 = vrot.slane %v7577_v5, 1  ;;  %v7603_v17 = vld [vmem:[%s7564_s21 + $0x20] sm:$0xff] }
  0x14   : > { %11147 = vst [vmem:[#allocation3_spill] sm:$0xff] %v7584_v8  ;;  %v7588_v10 = vld [vmem:[%s7564_s21 + $0x10] sm:$0x3]  ;;  %v500_v11 = vrot.slane %v7584_v8, 1  ;;  %6659 = vmatprep.subr.msk.mxu1 %vm708_vm0, %v313_v1  ;;  %v7594_v13 = vld [vmem:[%s7564_s21 + $0x1c0] sm:$0x3]  ;;  %6757 = vmatprep.subr.msk.mxu0 %vm708_vm0, %v315_v2 }
  0x15   : > { %v422_v12 = vrot.slane %v7588_v10, 1  ;;  %11148 = vst [vmem:[#allocation4_spill] sm:$0xff] %v7594_v13  ;;  %v7598_v14 = vld [vmem:[%s7564_s21 + $0x18] sm:$0xff]  ;;  %v421_v15 = vsel %vm418_vm1, %v419_v6, %v420_v7  ;;  %v502_v16 = vrot.slane %v7594_v13, 1  ;;  %v7607_v19 = vld [vmem:[%s7564_s21 + $0x1c8] sm:$0xff]  ;;  %v7610_v20 = vld [vmem:[%s7564_s21 + $0x1d0] sm:$0xff] }
  0x16   : > { %v424_v18 = vrot.slane %v7598_v14, 1  ;;  %11149 = vst [vmem:[#allocation5_spill] sm:$0xff] %v7607_v19  ;;  %11150 = vst [vmem:[#allocation6_spill] sm:$0xff] %v7610_v20  ;;  %6563 = vmatprep.mubr.msk.f32.mxu0 %vm579_vm2, %v421_v15  ;;  %v501_v21 = vsel %vm418_vm1, %v499_v9, %v500_v11  ;;  %v425_v23 = vrot.slane %v7603_v17, 1  ;;  %v504_v24 = vrot.slane %v7607_v19, 1  ;;  %v7630_v31 = vld [vmem:[%s7564_s21 + $0x30] sm:$0xff] }
  0x17   : > { %v423_v22 = vsel %vm418_vm1, %v420_v7, %v422_v12  ;;  %v7618_v25 = vld [vmem:[%s7564_s21 + $0x28] sm:$0x3]  ;;  %v7621_v26 = vld [vmem:[%s7564_s21 + $0x1d8] sm:$0x3]  ;;  %6611 = vmatprep.mubr.msk.f32.mxu1 %vm579_vm2, %v501_v21  ;;  %v503_v27 = vsel %vm418_vm1, %v500_v11, %v502_v16  ;;  %v505_v28 = vrot.slane %v7610_v20, 1  ;;  %v7636_v33 = vld [vmem:[%s7564_s21 + $0x1e0] sm:$0xff] }
  0x18   : > { %11151 = vst [vmem:[#allocation7_spill] sm:$0xff] %v7621_v26  ;;  %6564 = vmatmul.mubr.msk.f32.vlgmr.msra.gmra.mxu0 %vm579_vm2, %v423_v22  ;;  %v427_v29 = vrot.slane %v7618_v25, 1  ;;  %v507_v30 = vrot.slane %v7621_v26, 1  ;;  %v7633_v32 = vld [vmem:[%s7564_s21 + $0x38] sm:$0xff]  ;;  %11152 = vst [vmem:[#allocation8_spill] sm:$0xff] %v7636_v33  ;;  %6612 = vmatmul.mubr.msk.f32.vlgmr.msra.gmra.mxu1 %vm579_vm2, %v503_v27  ;;  %v7641_v34 = vsel %vm418_vm1, %v424_v18, %v425_v23  ;;  %v429_v35 = vrot.slane %v7630_v31, 1 }
  0x19   : > { %6758 = vmatpush3.msk.msra.mxu0 %vm708_vm0, %v315_v2  ;;  %11153 = vst [vmem:[#allocation9_spill] sm:$0xff] %v7641_v34  ;;  %v430_v36 = vrot.slane %v7633_v32, 1  ;;  %v7646_v37 = vld [vmem:[%s7564_s21 + $0x1e8] sm:$0xff]  ;;  %v509_v38 = vrot.slane %v7636_v33, 1  ;;  %v7650_v39 = vld [vmem:[%s7564_s21 + $0x40] sm:$0x3]  ;;  %6660 = vmatpush3.msk.msra.mxu1 %vm708_vm0, %v313_v1  ;;  %v7656_v40 = vsel %vm418_vm1, %v504_v24, %v505_v28 }
  0x1a   : > { %11154 = vst [vmem:[#allocation10_spill] sm:$0xff] %v7646_v37  ;;  %6566 = vmatprep.mubr.msk.f32.mxu0 %vm579_vm2, %v7641_v34  ;;  %11155 = vst [vmem:[#allocation11_spill] sm:$0xff] %v7656_v40  ;;  %v7659_v41 = vsel %vm418_vm1, %v425_v23, %v427_v29  ;;  %v7662_v42 = vsel %vm418_vm1, %v505_v28, %v507_v30  ;;  %v510_v43 = vrot.slane %v7646_v37, 1  ;;  %v7666_v44 = vld [vmem:[%s7564_s21 + $0x1f0] sm:$0x3]  ;;  %v7669_v45 = vld [vmem:[%s7564_s21 + $0x48] sm:$0xff]  ;;  %6614 = vmatprep.mubr.msk.f32.mxu1 %vm579_vm2, %v7656_v40 }
  0x1b   : > { %11156 = vst [vmem:[#allocation12_spill] sm:$0xff] %v7659_v41  ;;  %11157 = vst [vmem:[#allocation13_spill] sm:$0xff] %v7662_v42  ;;  %v7672_v46 = vld [vmem:[%s7564_s21 + $0x50] sm:$0xff]  ;;  %v7677_v47 = vsel %vm418_vm1, %v429_v35, %v430_v36  ;;  %v432_v48 = vrot.slane %v7650_v39, 1  ;;  %v512_v49 = vrot.slane %v7666_v44, 1  ;;  %v434_v50 = vrot.slane %v7669_v45, 1 }
  0x1c   : > { %11158 = vst [vmem:[#allocation14_spill] sm:$0xff] %v7666_v44  ;;  %11159 = vst [vmem:[#allocation15_spill] sm:$0xff] %v7677_v47  ;;  %v7683_v51 = vld [vmem:[%s7564_s21 + $0x1f8] sm:$0xff]  ;;  %v7686_v52 = vld [vmem:[%s7564_s21 + $0x200] sm:$0xff]  ;;  %6567 = vmatmul.mubr.msk.f32.gmra.mxu0 %vm579_vm2, %v7659_v41  ;;  %v7694_v54 = vsel %vm418_vm1, %v509_v38, %v510_v43  ;;  %v435_v55 = vrot.slane %v7672_v46, 1  ;;  %6615 = vmatmul.mubr.msk.f32.gmra.mxu1 %vm579_vm2, %v7662_v42 }
  0x1d   : > { %11160 = vst [vmem:[#allocation16_spill] sm:$0xff] %v7683_v51  ;;  %11161 = vst [vmem:[#allocation17_spill] sm:$0xff] %v7686_v52  ;;  %v7689_v53 = vld [vmem:[%s7564_s21 + $0x60] sm:$0xff]  ;;  %v514_v56 = vrot.slane %v7683_v51, 1  ;;  %v515_v57 = vrot.slane %v7686_v52, 1  ;;  %v7703_v59 = vld [vmem:[%s7564_s21 + $0x68] sm:$0xff]  ;;  %6569 = vmatprep.mubr.msk.f32.mxu0 %vm579_vm2, %v7677_v47  ;;  %v7710_v60 = vsel %vm418_vm1, %v430_v36, %v432_v48  ;;  %6617 = vmatprep.mubr.msk.f32.mxu1 %vm579_vm2, %v7694_v54 }
  0x1e   : > { %11162 = vst [vmem:[#allocation18_spill] sm:$0xff] %v7694_v54  ;;  %v7700_v58 = vld [vmem:[%s7564_s21 + $0x58] sm:$0x3]  ;;  %11163 = vst [vmem:[#allocation19_spill] sm:$0xff] %v7710_v60  ;;  %v7714_v62 = vld [vmem:[%s7564_s21 + $0x208] sm:$0x3]  ;;  %v7726_v2 = vsel %vm418_vm1, %v510_v43, %v512_v49  ;;  %v7729_v6 = vsel %vm418_vm1, %v434_v50, %v435_v55 }
  0x1f   : > { %v437_v61 = vrot.slane %v7700_v58, 1  ;;  %11164 = vst [vmem:[#allocation20_spill] sm:$0xff] %v7714_v62  ;;  %v439_v63 = vrot.slane %v7689_v53, 1  ;;  %v7718_v0 = vld [vmem:[%s7564_s21 + $0x210] sm:$0xff]  ;;  %v7721_v1 = vld [vmem:[%s7564_s21 + $0x218] sm:$0xff]  ;;  %11167 = vst [vmem:[#allocation23_spill] sm:$0xff] %v7726_v2  ;;  %v7740_v15 = vsel %vm418_vm1, %v514_v56, %v515_v57 }
  0x20   : > { %11165 = vst [vmem:[#allocation21_spill] sm:$0xff] %v7718_v0  ;;  %11166 = vst [vmem:[#allocation22_spill] sm:$0xff] %v7721_v1  ;;  %v517_v7 = vrot.slane %v7714_v62, 1  ;;  %v440_v9 = vrot.slane %v7703_v59, 1  ;;  %v7734_v11 = vld [vmem:[%s7564_s21 + $0x70] sm:$0x3]  ;;  %6570 = vmatmul.mubr.msk.f32.gmra.mxu0 %vm579_vm2, %v7710_v60  ;;  %6618 = vmatmul.mubr.msk.f32.gmra.mxu1 %vm579_vm2, %v7726_v2 }
  0x21   : > { %11168 = vst [vmem:[#allocation24_spill] sm:$0xff] %v7729_v6  ;;  %v7737_v12 = vld [vmem:[%s7564_s21 + $0x220] sm:$0x3]  ;;  %11170 = vst [vmem:[#allocation26_spill] sm:$0xff] %v7740_v15  ;;  %v519_v16 = vrot.slane %v7718_v0, 1  ;;  %v520_v18 = vrot.slane %v7721_v1, 1  ;;  %6572 = vmatprep.mubr.msk.f32.mxu0 %vm579_vm2, %v7729_v6  ;;  %v7763_v27 = vsel %vm418_vm1, %v435_v55, %v437_v61  ;;  %6620 = vmatprep.mubr.msk.f32.mxu1 %vm579_vm2, %v7740_v15 }
  0x22   : > { %11169 = vst [vmem:[#allocation25_spill] sm:$0xff] %v7737_v12  ;;  %v7745_v21 = vld [vmem:[%s7564_s21 + $0x78] sm:$0xff]  ;;  %v7748_v22 = vld [vmem:[%s7564_s21 + $0x80] sm:$0xff]  ;;  %v7753_v23 = vld [vmem:[%s7564_s21 + $0x228] sm:$0xff]  ;;  %v442_v28 = vrot.slane %v7734_v11, 1  ;;  %v522_v29 = vrot.slane %v7737_v12, 1  ;;  %v7770_v30 = vsel %vm418_vm1, %v515_v57, %v517_v7  ;;  %v7773_v35 = vsel %vm418_vm1, %v439_v63, %v440_v9 }
  0x23   : > { %11171 = vst [vmem:[#allocation27_spill] sm:$0xff] %v7753_v23  ;;  %v7756_v24 = vld [vmem:[%s7564_s21 + $0x230] sm:$0xff]  ;;  %11173 = vst [vmem:[#allocation29_spill] sm:$0xff] %v7763_v27  ;;  %v444_v36 = vrot.slane %v7745_v21, 1  ;;  %v445_v38 = vrot.slane %v7748_v22, 1  ;;  %v7784_v49 = vsel %vm418_vm1, %v519_v16, %v520_v18  ;;  %v524_v50 = vrot.slane %v7753_v23, 1 }
  0x24   : > { %11172 = vst [vmem:[#allocation28_spill] sm:$0xff] %v7756_v24  ;;  %11174 = vst [vmem:[#allocation30_spill] sm:$0xff] %v7770_v30  ;;  %v7778_v43 = vld [vmem:[%s7564_s21 + $0x88] sm:$0x3]  ;;  %v7781_v48 = vld [vmem:[%s7564_s21 + $0x238] sm:$0x3]  ;;  %6573 = vmatmul.mubr.msk.f32.gmra.mxu0 %vm579_vm2, %v7763_v27  ;;  %6621 = vmatmul.mubr.msk.f32.gmra.mxu1 %vm579_vm2, %v7770_v30  ;;  %v7807_v7 = vsel %vm418_vm1, %v440_v9, %v442_v28  ;;  %v7814_v2 = vsel %vm418_vm1, %v520_v18, %v522_v29 }
  0x25   : > { %11175 = vst [vmem:[#allocation31_spill] sm:$0xff] %v7773_v35  ;;  %11176 = vst [vmem:[#allocation32_spill] sm:$0xff] %v7781_v48  ;;  %v525_v55 = vrot.slane %v7756_v24, 1  ;;  %v7789_v56 = vld [vmem:[%s7564_s21 + $0x90] sm:$0xff]  ;;  %v7792_v57 = vld [vmem:[%s7564_s21 + $0x98] sm:$0xff]  ;;  %6575 = vmatprep.mubr.msk.f32.mxu0 %vm579_vm2, %v7773_v35  ;;  %v447_v16 = vrot.slane %v7778_v43, 1  ;;  %6623 = vmatprep.mubr.msk.f32.mxu1 %vm579_vm2, %v7784_v49  ;;  %v7817_v30 = vsel %vm418_vm1, %v444_v36, %v445_v38 }
  0x26   : > { %11177 = vst [vmem:[#allocation33_spill] sm:$0xff] %v7784_v49  ;;  %v7797_v61 = vld [vmem:[%s7564_s21 + $0x240] sm:$0xff]  ;;  %v7800_v63 = vld [vmem:[%s7564_s21 + $0x248] sm:$0xff]  ;;  %11180 = vst [vmem:[#allocation36_spill] sm:$0xff] %v7807_v7  ;;  %v527_v15 = vrot.slane %v7781_v48, 1  ;;  %v449_v54 = vrot.slane %v7789_v56, 1 }
  0x27   : > { %11178 = vst [vmem:[#allocation34_spill] sm:$0xff] %v7797_v61  ;;  %11179 = vst [vmem:[#allocation35_spill] sm:$0xff] %v7800_v63  ;;  %v450_v9 = vrot.slane %v7792_v57, 1  ;;  %v7822_v28 = vld [vmem:[%s7564_s21 + $0xa0] sm:$0x3]  ;;  %v7828_v40 = vsel %vm418_vm1, %v524_v50, %v525_v55  ;;  %v529_v35 = vrot.slane %v7797_v61, 1  ;;  %v7851_v50 = vsel %vm418_vm1, %v445_v38, %v447_v16 }
  0x28   : > { %11181 = vst [vmem:[#allocation37_spill] sm:$0xff] %v7814_v2  ;;  %11182 = vst [vmem:[#allocation38_spill] sm:$0xff] %v7817_v30  ;;  %v7825_v42 = vld [vmem:[%s7564_s21 + $0x250] sm:$0x3]  ;;  %v530_v49 = vrot.slane %v7800_v63, 1  ;;  %v7833_v18 = vld [vmem:[%s7564_s21 + $0xa8] sm:$0xff]  ;;  %6576 = vmatmul.mubr.msk.f32.gmra.mxu0 %vm579_vm2, %v7807_v7  ;;  %6624 = vmatmul.mubr.msk.f32.gmra.mxu1 %vm579_vm2, %v7814_v2  ;;  %v7858_v60 = vsel %vm418_vm1, %v525_v55, %v527_v15 }
  0x29   : > { %11183 = vst [vmem:[#allocation39_spill] sm:$0xff] %v7825_v42  ;;  %11184 = vst [vmem:[#allocation40_spill] sm:$0xff] %v7828_v40  ;;  %v7836_v29 = vld [vmem:[%s7564_s21 + $0xb0] sm:$0xff]  ;;  %v7841_v36 = vld [vmem:[%s7564_s21 + $0x258] sm:$0xff]  ;;  %6578 = vmatprep.mubr.msk.f32.mxu0 %vm579_vm2, %v7817_v30  ;;  %v452_v6 = vrot.slane %v7822_v28, 1  ;;  %v532_v7 = vrot.slane %v7825_v42, 1  ;;  %6626 = vmatprep.mubr.msk.f32.mxu1 %vm579_vm2, %v7828_v40  ;;  %v7861_v2 = vsel %vm418_vm1, %v449_v54, %v450_v9 }
  0x2a   : > { %11185 = vst [vmem:[#allocation41_spill] sm:$0xff] %v7841_v36  ;;  %v7844_v27 = vld [vmem:[%s7564_s21 + $0x260] sm:$0xff]  ;;  %11187 = vst [vmem:[#allocation43_spill] sm:$0xff] %v7851_v50  ;;  %v454_v30 = vrot.slane %v7833_v18, 1  ;;  %v455_v38 = vrot.slane %v7836_v29, 1  ;;  %v7872_v41 = vsel %vm418_vm1, %v529_v35, %v530_v49  ;;  %v534_v34 = vrot.slane %v7841_v36, 1 }
  0x2b   : > { %11186 = vst [vmem:[#allocation42_spill] sm:$0xff] %v7844_v27  ;;  %11188 = vst [vmem:[#allocation44_spill] sm:$0xff] %v7858_v60  ;;  %v7866_v16 = vld [vmem:[%s7564_s21 + $0xb8] sm:$0x3]  ;;  %v7869_v47 = vld [vmem:[%s7564_s21 + $0x268] sm:$0x3]  ;;  %v7895_v35 = vsel %vm418_vm1, %v450_v9, %v452_v6  ;;  %v7902_v36 = vsel %vm418_vm1, %v530_v49, %v532_v7 }
  0x2c   : > { %11189 = vst [vmem:[#allocation45_spill] sm:$0xff] %v7861_v2  ;;  %11190 = vst [vmem:[#allocation46_spill] sm:$0xff] %v7869_v47  ;;  %v535_v40 = vrot.slane %v7844_v27, 1  ;;  %v7877_v15 = vld [vmem:[%s7564_s21 + $0xc0] sm:$0xff]  ;;  %v7880_v54 = vld [vmem:[%s7564_s21 + $0xc8] sm:$0xff]  ;;  %6579 = vmatmul.mubr.msk.f32.gmra.mxu0 %vm579_vm2, %v7851_v50  ;;  %6627 = vmatmul.mubr.msk.f32.gmra.mxu1 %vm579_vm2, %v7858_v60  ;;  %v457_v27 = vrot.slane %v7866_v16, 1  ;;  %v7905_v60 = vsel %vm418_vm1, %v454_v30, %v455_v38 }
  0x2d   : > { %11191 = vst [vmem:[#allocation47_spill] sm:$0xff] %v7872_v41  ;;  %v7885_v55 = vld [vmem:[%s7564_s21 + $0x270] sm:$0xff]  ;;  %v7888_v42 = vld [vmem:[%s7564_s21 + $0x278] sm:$0xff]  ;;  %6581 = vmatprep.mubr.msk.f32.mxu0 %vm579_vm2, %v7861_v2  ;;  %11194 = vst [vmem:[#allocation50_spill] sm:$0xff] %v7895_v35  ;;  %v537_v50 = vrot.slane %v7869_v47, 1  ;;  %6629 = vmatprep.mubr.msk.f32.mxu1 %vm579_vm2, %v7872_v41  ;;  %v459_v2 = vrot.slane %v7877_v15, 1 }
  0x2e   : > { %11192 = vst [vmem:[#allocation48_spill] sm:$0xff] %v7885_v55  ;;  %11193 = vst [vmem:[#allocation49_spill] sm:$0xff] %v7888_v42  ;;  %v460_v6 = vrot.slane %v7880_v54, 1  ;;  %v7910_v9 = vld [vmem:[%s7564_s21 + $0xd0] sm:$0x3]  ;;  %v7913_v63 = vsel %vm418_vm1, %v534_v34, %v535_v40  ;;  %v539_v47 = vrot.slane %v7885_v55, 1  ;;  %v7939_v34 = vsel %vm418_vm1, %v455_v38, %v457_v27 }
  0x2f   : > { %11195 = vst [vmem:[#allocation51_spill] sm:$0xff] %v7902_v36  ;;  %11196 = vst [vmem:[#allocation52_spill] sm:$0xff] %v7905_v60  ;;  %v540_v41 = vrot.slane %v7888_v42, 1  ;;  %v7918_v61 = vld [vmem:[%s7564_s21 + $0x280] sm:$0x3]  ;;  %v7921_v49 = vld [vmem:[%s7564_s21 + $0xd8] sm:$0xff]  ;;  %v7942_v42 = vsel %vm418_vm1, %v535_v40, %v537_v50 }
  0x30   : > { %11197 = vst [vmem:[#allocation53_spill] sm:$0xff] %v7913_v63  ;;  %11198 = vst [vmem:[#allocation54_spill] sm:$0xff] %v7918_v61  ;;  %v7924_v30 = vld [vmem:[%s7564_s21 + $0xe0] sm:$0xff]  ;;  %6582 = vmatmul.mubr.msk.f32.gmra.mxu0 %vm579_vm2, %v7895_v35  ;;  %v7929_v7 = vld [vmem:[%s7564_s21 + $0x288] sm:$0xff]  ;;  %6630 = vmatmul.mubr.msk.f32.gmra.mxu1 %vm579_vm2, %v7902_v36  ;;  %v462_v35 = vrot.slane %v7910_v9, 1  ;;  %v7951_v36 = vsel %vm418_vm1, %v459_v2, %v460_v6  ;;  %v464_v27 = vrot.slane %v7921_v49, 1 }
  0x31   : > { %11199 = vst [vmem:[#allocation55_spill] sm:$0xff] %v7929_v7  ;;  %v7932_v48 = vld [vmem:[%s7564_s21 + $0x290] sm:$0xff]  ;;  %6584 = vmatprep.mubr.msk.f32.mxu0 %vm579_vm2, %v7905_v60  ;;  %11201 = vst [vmem:[#allocation57_spill] sm:$0xff] %v7939_v34  ;;  %v7946_v55 = vld [vmem:[%s7564_s21 + $0xe8] sm:$0x3]  ;;  %6632 = vmatprep.mubr.msk.f32.mxu1 %vm579_vm2, %v7913_v63  ;;  %v542_v60 = vrot.slane %v7918_v61, 1  ;;  %v7960_v40 = vsel %vm418_vm1, %v539_v47, %v540_v41 }
  0x32   : > { %11200 = vst [vmem:[#allocation56_spill] sm:$0xff] %v7932_v48  ;;  %11202 = vst [vmem:[#allocation58_spill] sm:$0xff] %v7942_v42  ;;  %v465_v38 = vrot.slane %v7924_v30, 1  ;;  %v7957_v24 = vld [vmem:[%s7564_s21 + $0x298] sm:$0x3]  ;;  %v544_v50 = vrot.slane %v7929_v7, 1  ;;  %v7983_v47 = vsel %vm418_vm1, %v460_v6, %v462_v35 }
  0x33   : > { %11203 = vst [vmem:[#allocation59_spill] sm:$0xff] %v7951_v36  ;;  %11204 = vst [vmem:[#allocation60_spill] sm:$0xff] %v7957_v24  ;;  %v545_v23 = vrot.slane %v7932_v48, 1  ;;  %v7965_v63 = vld [vmem:[%s7564_s21 + $0xf0] sm:$0xff]  ;;  %v7968_v2 = vld [vmem:[%s7564_s21 + $0xf8] sm:$0xff]  ;;  %v467_v48 = vrot.slane %v7946_v55, 1  ;;  %v7990_v7 = vsel %vm418_vm1, %v540_v41, %v542_v60 }
  0x34   : > { %11205 = vst [vmem:[#allocation61_spill] sm:$0xff] %v7960_v40  ;;  %6585 = vmatmul.mubr.msk.f32.gmra.mxu0 %vm579_vm2, %v7939_v34  ;;  %v7973_v61 = vld [vmem:[%s7564_s21 + $0x2a0] sm:$0xff]  ;;  %v7976_v12 = vld [vmem:[%s7564_s21 + $0x2a8] sm:$0xff]  ;;  %6633 = vmatmul.mubr.msk.f32.gmra.mxu1 %vm579_vm2, %v7942_v42  ;;  %11208 = vst [vmem:[#allocation64_spill] sm:$0xff] %v7983_v47  ;;  %v547_v34 = vrot.slane %v7957_v24, 1  ;;  %v7993_v42 = vsel %vm418_vm1, %v464_v27, %v465_v38  ;;  %v470_v35 = vrot.slane %v7968_v2, 1 }
  0x35   : > { %11206 = vst [vmem:[#allocation62_spill] sm:$0xff] %v7973_v61  ;;  %11207 = vst [vmem:[#allocation63_spill] sm:$0xff] %v7976_v12  ;;  %6587 = vmatprep.mubr.msk.f32.mxu0 %vm579_vm2, %v7951_v36  ;;  %6635 = vmatprep.mubr.msk.f32.mxu1 %vm579_vm2, %v7960_v40  ;;  %v469_v36 = vrot.slane %v7965_v63, 1  ;;  %v7998_v6 = vld [vmem:[%s7564_s21 + $0x100] sm:$0x3]  ;;  %v8001_v1 = vsel %vm418_vm1, %v544_v50, %v545_v23  ;;  %v549_v24 = vrot.slane %v7973_v61, 1 }
  0x36   : > { %11209 = vst [vmem:[#allocation65_spill] sm:$0xff] %v7990_v7  ;;  %11210 = vst [vmem:[#allocation66_spill] sm:$0xff] %v7993_v42  ;;  %v550_v40 = vrot.slane %v7976_v12, 1  ;;  %v8006_v41 = vld [vmem:[%s7564_s21 + $0x2b0] sm:$0x3]  ;;  %v8009_v60 = vld [vmem:[%s7564_s21 + $0x108] sm:$0xff]  ;;  %v8030_v12 = vsel %vm418_vm1, %v465_v38, %v467_v48 }
  0x37   : > { %11211 = vst [vmem:[#allocation67_spill] sm:$0xff] %v8001_v1  ;;  %11212 = vst [vmem:[#allocation68_spill] sm:$0xff] %v8006_v41  ;;  %v8012_v27 = vld [vmem:[%s7564_s21 + $0x110] sm:$0xff]  ;;  %v8017_v0 = vld [vmem:[%s7564_s21 + $0x2b8] sm:$0xff]  ;;  %v472_v61 = vrot.slane %v7998_v6, 1  ;;  %v552_v48 = vrot.slane %v8006_v41, 1 }
  0x38   : > { %6588 = vmatmul.mubr.msk.f32.gmra.mxu0 %vm579_vm2, %v7983_v47  ;;  %11213 = vst [vmem:[#allocation69_spill] sm:$0xff] %v8017_v0  ;;  %v8020_v62 = vld [vmem:[%s7564_s21 + $0x2c0] sm:$0xff]  ;;  %v8023_v50 = vld [vmem:[%s7558_s18 + $0xc] sm:$0xf]  ;;  %6636 = vmatmul.mubr.msk.f32.gmra.mxu1 %vm579_vm2, %v7990_v7  ;;  %11215 = vst [vmem:[#allocation71_spill] sm:$0xff] %v8030_v12  ;;  %v8033_v47 = vsel %vm418_vm1, %v545_v23, %v547_v34  ;;  %v8045_v7 = vsel %vm418_vm1, %v469_v36, %v470_v35  ;;  %v474_v38 = vrot.slane %v8009_v60, 1 }
  0x39   : > { %11214 = vst [vmem:[#allocation70_spill] sm:$0xff] %v8020_v62  ;;  %6590 = vmatprep.mubr.msk.f32.mxu0 %vm579_vm2, %v7993_v42  ;;  %11216 = vst [vmem:[#allocation72_spill] sm:$0xff] %v8033_v47  ;;  %v8037_v52 = vld [vmem:[%s7564_s21 + $0x118] sm:$0x3]  ;;  %v8040_v51 = vld [vmem:[%s7558_s18 + $0x10] sm:$0xf]  ;;  %6638 = vmatprep.mubr.msk.f32.mxu1 %vm579_vm2, %v8001_v1  ;;  %v8056_v42 = vsel %vm418_vm1, %v549_v24, %v550_v40  ;;  %v8088_v33 = vsel %vm418_vm1, %v550_v40, %v552_v48 }
  0x3a   : > { %11217 = vst [vmem:[#allocation73_spill] sm:$0xff] %v8045_v7  ;;  %v475_v23 = vrot.slane %v8012_v27, 1  ;;  %v8051_v34 = vld [vmem:[%s7564_s21 + $0x2c8] sm:$0x3]  ;;  %6855 = vmatprep.subr.msk.mxu1 %vm708_vm0, %v8023_v50  ;;  %11219 = vst [vmem:[#allocation75_spill] sm:$0xff] %v8056_v42  ;;  %v554_v44 = vrot.slane %v8017_v0, 1  ;;  %6953 = vmatprep.subr.msk.mxu0 %vm708_vm0, %v8040_v51 }
  0x3b   : > { %11218 = vst [vmem:[#allocation74_spill] sm:$0xff] %v8051_v34  ;;  %v555_v1 = vrot.slane %v8020_v62, 1  ;;  %v8061_v36 = vld [vmem:[%s7564_s21 + $0x120] sm:$0xff]  ;;  %v8064_v41 = vld [vmem:[%s7564_s21 + $0x128] sm:$0xff]  ;;  %v8071_v37 = vld [vmem:[%s7564_s21 + $0x2d0] sm:$0xff]  ;;  %v8081_v62 = vsel %vm418_vm1, %v470_v35, %v472_v61  ;;  %v477_v0 = vrot.slane %v8037_v52, 1 }
  0x3c   : > { %6591 = vmatmul.mubr.msk.f32.gmra.mxu0 %vm579_vm2, %v8030_v12  ;;  %11220 = vst [vmem:[#allocation76_spill] sm:$0xff] %v8071_v37  ;;  %v8074_v24 = vld [vmem:[%s7564_s21 + $0x2d8] sm:$0xff]  ;;  %6639 = vmatmul.mubr.msk.f32.gmra.mxu1 %vm579_vm2, %v8033_v47  ;;  %11222 = vst [vmem:[#allocation78_spill] sm:$0xff] %v8081_v62  ;;  %v557_v12 = vrot.slane %v8051_v34, 1  ;;  %v8091_v47 = vsel %vm418_vm1, %v474_v38, %v475_v23  ;;  %v480_v61 = vrot.slane %v8064_v41, 1  ;;  %v559_v34 = vrot.slane %v8071_v37, 1 }
  0x3d   : > { %11221 = vst [vmem:[#allocation77_spill] sm:$0xff] %v8074_v24  ;;  %6593 = vmatprep.mubr.msk.f32.mxu0 %vm579_vm2, %v8045_v7  ;;  %6641 = vmatprep.mubr.msk.f32.mxu1 %vm579_vm2, %v8056_v42  ;;  %11223 = vst [vmem:[#allocation79_spill] sm:$0xff] %v8088_v33  ;;  %v479_v7 = vrot.slane %v8061_v36, 1  ;;  %v8096_v35 = vld [vmem:[%s7564_s21 + $0x130] sm:$0x3]  ;;  %v8099_v26 = vsel %vm418_vm1, %v554_v44, %v555_v1  ;;  %v560_v42 = vrot.slane %v8074_v24, 1 }
  0x3e   : > { %11224 = vst [vmem:[#allocation80_spill] sm:$0xff] %v8091_v47  ;;  %11225 = vst [vmem:[#allocation81_spill] sm:$0xff] %v8099_v26  ;;  %v8104_v20 = vld [vmem:[%s7564_s21 + $0x2e0] sm:$0x3]  ;;  %v8107_v40 = vld [vmem:[%s7564_s21 + $0x138] sm:$0xff]  ;;  %v8125_v44 = vsel %vm418_vm1, %v475_v23, %v477_v0  ;;  %v8128_v24 = vsel %vm418_vm1, %v555_v1, %v557_v12 }
  0x3f   : > { %11226 = vst [vmem:[#allocation82_spill] sm:$0xff] %v8104_v20  ;;  %11227 = vst [vmem:[#allocation83_spill] sm:$0xff] %v8107_v40  ;;  %v8110_v48 = vld [vmem:[%s7564_s21 + $0x140] sm:$0xff]  ;;  %v8115_v38 = vld [vmem:[%s7564_s21 + $0x2e8] sm:$0xff]  ;;  %v484_v0 = vrot.slane %v8107_v40, 1  ;;  %v8146_v1 = vsel %vm418_vm1, %v559_v34, %v560_v42 }
  0x40   : > { %11228 = vst [vmem:[#allocation84_spill] sm:$0xff] %v8110_v48  ;;  %6594 = vmatmul.mubr.msk.f32.gmra.mxu0 %vm579_vm2, %v8081_v62  ;;  %11229 = vst [vmem:[#allocation85_spill] sm:$0xff] %v8115_v38  ;;  %v8118_v19 = vld [vmem:[%s7564_s21 + $0x2f0] sm:$0xff]  ;;  %6642 = vmatmul.mubr.msk.f32.gmra.mxu1 %vm579_vm2, %v8088_v33  ;;  %v482_v62 = vrot.slane %v8096_v35, 1  ;;  %v8132_v37 = vld [vmem:[%s7564_s21 + $0x148] sm:$0x3]  ;;  %v8137_v33 = vsel %vm418_vm1, %v479_v7, %v480_v61 }
  0x41   : > { %11230 = vst [vmem:[#allocation86_spill] sm:$0xff] %v8118_v19  ;;  %6596 = vmatprep.mubr.msk.f32.mxu0 %vm579_vm2, %v8091_v47  ;;  %11231 = vst [vmem:[#allocation87_spill] sm:$0xff] %v8125_v44  ;;  %6644 = vmatprep.mubr.msk.f32.mxu1 %vm579_vm2, %v8099_v26  ;;  %v562_v47 = vrot.slane %v8104_v20, 1  ;;  %v485_v23 = vrot.slane %v8110_v48, 1  ;;  %v8143_v13 = vld [vmem:[%s7564_s21 + $0x2f8] sm:$0x3] }
  0x42   : > { %11232 = vst [vmem:[#allocation88_spill] sm:$0xff] %v8128_v24  ;;  %11233 = vst [vmem:[#allocation89_spill] sm:$0xff] %v8132_v37  ;;  %v564_v12 = vrot.slane %v8115_v38, 1  ;;  %v565_v8 = vrot.slane %v8118_v19, 1  ;;  %v8151_v26 = vld [vmem:[%s7564_s21 + $0x150] sm:$0xff]  ;;  %v8154_v7 = vld [vmem:[%s7564_s21 + $0x158] sm:$0xff]  ;;  %v8169_v34 = vsel %vm418_vm1, %v480_v61, %v482_v62 }
  0x43   : > { %11234 = vst [vmem:[#allocation90_spill] sm:$0xff] %v8137_v33  ;;  %11235 = vst [vmem:[#allocation91_spill] sm:$0xff] %v8143_v13  ;;  %v8159_v20 = vld [vmem:[%s7564_s21 + $0x300] sm:$0xff]  ;;  %v8162_v5 = vld [vmem:[%s7564_s21 + $0x308] sm:$0xff]  ;;  %v487_v19 = vrot.slane %v8132_v37, 1  ;;  %v8176_v38 = vsel %vm418_vm1, %v560_v42, %v562_v47  ;;  %v490_v62 = vrot.slane %v8154_v7, 1 }
  0x44   : > { %11236 = vst [vmem:[#allocation92_spill] sm:$0xff] %v8146_v1  ;;  %11237 = vst [vmem:[#allocation93_spill] sm:$0xff] %v8151_v26  ;;  %6597 = vmatmul.mubr.msk.f32.gmra.mxu0 %vm579_vm2, %v8125_v44  ;;  %6645 = vmatmul.mubr.msk.f32.gmra.mxu1 %vm579_vm2, %v8128_v24  ;;  %v567_v44 = vrot.slane %v8143_v13, 1  ;;  %v8179_v24 = vsel %vm418_vm1, %v484_v0, %v485_v23  ;;  %v8184_v61 = vld [vmem:[%s7564_s21 + $0x160] sm:$0x3]  ;;  %v8187_v37 = vsel %vm418_vm1, %v564_v12, %v565_v8  ;;  %v8195_v42 = vld [vmem:[%s7564_s21 + $0x168] sm:$0xff] }
  0x45   : > { %11238 = vst [vmem:[#allocation94_spill] sm:$0xff] %v8154_v7  ;;  %11239 = vst [vmem:[#allocation95_spill] sm:$0xff] %v8159_v20  ;;  %6599 = vmatprep.mubr.msk.f32.mxu0 %vm579_vm2, %v8137_v33  ;;  %6647 = vmatprep.mubr.msk.f32.mxu1 %vm579_vm2, %v8146_v1  ;;  %v489_v33 = vrot.slane %v8151_v26, 1  ;;  %v569_v13 = vrot.slane %v8159_v20, 1  ;;  %v570_v48 = vrot.slane %v8162_v5, 1  ;;  %v8198_v47 = vld [vmem:[%s7564_s21 + $0x170] sm:$0xff]  ;;  %v8213_v12 = vsel %vm418_vm1, %v485_v23, %v487_v19 }
  0x46   : > { %11240 = vst [vmem:[#allocation96_spill] sm:$0xff] %v8162_v5  ;;  %11241 = vst [vmem:[#allocation97_spill] sm:$0xff] %v8169_v34  ;;  %v8192_v1 = vld [vmem:[%s7564_s21 + $0x310] sm:$0x3]  ;;  %v8203_v0 = vld [vmem:[%s7564_s21 + $0x318] sm:$0xff]  ;;  %v8216_v5 = vsel %vm418_vm1, %v565_v8, %v567_v44  ;;  %v492_v20 = vrot.slane %v8184_v61, 1 }
  0x47   : > { %11242 = vst [vmem:[#allocation98_spill] sm:$0xff] %v8176_v38  ;;  %11243 = vst [vmem:[#allocation99_spill] sm:$0xff] %v8179_v24  ;;  %v8206_v7 = vld [vmem:[%s7564_s21 + $0x320] sm:$0xff]  ;;  %v572_v26 = vrot.slane %v8192_v1, 1  ;;  %v8228_v40 = vld [vmem:[%s7564_s21 + $0x178] sm:$0x3]  ;;  %v8231_v19 = vsel %vm418_vm1, %v569_v13, %v570_v48 }
  0x48   : > { %11244 = vst [vmem:[#allocation100_spill] sm:$0xff] %v8187_v37  ;;  %6600 = vmatmul.mubr.msk.f32.gmra.mxu0 %vm579_vm2, %v8169_v34  ;;  %11245 = vst [vmem:[#allocation101_spill] sm:$0xff] %v8206_v7  ;;  %6648 = vmatmul.mubr.msk.f32.gmra.mxu1 %vm579_vm2, %v8176_v38  ;;  %v8222_v34 = vsel %vm418_vm1, %v489_v33, %v490_v62  ;;  %v494_v38 = vrot.slane %v8195_v42, 1  ;;  %v574_v8 = vrot.slane %v8203_v0, 1  ;;  %v575_v44 = vrot.slane %v8206_v7, 1 }
  0x49   : > { %6602 = vmatprep.mubr.msk.f32.mxu0 %vm579_vm2, %v8179_v24  ;;  %11246 = vst [vmem:[#allocation102_spill] sm:$0xff] %v8213_v12  ;;  %11247 = vst [vmem:[#allocation103_spill] sm:$0xff] %v8216_v5  ;;  %6650 = vmatprep.mubr.msk.f32.mxu1 %vm579_vm2, %v8187_v37  ;;  %v495_v24 = vrot.slane %v8198_v47, 1  ;;  %v8236_v23 = vld [vmem:[%s7564_s21 + $0x328] sm:$0x3]  ;;  %v8245_v33 = vsel %vm418_vm1, %v490_v62, %v492_v20  ;;  %v497_v13 = vrot.slane %v8228_v40, 1 }
  0x4a   : > { %11248 = vst [vmem:[#allocation104_spill] sm:$0xff] %v8222_v34  ;;  %11249 = vst [vmem:[#allocation105_spill] sm:$0xff] %v8231_v19  ;;  %v1614_v37 = vrot.slane %v7571_v3, 2  ;;  %v8252_v7 = vsel %vm418_vm1, %v570_v48, %v572_v26  ;;  %v8260_v20 = vsel %vm418_vm1, %v574_v8, %v575_v44  ;;  %v1617_v62 = vrot.slane %v7588_v10, 2 }
  0x4b   : > { %11250 = vst [vmem:[#allocation106_spill] sm:$0xff] %v8245_v33  ;;  %11251 = vst [vmem:[#allocation107_spill] sm:$0xff] %v8252_v7  ;;  %v8270_v26 = vsel %vm418_vm1, %v495_v24, %v497_v13  ;;  %v1619_v10 = vrot.slane %v7598_v14, 2  ;;  %v1620_v8 = vrot.slane %v7603_v17, 2  ;;  %v1622_v13 = vrot.slane %v7618_v25, 2 }
  0x4c   : > { %6603 = vmatmul.mubr.msk.f32.gmra.mxu0 %vm579_vm2, %v8213_v12  ;;  %6651 = vmatmul.mubr.msk.f32.gmra.mxu1 %vm579_vm2, %v8216_v5  ;;  %v8255_v12 = vsel %vm418_vm1, %v494_v38, %v495_v24  ;;  %v577_v5 = vrot.slane %v8236_v23, 1  ;;  %11253 = vst [vmem:[#allocation109_spill] sm:$0xff] %v8260_v20  ;;  %11254 = vst [vmem:[#allocation110_spill] sm:$0xff] %v8270_v26 }
  0x4d   : > { %6605 = vmatprep.mubr.msk.f32.mxu0 %vm579_vm2, %v8222_v34  ;;  %6653 = vmatprep.mubr.msk.f32.mxu1 %vm579_vm2, %v8231_v19  ;;  %11252 = vst [vmem:[#allocation108_spill] sm:$0xff] %v8255_v12  ;;  %v1615_v34 = vrot.slane %v7574_v4, 2  ;;  %v8303_v25 = vsel %vm1613_vm3, %v1620_v8, %v1622_v13  ;;  %v1644_v13 = vrot.slane %v7789_v56, 2 }
  0x4e   : > { %v8275_v48 = vsel %vm418_vm1, %v575_v44, %v577_v5  ;;  %v1624_v5 = vrot.slane %v7630_v31, 2  ;;  %v8293_v44 = vsel %vm1613_vm3, %v1619_v10, %v1620_v8  ;;  %v1635_v10 = vrot.slane %v7703_v59, 2 }
  0x4f   : > { %11255 = vst [vmem:[#allocation111_spill] sm:$0xff] %v8275_v48  ;;  %v1616_v38 = vsel %vm1613_vm3, %v1614_v37, %v1615_v34  ;;  %v1618_v24 = vsel %vm1613_vm3, %v1615_v34, %v1617_v62  ;;  %v1625_v37 = vrot.slane %v7633_v32, 2  ;;  %v1629_v62 = vrot.slane %v7669_v45, 2 }
  0x50   : > { %6606 = vmatmul.mubr.msk.f32.gmra.mxu0 %vm579_vm2, %v8245_v33  ;;  %6654 = vmatmul.mubr.msk.f32.gmra.mxu1 %vm579_vm2, %v8252_v7  ;;  %v1639_v8 = vrot.slane %v7745_v21, 2 }
  0x51   : > { %6608 = vmatprep.mubr.msk.f32.mxu0 %vm579_vm2, %v8255_v12  ;;  %6656 = vmatprep.mubr.msk.f32.mxu1 %vm579_vm2, %v8260_v20  ;;  %v8311_v34 = vsel %vm1613_vm3, %v1624_v5, %v1625_v37  ;;  %v1645_v5 = vrot.slane %v7792_v57, 2 }
  0x54   : > { %6609 = vmatmul.mubr.msk.f32.gmra.mxu0 %vm579_vm2, %v8270_v26  ;;  %6657 = vmatmul.mubr.msk.f32.gmra.mxu1 %vm579_vm2, %v8275_v48  ;;  %v8296_v48 = vld [vmem:[%s7558_s18 + $0x14] sm:$0xf] }
  0x55   : > { %6759 = vmatprep.mubr.msk.f32.mxu0 %vm579_vm2, %v1616_v38  ;;  %6661 = vmatprep.mubr.msk.f32.mxu1 %vm579_vm2, %v7571_v3  ;;  %v1627_v3 = vrot.slane %v7650_v39, 2  ;;  %v8316_v38 = vld [vmem:[%s7558_s18 + $0x18] sm:$0xf]  ;;  %v1632_v39 = vrot.slane %v7700_v58, 2 }
  0x58   : > { %6760 = vmatmul.mubr.msk.f32.vlgmr.msra.gmra.mxu0 %vm579_vm2, %v1618_v24  ;;  %6662 = vmatmul.mubr.msk.f32.vlgmr.msra.gmra.mxu1 %vm579_vm2, %v7574_v4  ;;  %v1630_v4 = vrot.slane %v7672_v46, 2  ;;  %v1640_v24 = vrot.slane %v7748_v22, 2 }
  0x59   : > { %6954 = vmatpush3.msk.msra.mxu0 %vm708_vm0, %v8040_v51  ;;  %6856 = vmatpush3.msk.msra.mxu1 %vm708_vm0, %v8023_v50  ;;  %v1634_v50 = vrot.slane %v7689_v53, 2 }
  0x5a   : > { %6664 = vmatprep.mubr.msk.f32.mxu1 %vm579_vm2, %v7598_v14  ;;  %6762 = vmatprep.mubr.msk.f32.mxu0 %vm579_vm2, %v8293_v44  ;;  %v8331_v14 = vsel %vm1613_vm3, %v1625_v37, %v1627_v3  ;;  %v8337_v51 = vsel %vm1613_vm3, %v1629_v62, %v1630_v4  ;;  %v1649_v37 = vrot.slane %v7833_v18, 2  ;;  %v1650_v3 = vrot.slane %v7836_v29, 2 }
  0x5b   : > { %7051 = vmatprep.subr.msk.mxu1 %vm708_vm0, %v8296_v48  ;;  %7149 = vmatprep.subr.msk.mxu0 %vm708_vm0, %v8316_v38  ;;  %v8354_v58 = vsel %vm1613_vm3, %v1634_v50, %v1635_v10  ;;  %v1654_v62 = vrot.slane %v7877_v15, 2  ;;  %v1660_v50 = vrot.slane %v7924_v30, 2 }
  0x5c   : > { %6763 = vmatmul.mubr.msk.f32.gmra.mxu0 %vm579_vm2, %v8303_v25  ;;  %6665 = vmatmul.mubr.msk.f32.gmra.mxu1 %vm579_vm2, %v7603_v17  ;;  %v8348_v17 = vsel %vm1613_vm3, %v1630_v4, %v1632_v39  ;;  %11257 = vst [vmem:[#allocation113_spill] sm:$0xff] %v8354_v58  ;;  %v1655_v4 = vrot.slane %v7880_v54, 2  ;;  %v1659_v39 = vrot.slane %v7921_v49, 2 }
  0x5d   : > { %6765 = vmatprep.mubr.msk.f32.mxu0 %vm579_vm2, %v8311_v34  ;;  %6667 = vmatprep.mubr.msk.f32.mxu1 %vm579_vm2, %v7630_v31  ;;  %11256 = vst [vmem:[#allocation112_spill] sm:$0xff] %v8348_v17  ;;  %v1637_v31 = vrot.slane %v7734_v11, 2  ;;  %v8371_v11 = vsel %vm1613_vm3, %v1639_v8, %v1640_v24  ;;  %v1669_v8 = vrot.slane %v8009_v60, 2 }
  0x5e   : > { %11259 = vst [vmem:[#allocation115_spill] sm:$0xff] %v8371_v11 }
  0x60   : > { %6766 = vmatmul.mubr.msk.f32.gmra.mxu0 %vm579_vm2, %v8331_v14  ;;  %6668 = vmatmul.mubr.msk.f32.gmra.mxu1 %vm579_vm2, %v7633_v32  ;;  %v8365_v32 = vsel %vm1613_vm3, %v1635_v10, %v1637_v31  ;;  %v1664_v10 = vrot.slane %v7965_v63, 2  ;;  %v1665_v31 = vrot.slane %v7968_v2, 2 }
  0x61   : > { %6768 = vmatprep.mubr.msk.f32.mxu0 %vm579_vm2, %v8337_v51  ;;  %6670 = vmatprep.mubr.msk.f32.mxu1 %vm579_vm2, %v7669_v45  ;;  %11258 = vst [vmem:[#allocation114_spill] sm:$0xff] %v8365_v32  ;;  %v1642_v45 = vrot.slane %v7778_v43, 2  ;;  %v8388_v43 = vsel %vm1613_vm3, %v1644_v13, %v1645_v5  ;;  %v1675_v13 = vrot.slane %v8064_v41, 2 }
  0x62   : > { %11261 = vst [vmem:[#allocation117_spill] sm:$0xff] %v8388_v43 }
  0x64   : > { %6769 = vmatmul.mubr.msk.f32.gmra.mxu0 %vm579_vm2, %v8348_v17  ;;  %6671 = vmatmul.mubr.msk.f32.gmra.mxu1 %vm579_vm2, %v7672_v46  ;;  %v8382_v46 = vsel %vm1613_vm3, %v1640_v24, %v1642_v45  ;;  %v1670_v24 = vrot.slane %v8012_v27, 2  ;;  %v1674_v45 = vrot.slane %v8061_v36, 2  ;;  %v11438_v17 = vld [vmem:[#allocation23_spill] sm:$0xff] }
  0x65   : > { %6771 = vmatprep.mubr.msk.f32.mxu0 %vm579_vm2, %v8354_v58  ;;  %6673 = vmatprep.mubr.msk.f32.mxu1 %vm579_vm2, %v7689_v53  ;;  %11260 = vst [vmem:[#allocation116_spill] sm:$0xff] %v8382_v46  ;;  %v1647_v53 = vrot.slane %v7822_v28, 2  ;;  %v8405_v28 = vsel %vm1613_vm3, %v1649_v37, %v1650_v3  ;;  %v11275_v37 = vld [vmem:[#allocation84_spill] sm:$0xff] }
  0x66   : > { %11263 = vst [vmem:[#allocation119_spill] sm:$0xff] %v8405_v28 }
  0x68   : > { %6772 = vmatmul.mubr.msk.f32.gmra.mxu0 %vm579_vm2, %v8365_v32  ;;  %6674 = vmatmul.mubr.msk.f32.gmra.mxu1 %vm579_vm2, %v7703_v59  ;;  %v8399_v59 = vsel %vm1613_vm3, %v1645_v5, %v1647_v53  ;;  %v11274_v5 = vld [vmem:[#allocation83_spill] sm:$0xff] }
  0x69   : > { %6774 = vmatprep.mubr.msk.f32.mxu0 %vm579_vm2, %v8371_v11  ;;  %6676 = vmatprep.mubr.msk.f32.mxu1 %vm579_vm2, %v7745_v21  ;;  %11262 = vst [vmem:[#allocation118_spill] sm:$0xff] %v8399_v59  ;;  %v1652_v21 = vrot.slane %v7866_v16, 2  ;;  %v8422_v16 = vsel %vm1613_vm3, %v1654_v62, %v1655_v4  ;;  %v1679_v53 = vrot.slane %v11274_v5, 2 }
  0x6a   : > { %11265 = vst [vmem:[#allocation121_spill] sm:$0xff] %v8422_v16 }
  0x6c   : > { %6775 = vmatmul.mubr.msk.f32.gmra.mxu0 %vm579_vm2, %v8382_v46  ;;  %6677 = vmatmul.mubr.msk.f32.gmra.mxu1 %vm579_vm2, %v7748_v22  ;;  %v8416_v22 = vsel %vm1613_vm3, %v1650_v3, %v1652_v21  ;;  %v1680_v3 = vrot.slane %v11275_v37, 2  ;;  %v8978_v46 = vld [vmem:[%s7564_s21 + $0xb0] sm:$0xff] }
  0x6d   : > { %6777 = vmatprep.mubr.msk.f32.mxu0 %vm579_vm2, %v8388_v43  ;;  %6679 = vmatprep.mubr.msk.f32.mxu1 %vm579_vm2, %v7789_v56  ;;  %11264 = vst [vmem:[#allocation120_spill] sm:$0xff] %v8416_v22  ;;  %v1657_v56 = vrot.slane %v7910_v9, 2  ;;  %v8439_v9 = vsel %vm1613_vm3, %v1659_v39, %v1660_v50  ;;  %v11280_v39 = vld [vmem:[#allocation94_spill] sm:$0xff]  ;;  %v8965_v43 = vld [vmem:[%s7564_s21 + $0xa8] sm:$0xff] }
  0x6e   : > { %11267 = vst [vmem:[#allocation123_spill] sm:$0xff] %v8439_v9  ;;  %v8507_v62 = vsel %vm1613_vm3, %v1679_v53, %v1680_v3 }
  0x6f   : > { %11278 = vst [vmem:[#allocation84_spill] sm:$0xff] %v8507_v62 }
  0x70   : > { %6778 = vmatmul.mubr.msk.f32.gmra.mxu0 %vm579_vm2, %v8399_v59  ;;  %6680 = vmatmul.mubr.msk.f32.gmra.mxu1 %vm579_vm2, %v7792_v57  ;;  %v8433_v57 = vsel %vm1613_vm3, %v1655_v4, %v1657_v56  ;;  %v11279_v4 = vld [vmem:[#allocation93_spill] sm:$0xff] }
  0x71   : > { %6780 = vmatprep.mubr.msk.f32.mxu0 %vm579_vm2, %v8405_v28  ;;  %6682 = vmatprep.mubr.msk.f32.mxu1 %vm579_vm2, %v7833_v18  ;;  %11266 = vst [vmem:[#allocation122_spill] sm:$0xff] %v8433_v57  ;;  %v1662_v18 = vrot.slane %v7946_v55, 2  ;;  %v8456_v55 = vsel %vm1613_vm3, %v1664_v10, %v1665_v31  ;;  %v1684_v56 = vrot.slane %v11279_v4, 2  ;;  %v1687_v10 = vrot.slane %v8184_v61, 2  ;;  %v8956_v28 = vld [vmem:[%s7564_s21 + $0x98] sm:$0xff] }
  0x72   : > { %11269 = vst [vmem:[#allocation125_spill] sm:$0xff] %v8456_v55 }
  0x74   : > { %6781 = vmatmul.mubr.msk.f32.gmra.mxu0 %vm579_vm2, %v8416_v22  ;;  %6683 = vmatmul.mubr.msk.f32.gmra.mxu1 %vm579_vm2, %v7836_v29  ;;  %v8450_v29 = vsel %vm1613_vm3, %v1660_v50, %v1662_v18  ;;  %v1685_v50 = vrot.slane %v11280_v39, 2 }
  0x75   : > { %6783 = vmatprep.mubr.msk.f32.mxu0 %vm579_vm2, %v8422_v16  ;;  %6685 = vmatprep.mubr.msk.f32.mxu1 %vm579_vm2, %v7877_v15  ;;  %11268 = vst [vmem:[#allocation124_spill] sm:$0xff] %v8450_v29  ;;  %v1667_v15 = vrot.slane %v7998_v6, 2  ;;  %v8473_v6 = vsel %vm1613_vm3, %v1669_v8, %v1670_v24  ;;  %v1690_v8 = vrot.slane %v8198_v47, 2  ;;  %v11381_v16 = vld [vmem:[#allocation50_spill] sm:$0xff] }
  0x76   : > { %11271 = vst [vmem:[#allocation127_spill] sm:$0xff] %v8473_v6  ;;  %v8535_v61 = vsel %vm1613_vm3, %v1685_v50, %v1687_v10  ;;  %v11290_v10 = vld [vmem:[#allocation6_spill] sm:$0xff] }
  0x77   : > { %11283 = vst [vmem:[#allocation94_spill] sm:$0xff] %v8535_v61 }
  0x78   : > { %6784 = vmatmul.mubr.msk.f32.gmra.mxu0 %vm579_vm2, %v8433_v57  ;;  %6686 = vmatmul.mubr.msk.f32.gmra.mxu1 %vm579_vm2, %v7880_v54  ;;  %v8467_v54 = vsel %vm1613_vm3, %v1665_v31, %v1667_v15  ;;  %v8524_v31 = vsel %vm1613_vm3, %v1684_v56, %v1685_v50  ;;  %v1689_v15 = vrot.slane %v8195_v42, 2  ;;  %v11289_v56 = vld [vmem:[#allocation5_spill] sm:$0xff] }
  0x79   : > { %6786 = vmatprep.mubr.msk.f32.mxu0 %vm579_vm2, %v8439_v9  ;;  %6688 = vmatprep.mubr.msk.f32.mxu1 %vm579_vm2, %v7921_v49  ;;  %11270 = vst [vmem:[#allocation126_spill] sm:$0xff] %v8467_v54  ;;  %v1672_v49 = vrot.slane %v8037_v52, 2  ;;  %11282 = vst [vmem:[#allocation93_spill] sm:$0xff] %v8524_v31  ;;  %v1699_v50 = vrot.slane %v11289_v56, 2  ;;  %v8943_v9 = vld [vmem:[%s7564_s21 + $0x90] sm:$0xff] }
  0x7b   : > { %v8484_v52 = vsel %vm1613_vm3, %v1670_v24, %v1672_v49  ;;  %v1692_v24 = vrot.slane %v8228_v40, 2  ;;  %v8541_v49 = vsel %vm1613_vm3, %v1689_v15, %v1690_v8  ;;  %v1700_v15 = vrot.slane %v11290_v10, 2 }
  0x7c   : > { %6787 = vmatmul.mubr.msk.f32.gmra.mxu0 %vm579_vm2, %v8450_v29  ;;  %6689 = vmatmul.mubr.msk.f32.gmra.mxu1 %vm579_vm2, %v7924_v30  ;;  %11272 = vst [vmem:[#allocation128_spill] sm:$0xff] %v8484_v52  ;;  %v8490_v30 = vsel %vm1613_vm3, %v1674_v45, %v1675_v13  ;;  %11284 = vst [vmem:[#allocation130_spill] sm:$0xff] %v8541_v49  ;;  %v11285_v45 = vld [vmem:[#allocation2_spill] sm:$0xff] }
  0x7d   : > { %6789 = vmatprep.mubr.msk.f32.mxu0 %vm579_vm2, %v8456_v55  ;;  %6691 = vmatprep.mubr.msk.f32.mxu1 %vm579_vm2, %v7965_v63  ;;  %v1677_v63 = vrot.slane %v8096_v35, 2  ;;  %11273 = vst [vmem:[#allocation129_spill] sm:$0xff] %v8490_v30  ;;  %v11277_v35 = vld [vmem:[#allocation89_spill] sm:$0xff]  ;;  %v8552_v40 = vsel %vm1613_vm3, %v1690_v8, %v1692_v24  ;;  %v11291_v24 = vld [vmem:[#allocation7_spill] sm:$0xff]  ;;  %v8934_v55 = vld [vmem:[%s7564_s21 + $0x80] sm:$0xff] }
  0x7e   : > { %v1682_v21 = vrot.slane %v11277_v35, 2  ;;  %11287 = vst [vmem:[#allocation2_spill] sm:$0xff] %v8552_v40 }
  0x80   : > { %6790 = vmatmul.mubr.msk.f32.gmra.mxu0 %vm579_vm2, %v8467_v54  ;;  %6692 = vmatmul.mubr.msk.f32.gmra.mxu1 %vm579_vm2, %v7968_v2  ;;  %v8501_v2 = vsel %vm1613_vm3, %v1675_v13, %v1677_v63  ;;  %v8518_v18 = vsel %vm1613_vm3, %v1680_v3, %v1682_v21  ;;  %v1694_v13 = vrot.slane %v11285_v45, 2  ;;  %v11286_v63 = vld [vmem:[#allocation3_spill] sm:$0xff]  ;;  %v11288_v3 = vld [vmem:[#allocation4_spill] sm:$0xff] }
  0x81   : > { %6792 = vmatprep.mubr.msk.f32.mxu0 %vm579_vm2, %v8473_v6  ;;  %6694 = vmatprep.mubr.msk.f32.mxu1 %vm579_vm2, %v8009_v60  ;;  %11276 = vst [vmem:[#allocation83_spill] sm:$0xff] %v8501_v2  ;;  %11281 = vst [vmem:[#allocation89_spill] sm:$0xff] %v8518_v18  ;;  %v1695_v53 = vrot.slane %v11286_v63, 2  ;;  %v1697_v35 = vrot.slane %v11288_v3, 2  ;;  %v1702_v3 = vrot.slane %v11291_v24, 2  ;;  %v11375_v6 = vld [vmem:[#allocation43_spill] sm:$0xff] }
  0x83   : > { %v1696_v21 = vsel %vm1613_vm3, %v1694_v13, %v1695_v53  ;;  %v1698_v8 = vsel %vm1613_vm3, %v1695_v53, %v1697_v35  ;;  %v8570_v13 = vsel %vm1613_vm3, %v1699_v50, %v1700_v15  ;;  %v8580_v53 = vsel %vm1613_vm3, %v1700_v15, %v1702_v3  ;;  %v11296_v35 = vld [vmem:[#allocation14_spill] sm:$0xff]  ;;  %v11298_v50 = vld [vmem:[#allocation16_spill] sm:$0xff]  ;;  %v11303_v3 = vld [vmem:[#allocation21_spill] sm:$0xff] }
  0x84   : > { %6793 = vmatmul.mubr.msk.f32.gmra.mxu0 %vm579_vm2, %v8484_v52  ;;  %6695 = vmatmul.mubr.msk.f32.gmra.mxu1 %vm579_vm2, %v8012_v27  ;;  %11292 = vst [vmem:[#allocation3_spill] sm:$0xff] %v8570_v13  ;;  %11295 = vst [vmem:[#allocation4_spill] sm:$0xff] %v8580_v53  ;;  %v1709_v24 = vrot.slane %v11298_v50, 2 }
  0x85   : > { %6795 = vmatprep.mubr.msk.f32.mxu0 %vm579_vm2, %v8490_v30  ;;  %6697 = vmatprep.mubr.msk.f32.mxu1 %vm579_vm2, %v8061_v36  ;;  %v8921_v30 = vld [vmem:[%s7564_s21 + $0x78] sm:$0xff] }
  0x88   : > { %6796 = vmatmul.mubr.msk.f32.gmra.mxu0 %vm579_vm2, %v8501_v2  ;;  %6698 = vmatmul.mubr.msk.f32.gmra.mxu1 %vm579_vm2, %v8064_v41 }
  0x89   : > { %6798 = vmatprep.mubr.msk.f32.mxu0 %vm579_vm2, %v8507_v62  ;;  %6700 = vmatprep.mubr.msk.f32.mxu1 %vm579_vm2, %v11274_v5  ;;  %v8912_v62 = vld [vmem:[%s7564_s21 + $0x68] sm:$0xff] }
  0x8c   : > { %6799 = vmatmul.mubr.msk.f32.gmra.mxu0 %vm579_vm2, %v8518_v18  ;;  %6701 = vmatmul.mubr.msk.f32.gmra.mxu1 %vm579_vm2, %v11275_v37 }
  0x8d   : > { %6801 = vmatprep.mubr.msk.f32.mxu0 %vm579_vm2, %v8524_v31  ;;  %6703 = vmatprep.mubr.msk.f32.mxu1 %vm579_vm2, %v11279_v4  ;;  %v11294_v31 = vld [vmem:[#allocation10_spill] sm:$0xff] }
  0x8e   : > { %v1705_v18 = vrot.slane %v11294_v31, 2 }
  0x90   : > { %6802 = vmatmul.mubr.msk.f32.gmra.mxu0 %vm579_vm2, %v8535_v61  ;;  %6704 = vmatmul.mubr.msk.f32.gmra.mxu1 %vm579_vm2, %v11280_v39 }
  0x91   : > { %6804 = vmatprep.mubr.msk.f32.mxu0 %vm579_vm2, %v8541_v49  ;;  %6706 = vmatprep.mubr.msk.f32.mxu1 %vm579_vm2, %v8195_v42  ;;  %v11293_v49 = vld [vmem:[#allocation8_spill] sm:$0xff] }
  0x92   : > { %v1704_v61 = vrot.slane %v11293_v49, 2 }
  0x94   : > { %6805 = vmatmul.mubr.msk.f32.gmra.mxu0 %vm579_vm2, %v8552_v40  ;;  %6707 = vmatmul.mubr.msk.f32.gmra.mxu1 %vm579_vm2, %v8198_v47 }
  0x95   : > { %6807 = vmatprep.mubr.msk.f32.mxu0 %vm579_vm2, %v1696_v21  ;;  %6709 = vmatprep.mubr.msk.f32.mxu1 %vm579_vm2, %v11285_v45  ;;  %v1707_v45 = vrot.slane %v11296_v35, 2  ;;  %v8586_v21 = vsel %vm1613_vm3, %v1704_v61, %v1705_v18  ;;  %v1714_v35 = vrot.slane %v11303_v3, 2 }
  0x96   : > { %11297 = vst [vmem:[#allocation5_spill] sm:$0xff] %v8586_v21 }
  0x98   : > { %6808 = vmatmul.mubr.msk.f32.gmra.mxu0 %vm579_vm2, %v1698_v8  ;;  %6710 = vmatmul.mubr.msk.f32.gmra.mxu1 %vm579_vm2, %v11286_v63  ;;  %v11299_v8 = vld [vmem:[#allocation17_spill] sm:$0xff]  ;;  %v8597_v63 = vsel %vm1613_vm3, %v1705_v18, %v1707_v45 }
  0x99   : > { %6810 = vmatprep.mubr.msk.f32.mxu0 %vm579_vm2, %v8570_v13  ;;  %6712 = vmatprep.mubr.msk.f32.mxu1 %vm579_vm2, %v11289_v56  ;;  %v1710_v40 = vrot.slane %v11299_v8, 2  ;;  %11300 = vst [vmem:[#allocation6_spill] sm:$0xff] %v8597_v63  ;;  %v11301_v56 = vld [vmem:[#allocation20_spill] sm:$0xff] }
  0x9a   : > { %v1712_v15 = vrot.slane %v11301_v56, 2 }
  0x9b   : > { %v8603_v61 = vsel %vm1613_vm3, %v1709_v24, %v1710_v40  ;;  %v11308_v24 = vld [vmem:[#allocation27_spill] sm:$0xff] }
  0x9c   : > { %6811 = vmatmul.mubr.msk.f32.gmra.mxu0 %vm579_vm2, %v8580_v53  ;;  %6713 = vmatmul.mubr.msk.f32.gmra.mxu1 %vm579_vm2, %v11290_v10  ;;  %11302 = vst [vmem:[#allocation7_spill] sm:$0xff] %v8603_v61  ;;  %v11304_v53 = vld [vmem:[#allocation22_spill] sm:$0xff]  ;;  %v8614_v18 = vsel %vm1613_vm3, %v1710_v40, %v1712_v15  ;;  %v1719_v56 = vrot.slane %v11308_v24, 2  ;;  %v11311_v40 = vld [vmem:[#allocation32_spill] sm:$0xff] }
  0x9d   : > { %6813 = vmatprep.mubr.msk.f32.mxu0 %vm579_vm2, %v8586_v21  ;;  %6715 = vmatprep.mubr.msk.f32.mxu1 %vm579_vm2, %v11293_v49  ;;  %v1715_v13 = vrot.slane %v11304_v53, 2  ;;  %11305 = vst [vmem:[#allocation8_spill] sm:$0xff] %v8614_v18  ;;  %v11306_v49 = vld [vmem:[#allocation25_spill] sm:$0xff] }
  0x9e   : > { %v1717_v10 = vrot.slane %v11306_v49, 2 }
  0x9f   : > { %v8620_v45 = vsel %vm1613_vm3, %v1714_v35, %v1715_v13  ;;  %v11313_v35 = vld [vmem:[#allocation34_spill] sm:$0xff] }
  0xa0   : > { %6814 = vmatmul.mubr.msk.f32.gmra.mxu0 %vm579_vm2, %v8597_v63  ;;  %6716 = vmatmul.mubr.msk.f32.gmra.mxu1 %vm579_vm2, %v11294_v31  ;;  %11307 = vst [vmem:[#allocation10_spill] sm:$0xff] %v8620_v45  ;;  %v11309_v63 = vld [vmem:[#allocation28_spill] sm:$0xff]  ;;  %v8631_v31 = vsel %vm1613_vm3, %v1715_v13, %v1717_v10  ;;  %v1724_v49 = vrot.slane %v11313_v35, 2 }
  0xa1   : > { %6816 = vmatprep.mubr.msk.f32.mxu0 %vm579_vm2, %v8603_v61  ;;  %6718 = vmatprep.mubr.msk.f32.mxu1 %vm579_vm2, %v11298_v50  ;;  %v1720_v21 = vrot.slane %v11309_v63, 2  ;;  %11310 = vst [vmem:[#allocation14_spill] sm:$0xff] %v8631_v31  ;;  %v1722_v50 = vrot.slane %v11311_v40, 2 }
  0xa3   : > { %v8637_v15 = vsel %vm1613_vm3, %v1719_v56, %v1720_v21  ;;  %v8648_v13 = vsel %vm1613_vm3, %v1720_v21, %v1722_v50  ;;  %v11318_v56 = vld [vmem:[#allocation41_spill] sm:$0xff]  ;;  %v11321_v21 = vld [vmem:[#allocation46_spill] sm:$0xff] }
  0xa4   : > { %6817 = vmatmul.mubr.msk.f32.gmra.mxu0 %vm579_vm2, %v8614_v18  ;;  %6719 = vmatmul.mubr.msk.f32.gmra.mxu1 %vm579_vm2, %v11299_v8  ;;  %11312 = vst [vmem:[#allocation16_spill] sm:$0xff] %v8637_v15  ;;  %v11314_v18 = vld [vmem:[#allocation35_spill] sm:$0xff]  ;;  %11315 = vst [vmem:[#allocation17_spill] sm:$0xff] %v8648_v13  ;;  %v1729_v40 = vrot.slane %v11318_v56, 2 }
  0xa5   : > { %6819 = vmatprep.mubr.msk.f32.mxu0 %vm579_vm2, %v8620_v45  ;;  %6721 = vmatprep.mubr.msk.f32.mxu1 %vm579_vm2, %v11303_v3  ;;  %v1725_v61 = vrot.slane %v11314_v18, 2  ;;  %v11316_v8 = vld [vmem:[#allocation39_spill] sm:$0xff] }
  0xa6   : > { %v1727_v3 = vrot.slane %v11316_v8, 2 }
  0xa7   : > { %v8654_v10 = vsel %vm1613_vm3, %v1724_v49, %v1725_v61  ;;  %v11323_v49 = vld [vmem:[#allocation48_spill] sm:$0xff] }
  0xa8   : > { %6820 = vmatmul.mubr.msk.f32.gmra.mxu0 %vm579_vm2, %v8631_v31  ;;  %6722 = vmatmul.mubr.msk.f32.gmra.mxu1 %vm579_vm2, %v11304_v53  ;;  %11317 = vst [vmem:[#allocation20_spill] sm:$0xff] %v8654_v10  ;;  %v11319_v31 = vld [vmem:[#allocation42_spill] sm:$0xff]  ;;  %v8665_v53 = vsel %vm1613_vm3, %v1725_v61, %v1727_v3  ;;  %v1734_v8 = vrot.slane %v11323_v49, 2 }
  0xa9   : > { %6822 = vmatprep.mubr.msk.f32.mxu0 %vm579_vm2, %v8637_v15  ;;  %6724 = vmatprep.mubr.msk.f32.mxu1 %vm579_vm2, %v11308_v24  ;;  %v1730_v45 = vrot.slane %v11319_v31, 2  ;;  %11320 = vst [vmem:[#allocation21_spill] sm:$0xff] %v8665_v53  ;;  %v1732_v24 = vrot.slane %v11321_v21, 2  ;;  %v11326_v61 = vld [vmem:[#allocation54_spill] sm:$0xff] }
  0xab   : > { %v8671_v50 = vsel %vm1613_vm3, %v1729_v40, %v1730_v45  ;;  %v11328_v40 = vld [vmem:[#allocation55_spill] sm:$0xff] }
  0xac   : > { %6823 = vmatmul.mubr.msk.f32.gmra.mxu0 %vm579_vm2, %v8648_v13  ;;  %6725 = vmatmul.mubr.msk.f32.gmra.mxu1 %vm579_vm2, %v11309_v63  ;;  %11322 = vst [vmem:[#allocation22_spill] sm:$0xff] %v8671_v50  ;;  %v11324_v13 = vld [vmem:[#allocation49_spill] sm:$0xff]  ;;  %v8682_v63 = vsel %vm1613_vm3, %v1730_v45, %v1732_v24  ;;  %v1739_v21 = vrot.slane %v11328_v40, 2  ;;  %v11331_v45 = vld [vmem:[#allocation60_spill] sm:$0xff] }
  0xad   : > { %6825 = vmatprep.mubr.msk.f32.mxu0 %vm579_vm2, %v8654_v10  ;;  %6727 = vmatprep.mubr.msk.f32.mxu1 %vm579_vm2, %v11313_v35  ;;  %v1735_v15 = vrot.slane %v11324_v13, 2  ;;  %11325 = vst [vmem:[#allocation25_spill] sm:$0xff] %v8682_v63  ;;  %v1737_v35 = vrot.slane %v11326_v61, 2 }
  0xaf   : > { %v8688_v3 = vsel %vm1613_vm3, %v1734_v8, %v1735_v15  ;;  %v11333_v8 = vld [vmem:[#allocation62_spill] sm:$0xff] }
  0xb0   : > { %6826 = vmatmul.mubr.msk.f32.gmra.mxu0 %vm579_vm2, %v8665_v53  ;;  %6728 = vmatmul.mubr.msk.f32.gmra.mxu1 %vm579_vm2, %v11314_v18  ;;  %11327 = vst [vmem:[#allocation27_spill] sm:$0xff] %v8688_v3  ;;  %v11329_v53 = vld [vmem:[#allocation56_spill] sm:$0xff]  ;;  %v8699_v18 = vsel %vm1613_vm3, %v1735_v15, %v1737_v35  ;;  %v1744_v61 = vrot.slane %v11333_v8, 2 }
  0xb1   : > { %6828 = vmatprep.mubr.msk.f32.mxu0 %vm579_vm2, %v8671_v50  ;;  %6730 = vmatprep.mubr.msk.f32.mxu1 %vm579_vm2, %v11318_v56  ;;  %v1740_v10 = vrot.slane %v11329_v53, 2  ;;  %11330 = vst [vmem:[#allocation28_spill] sm:$0xff] %v8699_v18  ;;  %v1742_v56 = vrot.slane %v11331_v45, 2  ;;  %v11336_v15 = vld [vmem:[#allocation68_spill] sm:$0xff] }
  0xb3   : > { %v8705_v24 = vsel %vm1613_vm3, %v1739_v21, %v1740_v10  ;;  %v11338_v21 = vld [vmem:[#allocation69_spill] sm:$0xff] }
  0xb4   : > { %6829 = vmatmul.mubr.msk.f32.gmra.mxu0 %vm579_vm2, %v8682_v63  ;;  %6731 = vmatmul.mubr.msk.f32.gmra.mxu1 %vm579_vm2, %v11319_v31  ;;  %11332 = vst [vmem:[#allocation32_spill] sm:$0xff] %v8705_v24  ;;  %v11334_v63 = vld [vmem:[#allocation63_spill] sm:$0xff]  ;;  %v8716_v31 = vsel %vm1613_vm3, %v1740_v10, %v1742_v56  ;;  %v1749_v45 = vrot.slane %v11338_v21, 2  ;;  %v11341_v10 = vld [vmem:[#allocation74_spill] sm:$0xff] }
  0xb5   : > { %6831 = vmatprep.mubr.msk.f32.mxu0 %vm579_vm2, %v8688_v3  ;;  %6733 = vmatprep.mubr.msk.f32.mxu1 %vm579_vm2, %v11323_v49  ;;  %v1745_v50 = vrot.slane %v11334_v63, 2  ;;  %11335 = vst [vmem:[#allocation34_spill] sm:$0xff] %v8716_v31  ;;  %v1747_v49 = vrot.slane %v11336_v15, 2 }
  0xb7   : > { %v8722_v35 = vsel %vm1613_vm3, %v1744_v61, %v1745_v50  ;;  %v11343_v61 = vld [vmem:[#allocation76_spill] sm:$0xff] }
  0xb8   : > { %6832 = vmatmul.mubr.msk.f32.gmra.mxu0 %vm579_vm2, %v8699_v18  ;;  %6734 = vmatmul.mubr.msk.f32.gmra.mxu1 %vm579_vm2, %v11324_v13  ;;  %11337 = vst [vmem:[#allocation35_spill] sm:$0xff] %v8722_v35  ;;  %v11339_v18 = vld [vmem:[#allocation70_spill] sm:$0xff]  ;;  %v8733_v13 = vsel %vm1613_vm3, %v1745_v50, %v1747_v49  ;;  %v1754_v15 = vrot.slane %v11343_v61, 2 }
  0xb9   : > { %6834 = vmatprep.mubr.msk.f32.mxu0 %vm579_vm2, %v8705_v24  ;;  %6736 = vmatprep.mubr.msk.f32.mxu1 %vm579_vm2, %v11328_v40  ;;  %v1750_v3 = vrot.slane %v11339_v18, 2  ;;  %11340 = vst [vmem:[#allocation39_spill] sm:$0xff] %v8733_v13  ;;  %v1752_v40 = vrot.slane %v11341_v10, 2  ;;  %v11346_v50 = vld [vmem:[#allocation82_spill] sm:$0xff]  ;;  %11373 = vst [vmem:[#allocation70_spill] sm:$0xff] %v8921_v30 }
  0xba   : > { %11379 = vst [vmem:[#allocation82_spill] sm:$0xff] %v8943_v9 }
  0xbb   : > { %v8739_v56 = vsel %vm1613_vm3, %v1749_v45, %v1750_v3  ;;  %v11348_v45 = vld [vmem:[#allocation85_spill] sm:$0xff] }
  0xbc   : > { %6835 = vmatmul.mubr.msk.f32.gmra.mxu0 %vm579_vm2, %v8716_v31  ;;  %6737 = vmatmul.mubr.msk.f32.gmra.mxu1 %vm579_vm2, %v11329_v53  ;;  %11342 = vst [vmem:[#allocation41_spill] sm:$0xff] %v8739_v56  ;;  %v11344_v31 = vld [vmem:[#allocation77_spill] sm:$0xff]  ;;  %v8750_v53 = vsel %vm1613_vm3, %v1750_v3, %v1752_v40  ;;  %v1759_v10 = vrot.slane %v11348_v45, 2  ;;  %v11351_v3 = vld [vmem:[#allocation91_spill] sm:$0xff] }
  0xbd   : > { %6837 = vmatprep.mubr.msk.f32.mxu0 %vm579_vm2, %v8722_v35  ;;  %6739 = vmatprep.mubr.msk.f32.mxu1 %vm579_vm2, %v11333_v8  ;;  %v1755_v24 = vrot.slane %v11344_v31, 2  ;;  %11345 = vst [vmem:[#allocation42_spill] sm:$0xff] %v8750_v53  ;;  %v1757_v8 = vrot.slane %v11346_v50, 2  ;;  %11377 = vst [vmem:[#allocation77_spill] sm:$0xff] %v8934_v55 }
  0xbe   : > { %11383 = vst [vmem:[#allocation91_spill] sm:$0xff] %v8956_v28 }
  0xbf   : > { %v8756_v49 = vsel %vm1613_vm3, %v1754_v15, %v1755_v24  ;;  %v11353_v15 = vld [vmem:[#allocation95_spill] sm:$0xff] }
  0xc0   : > { %6838 = vmatmul.mubr.msk.f32.gmra.mxu0 %vm579_vm2, %v8733_v13  ;;  %6740 = vmatmul.mubr.msk.f32.gmra.mxu1 %vm579_vm2, %v11334_v63  ;;  %11347 = vst [vmem:[#allocation46_spill] sm:$0xff] %v8756_v49  ;;  %v11349_v13 = vld [vmem:[#allocation86_spill] sm:$0xff]  ;;  %v8767_v63 = vsel %vm1613_vm3, %v1755_v24, %v1757_v8  ;;  %v1764_v50 = vrot.slane %v11353_v15, 2  ;;  %v1767_v24 = vrot.slane %v8192_v1, 2  ;;  %v1769_v8 = vrot.slane %v8203_v0, 2  ;;  %11385 = vst [vmem:[#allocation95_spill] sm:$0xff] %v8965_v43 }
  0xc1   : > { %6840 = vmatprep.mubr.msk.f32.mxu0 %vm579_vm2, %v8739_v56  ;;  %6742 = vmatprep.mubr.msk.f32.mxu1 %vm579_vm2, %v11338_v21  ;;  %v1760_v35 = vrot.slane %v11349_v13, 2  ;;  %11350 = vst [vmem:[#allocation48_spill] sm:$0xff] %v8767_v63  ;;  %v1762_v21 = vrot.slane %v11351_v3, 2 }
  0xc3   : > { %v8773_v40 = vsel %vm1613_vm3, %v1759_v10, %v1760_v35  ;;  %v11357_v10 = vld [vmem:[#allocation101_spill] sm:$0xff] }
  0xc4   : > { %6841 = vmatmul.mubr.msk.f32.gmra.mxu0 %vm579_vm2, %v8750_v53  ;;  %6743 = vmatmul.mubr.msk.f32.gmra.mxu1 %vm579_vm2, %v11339_v18  ;;  %11352 = vst [vmem:[#allocation49_spill] sm:$0xff] %v8773_v40  ;;  %v11354_v53 = vld [vmem:[#allocation96_spill] sm:$0xff]  ;;  %v8784_v18 = vsel %vm1613_vm3, %v1760_v35, %v1762_v21  ;;  %v1770_v3 = vrot.slane %v11357_v10, 2  ;;  %v7456_v21 = vld [vmem:[%s7564_s21 + $0x20] sm:$0xff] }
  0xc5   : > { %6843 = vmatprep.mubr.msk.f32.mxu0 %vm579_vm2, %v8756_v49  ;;  %6745 = vmatprep.mubr.msk.f32.mxu1 %vm579_vm2, %v11343_v61  ;;  %v1765_v56 = vrot.slane %v11354_v53, 2  ;;  %11355 = vst [vmem:[#allocation54_spill] sm:$0xff] %v8784_v18 }
  0xc6   : > { %v8807_v35 = vsel %vm1613_vm3, %v1769_v8, %v1770_v3 }
  0xc7   : > { %v8790_v61 = vsel %vm1613_vm3, %v1764_v50, %v1765_v56  ;;  %v8801_v1 = vsel %vm1613_vm3, %v1765_v56, %v1767_v24  ;;  %11359 = vst [vmem:[#allocation60_spill] sm:$0xff] %v8807_v35  ;;  %v7455_v56 = vld [vmem:[%s7564_s21 + $0x18] sm:$0xff]  ;;  %v8843_v50 = vld [vmem:[%s7564_s21 + $0x30] sm:$0xff] }
  0xc8   : > { %6844 = vmatmul.mubr.msk.f32.gmra.mxu0 %vm579_vm2, %v8767_v63  ;;  %6746 = vmatmul.mubr.msk.f32.gmra.mxu1 %vm579_vm2, %v11344_v31  ;;  %11356 = vst [vmem:[#allocation55_spill] sm:$0xff] %v8790_v61  ;;  %11358 = vst [vmem:[#allocation56_spill] sm:$0xff] %v8801_v1  ;;  %v1772_v31 = vrot.slane %v8236_v23, 2  ;;  %v11361_v23 = vld [vmem:[#allocation9_spill] sm:$0xff]  ;;  %v11370_v63 = vld [vmem:[#allocation36_spill] sm:$0xff] }
  0xc9   : > { %6846 = vmatprep.mubr.msk.f32.mxu0 %vm579_vm2, %v8773_v40  ;;  %6748 = vmatprep.mubr.msk.f32.mxu1 %vm579_vm2, %v11348_v45  ;;  %v11362_v45 = vld [vmem:[#allocation12_spill] sm:$0xff]  ;;  %v8848_v24 = vld [vmem:[%s7558_s18 + $0x1c] sm:$0xf]  ;;  %11389 = vst [vmem:[#allocation9_spill] sm:$0xff] %v8978_v46 }
  0xcc   : > { %6847 = vmatmul.mubr.msk.f32.gmra.mxu0 %vm579_vm2, %v8784_v18  ;;  %6749 = vmatmul.mubr.msk.f32.gmra.mxu1 %vm579_vm2, %v11349_v13  ;;  %v8816_v13 = vsel %vm1613_vm3, %v1770_v3, %v1772_v31  ;;  %v8861_v3 = vld [vmem:[%s7558_s18 + $0x20] sm:$0xf] }
  0xcd   : > { %6849 = vmatprep.mubr.msk.f32.mxu0 %vm579_vm2, %v8790_v61  ;;  %6751 = vmatprep.mubr.msk.f32.mxu1 %vm579_vm2, %v11353_v15  ;;  %11360 = vst [vmem:[#allocation62_spill] sm:$0xff] %v8816_v13  ;;  %v8899_v18 = vld [vmem:[%s7564_s21 + $0x60] sm:$0xff] }
  0xd0   : > { %6850 = vmatmul.mubr.msk.f32.gmra.mxu0 %vm579_vm2, %v8801_v1  ;;  %6752 = vmatmul.mubr.msk.f32.gmra.mxu1 %vm579_vm2, %v11354_v53  ;;  %v11368_v1 = vld [vmem:[#allocation31_spill] sm:$0xff] }
  0xd1   : > { %6852 = vmatprep.mubr.msk.f32.mxu0 %vm579_vm2, %v8807_v35  ;;  %6754 = vmatprep.mubr.msk.f32.mxu1 %vm579_vm2, %v8203_v0  ;;  %v8890_v35 = vld [vmem:[%s7564_s21 + $0x50] sm:$0xff] }
  0xd4   : > { %6853 = vmatmul.mubr.msk.f32.gmra.mxu0 %vm579_vm2, %v8816_v13  ;;  %6755 = vmatmul.mubr.msk.f32.gmra.mxu1 %vm579_vm2, %v11357_v10  ;;  %v11363_v10 = vld [vmem:[#allocation15_spill] sm:$0xff]  ;;  %v11366_v13 = vld [vmem:[#allocation29_spill] sm:$0xff] }
  0xd5   : > { %6955 = vmatprep.mubr.msk.f32.mxu0 %vm579_vm2, %v11361_v23  ;;  %6857 = vmatprep.mubr.msk.f32.mxu1 %vm579_vm2, %v7455_v56  ;;  %v8866_v23 = vld [vmem:[%s7564_s21 + $0x38] sm:$0xff]  ;;  %v11365_v56 = vld [vmem:[#allocation24_spill] sm:$0xff] }
  0xd8   : > { %v8828_v53 = vpop.f32.mrf.mxu0  ;;  %6956 = vmatmul.mubr.msk.f32.vlgmr.msra.gmra.mxu0 %vm579_vm2, %v11362_v45  ;;  %v8832_v0 = vpop.f32.mrf.mxu1  ;;  %6858 = vmatmul.mubr.msk.f32.vlgmr.msra.gmra.mxu1 %vm579_vm2, %v7456_v21  ;;  %v8875_v21 = vld [vmem:[%s7564_s21 + $0x48] sm:$0xff] }
  0xd9   : > { %7150 = vmatpush3.msk.msra.mxu0 %vm708_vm0, %v8316_v38  ;;  %7052 = vmatpush3.msk.msra.mxu1 %vm708_vm0, %v8296_v48  ;;  %v11364_v38 = vld [vmem:[#allocation19_spill] sm:$0xff] }
  0xda   : > { %v8840_v15 = vpop.f32.mrf.mxu0  ;;  %6860 = vmatprep.mubr.msk.f32.mxu1 %vm579_vm2, %v8843_v50  ;;  %v8850_v8 = vpop.f32.mrf.mxu1  ;;  %6958 = vmatprep.mubr.msk.f32.mxu0 %vm579_vm2, %v11363_v10 }
  0xdb   : > { %7247 = vmatprep.subr.msk.mxu1 %vm708_vm0, %v8848_v24  ;;  %7345 = vmatprep.subr.msk.mxu0 %vm708_vm0, %v8861_v3 }
  0xdc   : > { %v8856_v48 = vpop.f32.mrf.mxu0  ;;  %6959 = vmatmul.mubr.msk.f32.gmra.mxu0 %vm579_vm2, %v11364_v38  ;;  %v8863_v31 = vpop.f32.mrf.mxu1  ;;  %6861 = vmatmul.mubr.msk.f32.gmra.mxu1 %vm579_vm2, %v8866_v23 }
  0xdd   : > { %6961 = vmatprep.mubr.msk.f32.mxu0 %vm579_vm2, %v11365_v56  ;;  %6863 = vmatprep.mubr.msk.f32.mxu1 %vm579_vm2, %v8875_v21 }
  0xde   : > { %v8872_v45 = vpop.f32.mrf.mxu0  ;;  %v8881_v38 = vpop.f32.mrf.mxu1 }
  0xe0   : > { %v8883_v10 = vpop.f32.mrf.mxu0  ;;  %6962 = vmatmul.mubr.msk.f32.gmra.mxu0 %vm579_vm2, %v11366_v13  ;;  %v8887_v56 = vpop.f32.mrf.mxu1  ;;  %6864 = vmatmul.mubr.msk.f32.gmra.mxu1 %vm579_vm2, %v8890_v35 }
  0xe1   : > { %11367 = vst [vmem:[#allocation63_spill] sm:$0xff] %v8887_v56  ;;  %6964 = vmatprep.mubr.msk.f32.mxu0 %vm579_vm2, %v11368_v1  ;;  %6866 = vmatprep.mubr.msk.f32.mxu1 %vm579_vm2, %v8899_v18  ;;  %v11372_v1 = vld [vmem:[#allocation38_spill] sm:$0xff]  ;;  %v9111_v56 = vld [vmem:[%s7564_s21 + $0x190] sm:$0x3] }
  0xe2   : > { %v8896_v61 = vpop.f32.mrf.mxu0  ;;  %v8903_v13 = vpop.f32.mrf.mxu1  ;;  %11423 = vst [vmem:[#allocation150_spill] sm:$0xff] %v9111_v56 }
  0xe3   : > { %11369 = vst [vmem:[#allocation68_spill] sm:$0xff] %v8903_v13  ;;  %v11414_v13 = vld [vmem:[#allocation97_spill] sm:$0xff] }
  0xe4   : > { %v8905_v40 = vpop.f32.mrf.mxu0  ;;  %6965 = vmatmul.mubr.msk.f32.gmra.mxu0 %vm579_vm2, %v11370_v63  ;;  %v8909_v49 = vpop.f32.mrf.mxu1  ;;  %6867 = vmatmul.mubr.msk.f32.gmra.mxu1 %vm579_vm2, %v8912_v62 }
  0xe5   : > { %11371 = vst [vmem:[#allocation69_spill] sm:$0xff] %v8909_v49  ;;  %6967 = vmatprep.mubr.msk.f32.mxu0 %vm579_vm2, %v11372_v1  ;;  %6869 = vmatprep.mubr.msk.f32.mxu1 %vm579_vm2, %v8921_v30  ;;  %v11378_v1 = vld [vmem:[#allocation45_spill] sm:$0xff] }
  0xe6   : > { %v8918_v2 = vpop.f32.mrf.mxu0  ;;  %v8925_v63 = vpop.f32.mrf.mxu1 }
  0xe7   : > { %11374 = vst [vmem:[#allocation74_spill] sm:$0xff] %v8925_v63  ;;  %v9000_v63 = vld [vmem:[%s7564_s21 + $0xc8] sm:$0xff] }
  0xe8   : > { %v8927_v52 = vpop.f32.mrf.mxu0  ;;  %6968 = vmatmul.mubr.msk.f32.gmra.mxu0 %vm579_vm2, %v11375_v6  ;;  %v8931_v54 = vpop.f32.mrf.mxu1  ;;  %6870 = vmatmul.mubr.msk.f32.gmra.mxu1 %vm579_vm2, %v8934_v55  ;;  %11395 = vst [vmem:[#allocation133_spill] sm:$0xff] %v9000_v63 }
  0xe9   : > { %11376 = vst [vmem:[#allocation76_spill] sm:$0xff] %v8931_v54  ;;  %6970 = vmatprep.mubr.msk.f32.mxu0 %vm579_vm2, %v11378_v1  ;;  %6872 = vmatprep.mubr.msk.f32.mxu1 %vm579_vm2, %v8943_v9  ;;  %v11384_v1 = vld [vmem:[#allocation52_spill] sm:$0xff] }
  0xea   : > { %v8940_v29 = vpop.f32.mrf.mxu0  ;;  %v8947_v6 = vpop.f32.mrf.mxu1 }
  0xeb   : > { %11380 = vst [vmem:[#allocation85_spill] sm:$0xff] %v8947_v6 }
  0xec   : > { %v8949_v57 = vpop.f32.mrf.mxu0  ;;  %6971 = vmatmul.mubr.msk.f32.gmra.mxu0 %vm579_vm2, %v11381_v16  ;;  %v8953_v22 = vpop.f32.mrf.mxu1  ;;  %6873 = vmatmul.mubr.msk.f32.gmra.mxu1 %vm579_vm2, %v8956_v28 }
  0xed   : > { %11382 = vst [vmem:[#allocation86_spill] sm:$0xff] %v8953_v22  ;;  %6973 = vmatprep.mubr.msk.f32.mxu0 %vm579_vm2, %v11384_v1  ;;  %6875 = vmatprep.mubr.msk.f32.mxu1 %vm579_vm2, %v8965_v43  ;;  %v11387_v22 = vld [vmem:[#allocation57_spill] sm:$0xff]  ;;  %v11390_v1 = vld [vmem:[#allocation59_spill] sm:$0xff]  ;;  %v8987_v43 = vld [vmem:[%s7564_s21 + $0xc0] sm:$0xff] }
  0xee   : > { %v8962_v59 = vpop.f32.mrf.mxu0  ;;  %v8969_v16 = vpop.f32.mrf.mxu1  ;;  %11391 = vst [vmem:[#allocation12_spill] sm:$0xff] %v8987_v43 }
  0xef   : > { %11386 = vst [vmem:[#allocation96_spill] sm:$0xff] %v8969_v16 }
  0xf0   : > { %v8971_v6 = vpop.f32.mrf.mxu0  ;;  %6974 = vmatmul.mubr.msk.f32.gmra.mxu0 %vm579_vm2, %v11387_v22  ;;  %v8975_v54 = vpop.f32.mrf.mxu1  ;;  %6876 = vmatmul.mubr.msk.f32.gmra.mxu1 %vm579_vm2, %v8978_v46 }
  0xf1   : > { %11388 = vst [vmem:[#allocation101_spill] sm:$0xff] %v8975_v54  ;;  %6976 = vmatprep.mubr.msk.f32.mxu0 %vm579_vm2, %v11390_v1  ;;  %6878 = vmatprep.mubr.msk.f32.mxu1 %vm579_vm2, %v8987_v43  ;;  %v11393_v54 = vld [vmem:[#allocation64_spill] sm:$0xff]  ;;  %v11396_v1 = vld [vmem:[#allocation66_spill] sm:$0xff]  ;;  %v9009_v43 = vld [vmem:[%s7564_s21 + $0xd8] sm:$0xff] }
  0xf2   : > { %v8984_v28 = vpop.f32.mrf.mxu0  ;;  %v8991_v22 = vpop.f32.mrf.mxu1  ;;  %11397 = vst [vmem:[#allocation134_spill] sm:$0xff] %v9009_v43 }
  0xf3   : > { %11392 = vst [vmem:[#allocation131_spill] sm:$0xff] %v8991_v22 }
  0xf4   : > { %v8993_v16 = vpop.f32.mrf.mxu0  ;;  %6977 = vmatmul.mubr.msk.f32.gmra.mxu0 %vm579_vm2, %v11393_v54  ;;  %v8997_v46 = vpop.f32.mrf.mxu1  ;;  %6879 = vmatmul.mubr.msk.f32.gmra.mxu1 %vm579_vm2, %v9000_v63  ;;  %v9022_v63 = vld [vmem:[%s7564_s21 + $0xe0] sm:$0xff] }
  0xf5   : > { %11394 = vst [vmem:[#allocation132_spill] sm:$0xff] %v8997_v46  ;;  %6979 = vmatprep.mubr.msk.f32.mxu0 %vm579_vm2, %v11396_v1  ;;  %6881 = vmatprep.mubr.msk.f32.mxu1 %vm579_vm2, %v9009_v43  ;;  %v11399_v46 = vld [vmem:[#allocation71_spill] sm:$0xff]  ;;  %11401 = vst [vmem:[#allocation137_spill] sm:$0xff] %v9022_v63  ;;  %v11402_v1 = vld [vmem:[#allocation73_spill] sm:$0xff] }
  0xf6   : > { %v9006_v11 = vpop.f32.mrf.mxu0  ;;  %v9013_v54 = vpop.f32.mrf.mxu1  ;;  %v9031_v43 = vld [vmem:[%s7564_s21 + $0xf0] sm:$0xff] }
  0xf7   : > { %11398 = vst [vmem:[#allocation135_spill] sm:$0xff] %v9013_v54  ;;  %11403 = vst [vmem:[#allocation138_spill] sm:$0xff] %v9031_v43 }
  0xf8   : > { %v9015_v22 = vpop.f32.mrf.mxu0  ;;  %6980 = vmatmul.mubr.msk.f32.gmra.mxu0 %vm579_vm2, %v11399_v46  ;;  %v9019_v49 = vpop.f32.mrf.mxu1  ;;  %6882 = vmatmul.mubr.msk.f32.gmra.mxu1 %vm579_vm2, %v9022_v63  ;;  %v9044_v63 = vld [vmem:[%s7564_s21 + $0xf8] sm:$0xff] }
  0xf9   : > { %11400 = vst [vmem:[#allocation136_spill] sm:$0xff] %v9019_v49  ;;  %6982 = vmatprep.mubr.msk.f32.mxu0 %vm579_vm2, %v11402_v1  ;;  %6884 = vmatprep.mubr.msk.f32.mxu1 %vm579_vm2, %v9031_v43  ;;  %v11405_v49 = vld [vmem:[#allocation78_spill] sm:$0xff]  ;;  %11407 = vst [vmem:[#allocation141_spill] sm:$0xff] %v9044_v63  ;;  %v11408_v1 = vld [vmem:[#allocation80_spill] sm:$0xff] }
  0xfa   : > { %v9028_v9 = vpop.f32.mrf.mxu0  ;;  %v9035_v54 = vpop.f32.mrf.mxu1 }
  0xfb   : > { %11404 = vst [vmem:[#allocation139_spill] sm:$0xff] %v9035_v54 }
  0xfc   : > { %v9037_v46 = vpop.f32.mrf.mxu0  ;;  %6983 = vmatmul.mubr.msk.f32.gmra.mxu0 %vm579_vm2, %v11405_v49  ;;  %v9041_v32 = vpop.f32.mrf.mxu1  ;;  %6885 = vmatmul.mubr.msk.f32.gmra.mxu1 %vm579_vm2, %v9044_v63  ;;  %v11410_v49 = vld [vmem:[#allocation87_spill] sm:$0xff] }
  0xfd   : > { %11406 = vst [vmem:[#allocation140_spill] sm:$0xff] %v9041_v32  ;;  %6985 = vmatprep.mubr.msk.f32.mxu0 %vm579_vm2, %v11408_v1  ;;  %6887 = vmatprep.mubr.msk.f32.mxu1 %vm579_vm2, %v8009_v60  ;;  %v11412_v1 = vld [vmem:[#allocation90_spill] sm:$0xff] }
  0xfe   : > { %v9050_v55 = vpop.f32.mrf.mxu0  ;;  %v9054_v54 = vpop.f32.mrf.mxu1 }
  0xff   : > { %11409 = vst [vmem:[#allocation142_spill] sm:$0xff] %v9054_v54 }
 0x100   : > { %v9056_v43 = vpop.f32.mrf.mxu0  ;;  %6986 = vmatmul.mubr.msk.f32.gmra.mxu0 %vm579_vm2, %v11410_v49  ;;  %v9060_v32 = vpop.f32.mrf.mxu1  ;;  %6888 = vmatmul.mubr.msk.f32.gmra.mxu1 %vm579_vm2, %v8012_v27  ;;  %v11416_v27 = vld [vmem:[#allocation99_spill] sm:$0xff] }
 0x101   : > { %11411 = vst [vmem:[#allocation143_spill] sm:$0xff] %v9060_v32  ;;  %6988 = vmatprep.mubr.msk.f32.mxu0 %vm579_vm2, %v11412_v1  ;;  %6890 = vmatprep.mubr.msk.f32.mxu1 %vm579_vm2, %v8061_v36  ;;  %v9092_v32 = vld [vmem:[%s7564_s21 + $0x188] sm:$0xff] }
 0x102   : > { %v9066_v63 = vpop.f32.mrf.mxu0  ;;  %v9070_v60 = vpop.f32.mrf.mxu1  ;;  %11419 = vst [vmem:[#allocation148_spill] sm:$0xff] %v9092_v32  ;;  %v2821_v58 = vrot.slane %v9092_v32, 1 }
 0x103   : > { %11413 = vst [vmem:[#allocation144_spill] sm:$0xff] %v9070_v60  ;;  %v9089_v60 = vld [vmem:[%s7564_s21 + $0x180] sm:$0xff] }
 0x104   : > { %v9072_v54 = vpop.f32.mrf.mxu0  ;;  %6989 = vmatmul.mubr.msk.f32.gmra.mxu0 %vm579_vm2, %v11414_v13  ;;  %v9076_v49 = vpop.f32.mrf.mxu1  ;;  %6891 = vmatmul.mubr.msk.f32.gmra.mxu1 %vm579_vm2, %v8064_v41  ;;  %11418 = vst [vmem:[#allocation147_spill] sm:$0xff] %v9089_v60 }
 0x105   : > { %11415 = vst [vmem:[#allocation145_spill] sm:$0xff] %v9076_v49  ;;  %6991 = vmatprep.mubr.msk.f32.mxu0 %vm579_vm2, %v11416_v27  ;;  %6893 = vmatprep.mubr.msk.f32.mxu1 %vm579_vm2, %v11274_v5  ;;  %v11420_v49 = vld [vmem:[#allocation102_spill] sm:$0xff]  ;;  %v11422_v27 = vld [vmem:[#allocation104_spill] sm:$0xff] }
 0x106   : > { %v9082_v1 = vpop.f32.mrf.mxu0  ;;  %v9086_v36 = vpop.f32.mrf.mxu1 }
 0x107   : > { %11417 = vst [vmem:[#allocation146_spill] sm:$0xff] %v9086_v36  ;;  %v2820_v36 = vrot.slane %v9089_v60, 1 }
 0x108   : > { %v9094_v13 = vpop.f32.mrf.mxu0  ;;  %6992 = vmatmul.mubr.msk.f32.gmra.mxu0 %vm579_vm2, %v11420_v49  ;;  %v9098_v41 = vpop.f32.mrf.mxu1  ;;  %6894 = vmatmul.mubr.msk.f32.gmra.mxu1 %vm579_vm2, %v11275_v37 }
 0x109   : > { %11421 = vst [vmem:[#allocation149_spill] sm:$0xff] %v9098_v41  ;;  %6994 = vmatprep.mubr.msk.f32.mxu0 %vm579_vm2, %v11422_v27  ;;  %6896 = vmatprep.mubr.msk.f32.mxu1 %vm579_vm2, %v11279_v4  ;;  %v2823_v4 = vrot.slane %v9111_v56, 1  ;;  %v11435_v56 = vld [vmem:[#allocation18_spill] sm:$0xff] }
 0x10a   : > { %v9104_v5 = vpop.f32.mrf.mxu0  ;;  %v9113_v49 = vpop.f32.mrf.mxu1 }
 0x10b   : > { %11424 = vst [vmem:[#allocation151_spill] sm:$0xff] %v9113_v49  ;;  %v9131_v49 = vsel %vm418_vm1, %v2820_v36, %v2821_v58 }
 0x10c   : > { %v9115_v41 = vpop.f32.mrf.mxu0  ;;  %6995 = vmatmul.mubr.msk.f32.gmra.mxu0 %vm579_vm2, %v8245_v33  ;;  %v9119_v37 = vpop.f32.mrf.mxu1  ;;  %6897 = vmatmul.mubr.msk.f32.gmra.mxu1 %vm579_vm2, %v11280_v39  ;;  %11426 = vst [vmem:[#allocation153_spill] sm:$0xff] %v9131_v49 }
 0x10d   : > { %11425 = vst [vmem:[#allocation152_spill] sm:$0xff] %v9119_v37  ;;  %6997 = vmatprep.mubr.msk.f32.mxu0 %vm579_vm2, %v8255_v12  ;;  %6899 = vmatprep.mubr.msk.f32.mxu1 %vm579_vm2, %v8195_v42  ;;  %v9146_v42 = vsel %vm418_vm1, %v2821_v58, %v2823_v4  ;;  %v11432_v58 = vld [vmem:[#allocation11_spill] sm:$0xff] }
 0x10e   : > { %v9126_v27 = vpop.f32.mrf.mxu0  ;;  %v9133_v30 = vpop.f32.mrf.mxu1  ;;  %11429 = vst [vmem:[#allocation156_spill] sm:$0xff] %v9146_v42 }
 0x10f   : > { %11427 = vst [vmem:[#allocation154_spill] sm:$0xff] %v9133_v30  ;;  %v11434_v30 = vld [vmem:[#allocation13_spill] sm:$0xff] }
 0x110   : > { %v9135_v33 = vpop.f32.mrf.mxu0  ;;  %6998 = vmatmul.mubr.msk.f32.gmra.mxu0 %vm579_vm2, %v8270_v26  ;;  %v9139_v39 = vpop.f32.mrf.mxu1  ;;  %6900 = vmatmul.mubr.msk.f32.gmra.mxu1 %vm579_vm2, %v8198_v47 }
 0x111   : > { %11428 = vst [vmem:[#allocation155_spill] sm:$0xff] %v9139_v39  ;;  %7000 = vmatprep.mubr.msk.f32.mxu0 %vm579_vm2, %v9131_v49  ;;  %6902 = vmatprep.mubr.msk.f32.mxu1 %vm579_vm2, %v9089_v60  ;;  %v7475_v49 = vld [vmem:[%s7564_s21 + $0x1c8] sm:$0xff] }
 0x112   : > { %v9148_v36 = vpop.f32.mrf.mxu0  ;;  %v9152_v12 = vpop.f32.mrf.mxu1 }
 0x113   : > { %11430 = vst [vmem:[#allocation157_spill] sm:$0xff] %v9152_v12 }
 0x114   : > { %v9154_v26 = vpop.f32.mrf.mxu0  ;;  %7001 = vmatmul.mubr.msk.f32.gmra.mxu0 %vm579_vm2, %v9146_v42  ;;  %v9158_v47 = vpop.f32.mrf.mxu1  ;;  %6903 = vmatmul.mubr.msk.f32.gmra.mxu1 %vm579_vm2, %v9092_v32  ;;  %v9178_v32 = vld [vmem:[%s7564_s21 + $0x1e0] sm:$0xff] }
 0x115   : > { %11431 = vst [vmem:[#allocation158_spill] sm:$0xff] %v9158_v47  ;;  %7003 = vmatprep.mubr.msk.f32.mxu0 %vm579_vm2, %v11432_v58  ;;  %6905 = vmatprep.mubr.msk.f32.mxu1 %vm579_vm2, %v7475_v49  ;;  %v7476_v47 = vld [vmem:[%s7564_s21 + $0x1d0] sm:$0xff]  ;;  %11436 = vst [vmem:[#allocation13_spill] sm:$0xff] %v9178_v32 }
 0x116   : > { %v9164_v4 = vpop.f32.mrf.mxu0  ;;  %v9168_v12 = vpop.f32.mrf.mxu1 }
 0x117   : > { %11433 = vst [vmem:[#allocation11_spill] sm:$0xff] %v9168_v12 }
 0x118   : > { %v6761_v39 = vpop.f32.mrf.mxu0  ;;  %7004 = vmatmul.mubr.msk.f32.gmra.mxu0 %vm579_vm2, %v11434_v30  ;;  %v6663_v42 = vpop.f32.mrf.mxu1  ;;  %6906 = vmatmul.mubr.msk.f32.gmra.mxu1 %vm579_vm2, %v7476_v47 }
 0x119   : > { %7006 = vmatprep.mubr.msk.f32.mxu0 %vm579_vm2, %v11435_v56  ;;  %v1300_v58 = vadd.f32 %v6663_v42, %v8828_v53  ;;  %6908 = vmatprep.mubr.msk.f32.mxu1 %vm579_vm2, %v9178_v32  ;;  %v9188_v56 = vld [vmem:[%s7564_s21 + $0x1e8] sm:$0xff]  ;;  %v11440_v53 = vld [vmem:[#allocation26_spill] sm:$0xff] }
 0x11a   : > { %v1971_v37 = vpop.f32.mrf.mxu0  ;;  %v1294_v49 = vpop.f32.mrf.mxu1  ;;  %11439 = vst [vmem:[#allocation160_spill] sm:$0xff] %v9188_v56  ;;  %v11442_v32 = vld [vmem:[#allocation30_spill] sm:$0xff] }
 0x11b   : > { %v9182_v12 = vadd.f32 %v6761_v39, %v1300_v58  ;;  %v1295_v30 = vadd.f32 %v1294_v49, %v8840_v15  ;;  %v9198_v58 = vld [vmem:[%s7564_s21 + $0x1f8] sm:$0xff] }
 0x11c   : > { %v6764_v60 = vpop.f32.mrf.mxu0  ;;  %7007 = vmatmul.mubr.msk.f32.gmra.mxu0 %vm579_vm2, %v11438_v17  ;;  %v6666_v47 = vpop.f32.mrf.mxu1  ;;  %6909 = vmatmul.mubr.msk.f32.gmra.mxu1 %vm579_vm2, %v9188_v56 }
 0x11d   : > { %11437 = vst [vmem:[#allocation159_spill] sm:$0xff] %v9182_v12  ;;  %7009 = vmatprep.mubr.msk.f32.mxu0 %vm579_vm2, %v11440_v53  ;;  %v9194_v42 = vadd.f32 %v1971_v37, %v1295_v30  ;;  %v1310_v39 = vadd.f32 %v6666_v47, %v8856_v48  ;;  %6911 = vmatprep.mubr.msk.f32.mxu1 %vm579_vm2, %v9198_v58  ;;  %v9208_v30 = vld [vmem:[%s7564_s21 + $0x200] sm:$0xff]  ;;  %v11444_v48 = vld [vmem:[#allocation33_spill] sm:$0xff] }
 0x11e   : > { %v1981_v15 = vpop.f32.mrf.mxu0  ;;  %v1304_v49 = vpop.f32.mrf.mxu1  ;;  %11443 = vst [vmem:[#allocation162_spill] sm:$0xff] %v9208_v30 }
 0x11f   : > { %v9202_v17 = vadd.f32 %v6764_v60, %v1310_v39  ;;  %v1305_v12 = vadd.f32 %v1304_v49, %v8872_v45  ;;  %v9218_v39 = vld [vmem:[%s7564_s21 + $0x210] sm:$0xff] }
 0x120   : > { %v6767_v56 = vpop.f32.mrf.mxu0  ;;  %7010 = vmatmul.mubr.msk.f32.gmra.mxu0 %vm579_vm2, %v11442_v32  ;;  %v6669_v37 = vpop.f32.mrf.mxu1  ;;  %6912 = vmatmul.mubr.msk.f32.gmra.mxu1 %vm579_vm2, %v9208_v30  ;;  %v11446_v30 = vld [vmem:[#allocation37_spill] sm:$0xff] }
 0x121   : > { %11441 = vst [vmem:[#allocation161_spill] sm:$0xff] %v9202_v17  ;;  %7012 = vmatprep.mubr.msk.f32.mxu0 %vm579_vm2, %v11444_v48  ;;  %v9214_v47 = vadd.f32 %v1981_v15, %v1305_v12  ;;  %v1320_v60 = vadd.f32 %v6669_v37, %v8883_v10  ;;  %6914 = vmatprep.mubr.msk.f32.mxu1 %vm579_vm2, %v9218_v39  ;;  %v9228_v15 = vld [vmem:[%s7564_s21 + $0x218] sm:$0xff]  ;;  %v11448_v10 = vld [vmem:[#allocation40_spill] sm:$0xff] }
 0x122   : > { %v1991_v45 = vpop.f32.mrf.mxu0  ;;  %v1314_v49 = vpop.f32.mrf.mxu1  ;;  %11447 = vst [vmem:[#allocation164_spill] sm:$0xff] %v9228_v15 }
 0x123   : > { %v9222_v32 = vadd.f32 %v6767_v56, %v1320_v60  ;;  %v1315_v53 = vadd.f32 %v1314_v49, %v8896_v61  ;;  %v9238_v60 = vld [vmem:[%s7564_s21 + $0x228] sm:$0xff] }
 0x124   : > { %v6770_v17 = vpop.f32.mrf.mxu0  ;;  %7013 = vmatmul.mubr.msk.f32.gmra.mxu0 %vm579_vm2, %v11446_v30  ;;  %v6672_v12 = vpop.f32.mrf.mxu1  ;;  %6915 = vmatmul.mubr.msk.f32.gmra.mxu1 %vm579_vm2, %v9228_v15  ;;  %v11450_v15 = vld [vmem:[#allocation44_spill] sm:$0xff] }
 0x125   : > { %11445 = vst [vmem:[#allocation163_spill] sm:$0xff] %v9222_v32  ;;  %7015 = vmatprep.mubr.msk.f32.mxu0 %vm579_vm2, %v11448_v10  ;;  %v9234_v37 = vadd.f32 %v1991_v45, %v1315_v53  ;;  %v1330_v56 = vadd.f32 %v6672_v12, %v8905_v40  ;;  %6917 = vmatprep.mubr.msk.f32.mxu1 %vm579_vm2, %v9238_v60  ;;  %v9248_v45 = vld [vmem:[%s7564_s21 + $0x230] sm:$0xff]  ;;  %v11452_v40 = vld [vmem:[#allocation47_spill] sm:$0xff] }
 0x126   : > { %v2001_v61 = vpop.f32.mrf.mxu0  ;;  %v1324_v49 = vpop.f32.mrf.mxu1  ;;  %11451 = vst [vmem:[#allocation166_spill] sm:$0xff] %v9248_v45 }
 0x127   : > { %v9242_v30 = vadd.f32 %v6770_v17, %v1330_v56  ;;  %v1325_v48 = vadd.f32 %v1324_v49, %v8918_v2  ;;  %v9258_v56 = vld [vmem:[%s7564_s21 + $0x240] sm:$0xff] }
 0x128   : > { %v6773_v32 = vpop.f32.mrf.mxu0  ;;  %7016 = vmatmul.mubr.msk.f32.gmra.mxu0 %vm579_vm2, %v11450_v15  ;;  %v6675_v53 = vpop.f32.mrf.mxu1  ;;  %6918 = vmatmul.mubr.msk.f32.gmra.mxu1 %vm579_vm2, %v9248_v45  ;;  %v11454_v45 = vld [vmem:[#allocation51_spill] sm:$0xff] }
 0x129   : > { %11449 = vst [vmem:[#allocation165_spill] sm:$0xff] %v9242_v30  ;;  %7018 = vmatprep.mubr.msk.f32.mxu0 %vm579_vm2, %v11452_v40  ;;  %v9254_v12 = vadd.f32 %v2001_v61, %v1325_v48  ;;  %v1340_v17 = vadd.f32 %v6675_v53, %v8927_v52  ;;  %6920 = vmatprep.mubr.msk.f32.mxu1 %vm579_vm2, %v9258_v56  ;;  %v9268_v61 = vld [vmem:[%s7564_s21 + $0x248] sm:$0xff]  ;;  %v11456_v52 = vld [vmem:[#allocation53_spill] sm:$0xff] }
 0x12a   : > { %v2011_v2 = vpop.f32.mrf.mxu0  ;;  %v1334_v49 = vpop.f32.mrf.mxu1  ;;  %11455 = vst [vmem:[#allocation168_spill] sm:$0xff] %v9268_v61 }
 0x12b   : > { %v9262_v15 = vadd.f32 %v6773_v32, %v1340_v17  ;;  %v1335_v10 = vadd.f32 %v1334_v49, %v8940_v29  ;;  %v9278_v17 = vld [vmem:[%s7564_s21 + $0x258] sm:$0xff] }
 0x12c   : > { %v6776_v30 = vpop.f32.mrf.mxu0  ;;  %7019 = vmatmul.mubr.msk.f32.gmra.mxu0 %vm579_vm2, %v11454_v45  ;;  %v6678_v48 = vpop.f32.mrf.mxu1  ;;  %6921 = vmatmul.mubr.msk.f32.gmra.mxu1 %vm579_vm2, %v9268_v61  ;;  %v11458_v61 = vld [vmem:[#allocation58_spill] sm:$0xff] }
 0x12d   : > { %11453 = vst [vmem:[#allocation167_spill] sm:$0xff] %v9262_v15  ;;  %7021 = vmatprep.mubr.msk.f32.mxu0 %vm579_vm2, %v11456_v52  ;;  %v9274_v53 = vadd.f32 %v2011_v2, %v1335_v10  ;;  %v1350_v32 = vadd.f32 %v6678_v48, %v8949_v57  ;;  %6923 = vmatprep.mubr.msk.f32.mxu1 %vm579_vm2, %v9278_v17  ;;  %v9288_v2 = vld [vmem:[%s7564_s21 + $0x260] sm:$0xff]  ;;  %v11460_v57 = vld [vmem:[#allocation61_spill] sm:$0xff] }
 0x12e   : > { %v2021_v29 = vpop.f32.mrf.mxu0  ;;  %v1344_v49 = vpop.f32.mrf.mxu1  ;;  %11459 = vst [vmem:[#allocation170_spill] sm:$0xff] %v9288_v2 }
 0x12f   : > { %v9282_v45 = vadd.f32 %v6776_v30, %v1350_v32  ;;  %v1345_v40 = vadd.f32 %v1344_v49, %v8962_v59  ;;  %v9298_v32 = vld [vmem:[%s7564_s21 + $0x270] sm:$0xff] }
 0x130   : > { %v6779_v15 = vpop.f32.mrf.mxu0  ;;  %7022 = vmatmul.mubr.msk.f32.gmra.mxu0 %vm579_vm2, %v11458_v61  ;;  %v6681_v10 = vpop.f32.mrf.mxu1  ;;  %6924 = vmatmul.mubr.msk.f32.gmra.mxu1 %vm579_vm2, %v9288_v2  ;;  %v11462_v2 = vld [vmem:[#allocation65_spill] sm:$0xff] }
 0x131   : > { %11457 = vst [vmem:[#allocation169_spill] sm:$0xff] %v9282_v45  ;;  %7024 = vmatprep.mubr.msk.f32.mxu0 %vm579_vm2, %v11460_v57  ;;  %v9294_v48 = vadd.f32 %v2021_v29, %v1345_v40  ;;  %v1360_v30 = vadd.f32 %v6681_v10, %v8971_v6  ;;  %6926 = vmatprep.mubr.msk.f32.mxu1 %vm579_vm2, %v9298_v32  ;;  %v9308_v29 = vld [vmem:[%s7564_s21 + $0x278] sm:$0xff]  ;;  %v11464_v6 = vld [vmem:[#allocation67_spill] sm:$0xff] }
 0x132   : > { %v2031_v59 = vpop.f32.mrf.mxu0  ;;  %v1354_v49 = vpop.f32.mrf.mxu1  ;;  %11463 = vst [vmem:[#allocation172_spill] sm:$0xff] %v9308_v29 }
 0x133   : > { %v9302_v61 = vadd.f32 %v6779_v15, %v1360_v30  ;;  %v1355_v52 = vadd.f32 %v1354_v49, %v8984_v28  ;;  %v9318_v30 = vld [vmem:[%s7564_s21 + $0x288] sm:$0xff] }
 0x134   : > { %v6782_v45 = vpop.f32.mrf.mxu0  ;;  %7025 = vmatmul.mubr.msk.f32.gmra.mxu0 %vm579_vm2, %v11462_v2  ;;  %v6684_v40 = vpop.f32.mrf.mxu1  ;;  %6927 = vmatmul.mubr.msk.f32.gmra.mxu1 %vm579_vm2, %v9308_v29  ;;  %v11466_v29 = vld [vmem:[#allocation72_spill] sm:$0xff] }
 0x135   : > { %11461 = vst [vmem:[#allocation171_spill] sm:$0xff] %v9302_v61  ;;  %7027 = vmatprep.mubr.msk.f32.mxu0 %vm579_vm2, %v11464_v6  ;;  %v9314_v10 = vadd.f32 %v2031_v59, %v1355_v52  ;;  %v1370_v15 = vadd.f32 %v6684_v40, %v8993_v16  ;;  %6929 = vmatprep.mubr.msk.f32.mxu1 %vm579_vm2, %v9318_v30  ;;  %v9328_v59 = vld [vmem:[%s7564_s21 + $0x290] sm:$0xff]  ;;  %v11468_v16 = vld [vmem:[#allocation75_spill] sm:$0xff] }
 0x136   : > { %v2041_v28 = vpop.f32.mrf.mxu0  ;;  %v1364_v49 = vpop.f32.mrf.mxu1  ;;  %11467 = vst [vmem:[#allocation174_spill] sm:$0xff] %v9328_v59 }
 0x137   : > { %v9322_v2 = vadd.f32 %v6782_v45, %v1370_v15  ;;  %v1365_v57 = vadd.f32 %v1364_v49, %v9006_v11  ;;  %v9338_v15 = vld [vmem:[%s7564_s21 + $0x2a0] sm:$0xff] }
 0x138   : > { %v6785_v61 = vpop.f32.mrf.mxu0  ;;  %7028 = vmatmul.mubr.msk.f32.gmra.mxu0 %vm579_vm2, %v11466_v29  ;;  %v6687_v52 = vpop.f32.mrf.mxu1  ;;  %6930 = vmatmul.mubr.msk.f32.gmra.mxu1 %vm579_vm2, %v9328_v59  ;;  %v11470_v59 = vld [vmem:[#allocation79_spill] sm:$0xff] }
 0x139   : > { %11465 = vst [vmem:[#allocation173_spill] sm:$0xff] %v9322_v2  ;;  %7030 = vmatprep.mubr.msk.f32.mxu0 %vm579_vm2, %v11468_v16  ;;  %v9334_v40 = vadd.f32 %v2041_v28, %v1365_v57  ;;  %v1380_v45 = vadd.f32 %v6687_v52, %v9015_v22  ;;  %6932 = vmatprep.mubr.msk.f32.mxu1 %vm579_vm2, %v9338_v15  ;;  %v9348_v28 = vld [vmem:[%s7564_s21 + $0x2a8] sm:$0xff]  ;;  %v11472_v22 = vld [vmem:[#allocation81_spill] sm:$0xff] }
 0x13a   : > { %v2051_v11 = vpop.f32.mrf.mxu0  ;;  %v1374_v49 = vpop.f32.mrf.mxu1  ;;  %11471 = vst [vmem:[#allocation176_spill] sm:$0xff] %v9348_v28 }
 0x13b   : > { %v9342_v29 = vadd.f32 %v6785_v61, %v1380_v45  ;;  %v1375_v6 = vadd.f32 %v1374_v49, %v9028_v9  ;;  %v9358_v45 = vld [vmem:[%s7564_s21 + $0x2b8] sm:$0xff] }
 0x13c   : > { %v6788_v2 = vpop.f32.mrf.mxu0  ;;  %7031 = vmatmul.mubr.msk.f32.gmra.mxu0 %vm579_vm2, %v11470_v59  ;;  %v6690_v57 = vpop.f32.mrf.mxu1  ;;  %6933 = vmatmul.mubr.msk.f32.gmra.mxu1 %vm579_vm2, %v9348_v28  ;;  %v11474_v28 = vld [vmem:[#allocation88_spill] sm:$0xff] }
 0x13d   : > { %11469 = vst [vmem:[#allocation175_spill] sm:$0xff] %v9342_v29  ;;  %7033 = vmatprep.mubr.msk.f32.mxu0 %vm579_vm2, %v11472_v22  ;;  %v9354_v52 = vadd.f32 %v2051_v11, %v1375_v6  ;;  %v1390_v61 = vadd.f32 %v6690_v57, %v9037_v46  ;;  %6935 = vmatprep.mubr.msk.f32.mxu1 %vm579_vm2, %v9358_v45  ;;  %v9368_v11 = vld [vmem:[%s7564_s21 + $0x2c0] sm:$0xff]  ;;  %v11475_v46 = vld [vmem:[#allocation92_spill] sm:$0xff] }
 0x13e   : > { %v2061_v9 = vpop.f32.mrf.mxu0  ;;  %v1384_v49 = vpop.f32.mrf.mxu1 }
 0x13f   : > { %v9362_v59 = vadd.f32 %v6788_v2, %v1390_v61  ;;  %v1385_v16 = vadd.f32 %v1384_v49, %v9050_v55  ;;  %v9378_v61 = vld [vmem:[%s7564_s21 + $0x2d0] sm:$0xff] }
 0x140   : > { %v6791_v29 = vpop.f32.mrf.mxu0  ;;  %7034 = vmatmul.mubr.msk.f32.gmra.mxu0 %vm579_vm2, %v11474_v28  ;;  %v6693_v6 = vpop.f32.mrf.mxu1  ;;  %6936 = vmatmul.mubr.msk.f32.gmra.mxu1 %vm579_vm2, %v9368_v11 }
 0x141   : > { %11473 = vst [vmem:[#allocation177_spill] sm:$0xff] %v9362_v59  ;;  %7036 = vmatprep.mubr.msk.f32.mxu0 %vm579_vm2, %v11475_v46  ;;  %v9374_v57 = vadd.f32 %v2061_v9, %v1385_v16  ;;  %v1400_v2 = vadd.f32 %v6693_v6, %v9056_v43  ;;  %6938 = vmatprep.mubr.msk.f32.mxu1 %vm579_vm2, %v9378_v61  ;;  %v11477_v46 = vld [vmem:[#allocation98_spill] sm:$0xff]  ;;  %v9388_v43 = vld [vmem:[%s7564_s21 + $0x2d8] sm:$0xff]  ;;  %v11479_v9 = vld [vmem:[#allocation100_spill] sm:$0xff] }
 0x142   : > { %v2071_v55 = vpop.f32.mrf.mxu0  ;;  %v1394_v49 = vpop.f32.mrf.mxu1  ;;  %11478 = vst [vmem:[#allocation179_spill] sm:$0xff] %v9388_v43 }
 0x143   : > { %v9382_v28 = vadd.f32 %v6791_v29, %v1400_v2  ;;  %v1395_v22 = vadd.f32 %v1394_v49, %v9066_v63  ;;  %v9398_v63 = vld [vmem:[%s7564_s21 + $0x2e8] sm:$0xff] }
 0x144   : > { %v6794_v59 = vpop.f32.mrf.mxu0  ;;  %7037 = vmatmul.mubr.msk.f32.gmra.mxu0 %vm579_vm2, %v11477_v46  ;;  %v6696_v16 = vpop.f32.mrf.mxu1  ;;  %6939 = vmatmul.mubr.msk.f32.gmra.mxu1 %vm579_vm2, %v9388_v43  ;;  %11481 = vst [vmem:[#allocation181_spill] sm:$0xff] %v9398_v63  ;;  %v9403_v46 = vld [vmem:[%s7564_s21 + $0x330] sm:$0xff] }
 0x145   : > { %11476 = vst [vmem:[#allocation178_spill] sm:$0xff] %v9382_v28  ;;  %7039 = vmatprep.mubr.msk.f32.mxu0 %vm579_vm2, %v11479_v9  ;;  %v9394_v6 = vadd.f32 %v2071_v55, %v1395_v22  ;;  %v1410_v29 = vadd.f32 %v6696_v16, %v9072_v54  ;;  %6941 = vmatprep.mubr.msk.f32.mxu1 %vm579_vm2, %v9398_v63  ;;  %v9406_v28 = vld [vmem:[%s7564_s21 + $0x338] sm:$0xff]  ;;  %v11483_v9 = vld [vmem:[#allocation103_spill] sm:$0xff]  ;;  %v9414_v16 = vld [vmem:[%s7564_s21 + $0x2f0] sm:$0xff] }
 0x146   : > { %v2081_v2 = vpop.f32.mrf.mxu0  ;;  %v1404_v49 = vpop.f32.mrf.mxu1  ;;  %11484 = vst [vmem:[#allocation183_spill] sm:$0xff] %v9414_v16 }
 0x147   : > { %11480 = vst [vmem:[#allocation180_spill] sm:$0xff] %v9394_v6  ;;  %v9408_v43 = vadd.f32 %v6794_v59, %v1410_v29  ;;  %v1405_v22 = vadd.f32 %v1404_v49, %v9082_v1  ;;  %v9424_v1 = vld [vmem:[%s7564_s21 + $0x300] sm:$0xff]  ;;  %v2825_v49 = vrot.slane %v9403_v46, 1 }
 0x148   : > { %v6797_v55 = vpop.f32.mrf.mxu0  ;;  %7040 = vmatmul.mubr.msk.f32.gmra.mxu0 %vm579_vm2, %v11483_v9  ;;  %v6699_v54 = vpop.f32.mrf.mxu1  ;;  %6942 = vmatmul.mubr.msk.f32.gmra.mxu1 %vm579_vm2, %v9414_v16  ;;  %v2826_v9 = vrot.slane %v9406_v28, 1 }
 0x149   : > { %11482 = vst [vmem:[#allocation182_spill] sm:$0xff] %v9408_v43  ;;  %7042 = vmatprep.mubr.msk.f32.mxu0 %vm579_vm2, %v8231_v19  ;;  %v9420_v6 = vadd.f32 %v2081_v2, %v1405_v22  ;;  %v1420_v59 = vadd.f32 %v6699_v54, %v9094_v13  ;;  %6944 = vmatprep.mubr.msk.f32.mxu1 %vm579_vm2, %v9424_v1  ;;  %v9431_v43 = vld [vmem:[%s7564_s21 + $0x340] sm:$0x3]  ;;  %v9439_v54 = vld [vmem:[%s7564_s21 + $0x308] sm:$0xff] }
 0x14a   : > { %v2091_v29 = vpop.f32.mrf.mxu0  ;;  %11486 = vst [vmem:[#allocation185_spill] sm:$0xff] %v9431_v43  ;;  %v1414_v16 = vpop.f32.mrf.mxu1  ;;  %11488 = vst [vmem:[#allocation187_spill] sm:$0xff] %v9439_v54  ;;  %v2828_v19 = vrot.slane %v9431_v43, 1  ;;  %v11490_v43 = vld [vmem:[#allocation111_spill] sm:$0xff] }
 0x14b   : > { %11485 = vst [vmem:[#allocation184_spill] sm:$0xff] %v9420_v6  ;;  %v9433_v63 = vadd.f32 %v6797_v55, %v1420_v59  ;;  %v1415_v2 = vadd.f32 %v1414_v16, %v9104_v5  ;;  %v9450_v59 = vld [vmem:[%s7564_s21 + $0x318] sm:$0xff] }
 0x14c   : > { %v6800_v22 = vpop.f32.mrf.mxu0  ;;  %7043 = vmatmul.mubr.msk.f32.gmra.mxu0 %vm579_vm2, %v8252_v7  ;;  %v6702_v13 = vpop.f32.mrf.mxu1  ;;  %6945 = vmatmul.mubr.msk.f32.gmra.mxu1 %vm579_vm2, %v9439_v54  ;;  %v9455_v7 = vsel %vm418_vm1, %v2825_v49, %v2826_v9  ;;  %v9470_v49 = vsel %vm418_vm1, %v2826_v9, %v2828_v19 }
 0x14d   : > { %11487 = vst [vmem:[#allocation186_spill] sm:$0xff] %v9433_v63  ;;  %7045 = vmatprep.mubr.msk.f32.mxu0 %vm579_vm2, %v8260_v20  ;;  %v9446_v55 = vadd.f32 %v2091_v29, %v1415_v2  ;;  %v1430_v5 = vadd.f32 %v6702_v13, %v9115_v41  ;;  %6947 = vmatprep.mubr.msk.f32.mxu1 %vm579_vm2, %v9450_v59  ;;  %11489 = vst [vmem:[#allocation188_spill] sm:$0xff] %v9455_v7  ;;  %v9463_v41 = vld [vmem:[%s7564_s21 + $0x320] sm:$0xff] }
 0x14e   : > { %v2101_v16 = vpop.f32.mrf.mxu0  ;;  %v1424_v63 = vpop.f32.mrf.mxu1  ;;  %11491 = vst [vmem:[#allocation189_spill] sm:$0xff] %v9470_v49 }
 0x14f   : > { %v9457_v54 = vadd.f32 %v6800_v22, %v1430_v5  ;;  %v1425_v20 = vadd.f32 %v1424_v63, %v9126_v27 }
 0x150   : > { %v6803_v6 = vpop.f32.mrf.mxu0  ;;  %7046 = vmatmul.mubr.msk.f32.gmra.mxu0 %vm579_vm2, %v11490_v43  ;;  %v6705_v29 = vpop.f32.mrf.mxu1  ;;  %6948 = vmatmul.mubr.msk.f32.gmra.mxu1 %vm579_vm2, %v9463_v41 }
 0x151   : > { %7048 = vmatprep.mubr.msk.f32.mxu0 %vm579_vm2, %v9455_v7  ;;  %v9472_v2 = vadd.f32 %v2101_v16, %v1425_v20  ;;  %v1440_v27 = vadd.f32 %v6705_v29, %v9135_v33  ;;  %6950 = vmatprep.mubr.msk.f32.mxu1 %vm579_vm2, %v9403_v46 }
 0x152   : > { %v2111_v63 = vpop.f32.mrf.mxu0  ;;  %v1434_v22 = vpop.f32.mrf.mxu1 }
 0x153   : > { %v9477_v13 = vadd.f32 %v6803_v6, %v1440_v27  ;;  %v1435_v5 = vadd.f32 %v1434_v22, %v9148_v36  ;;  %v11492_v22 = vld [vmem:[#allocation112_spill] sm:$0xff] }
 0x154   : > { %v6806_v43 = vpop.f32.mrf.mxu0  ;;  %7049 = vmatmul.mubr.msk.f32.gmra.mxu0 %vm579_vm2, %v9470_v49  ;;  %v6708_v7 = vpop.f32.mrf.mxu1  ;;  %6951 = vmatmul.mubr.msk.f32.gmra.mxu1 %vm579_vm2, %v9406_v28  ;;  %v11514_v49 = vld [vmem:[#allocation9_spill] sm:$0xff] }
 0x155   : > { %7151 = vmatprep.mubr.msk.f32.mxu0 %vm579_vm2, %v8843_v50  ;;  %v9486_v19 = vadd.f32 %v2111_v63, %v1435_v5  ;;  %v1450_v33 = vadd.f32 %v6708_v7, %v9154_v26  ;;  %7053 = vmatprep.mubr.msk.f32.mxu1 %vm579_vm2, %v8293_v44  ;;  %v11494_v5 = vld [vmem:[#allocation63_spill] sm:$0xff] }
 0x156   : > { %v2121_v20 = vpop.f32.mrf.mxu0  ;;  %v1444_v36 = vpop.f32.mrf.mxu1 }
 0x157   : > { %v9491_v9 = vadd.f32 %v6806_v43, %v1450_v33  ;;  %v1445_v6 = vadd.f32 %v1444_v36, %v9164_v4  ;;  %v11495_v36 = vld [vmem:[#allocation113_spill] sm:$0xff] }
 0x158   : > { %v6809_v16 = vpop.f32.mrf.mxu0  ;;  %7152 = vmatmul.mubr.msk.f32.vlgmr.msra.gmra.mxu0 %vm579_vm2, %v8866_v23  ;;  %v6711_v29 = vpop.f32.mrf.mxu1  ;;  %7054 = vmatmul.mubr.msk.f32.vlgmr.msra.gmra.mxu1 %vm579_vm2, %v8303_v25 }
 0x159   : > { %7346 = vmatpush3.msk.msra.mxu0 %vm708_vm0, %v8861_v3  ;;  %v9500_v7 = vadd.f32 %v2121_v20, %v1445_v6  ;;  %v1460_v26 = vadd.f32 %v6711_v29, %v8832_v0  ;;  %7248 = vmatpush3.msk.msra.mxu1 %vm708_vm0, %v8848_v24 }
 0x15a   : > { %v2131_v44 = vpop.f32.mrf.mxu0  ;;  %7056 = vmatprep.mubr.msk.f32.mxu1 %vm579_vm2, %v8311_v34  ;;  %v1454_v50 = vpop.f32.mrf.mxu1  ;;  %7154 = vmatprep.mubr.msk.f32.mxu0 %vm579_vm2, %v8875_v21 }
 0x15b   : > { %v9509_v23 = vadd.f32 %v6809_v16, %v1460_v26  ;;  %v1455_v25 = vadd.f32 %v1454_v50, %v8850_v8  ;;  %v11497_v16 = vld [vmem:[#allocation68_spill] sm:$0xff]  ;;  %v11498_v26 = vld [vmem:[#allocation77_spill] sm:$0xff]  ;;  %v11499_v50 = vld [vmem:[#allocation114_spill] sm:$0xff] }
 0x15c   : > { %v6812_v3 = vpop.f32.mrf.mxu0  ;;  %7155 = vmatmul.mubr.msk.f32.gmra.mxu0 %vm579_vm2, %v8890_v35  ;;  %v6714_v0 = vpop.f32.mrf.mxu1  ;;  %7057 = vmatmul.mubr.msk.f32.gmra.mxu1 %vm579_vm2, %v8331_v14 }
 0x15d   : > { %7157 = vmatprep.mubr.msk.f32.mxu0 %vm579_vm2, %v8899_v18  ;;  %v9518_v24 = vadd.f32 %v2131_v44, %v1455_v25  ;;  %v1470_v4 = vadd.f32 %v6714_v0, %v8863_v31  ;;  %7059 = vmatprep.mubr.msk.f32.mxu1 %vm579_vm2, %v8337_v51  ;;  %v11493_v18 = vld [vmem:[#allocation70_spill] sm:$0xff]  ;;  %v11502_v0 = vld [vmem:[#allocation69_spill] sm:$0xff] }
 0x15e   : > { %v2141_v21 = vpop.f32.mrf.mxu0  ;;  %v1464_v8 = vpop.f32.mrf.mxu1  ;;  %v11500_v25 = vld [vmem:[#allocation82_spill] sm:$0xff] }
 0x15f   : > { %v9523_v43 = vadd.f32 %v6812_v3, %v1470_v4  ;;  %v1465_v35 = vadd.f32 %v1464_v8, %v8881_v38  ;;  %v11503_v8 = vld [vmem:[#allocation115_spill] sm:$0xff] }
 0x160   : > { %v6815_v27 = vpop.f32.mrf.mxu0  ;;  %7158 = vmatmul.mubr.msk.f32.gmra.mxu0 %vm579_vm2, %v8912_v62  ;;  %v6717_v63 = vpop.f32.mrf.mxu1  ;;  %7060 = vmatmul.mubr.msk.f32.gmra.mxu1 %vm579_vm2, %v11492_v22 }
 0x161   : > { %7160 = vmatprep.mubr.msk.f32.mxu0 %vm579_vm2, %v11493_v18  ;;  %v9532_v31 = vadd.f32 %v2141_v21, %v1465_v35  ;;  %v1480_v33 = vadd.f32 %v6717_v63, %v11494_v5  ;;  %7062 = vmatprep.mubr.msk.f32.mxu1 %vm579_vm2, %v11495_v36  ;;  %v11505_v63 = vld [vmem:[#allocation74_spill] sm:$0xff] }
 0x162   : > { %v2151_v20 = vpop.f32.mrf.mxu0  ;;  %v1474_v38 = vpop.f32.mrf.mxu1 }
 0x163   : > { %v9537_v6 = vadd.f32 %v6815_v27, %v1480_v33  ;;  %v1475_v62 = vadd.f32 %v1474_v38, %v11497_v16  ;;  %v11506_v33 = vld [vmem:[#allocation91_spill] sm:$0xff]  ;;  %v11507_v16 = vld [vmem:[#allocation116_spill] sm:$0xff] }
 0x164   : > { %v6818_v29 = vpop.f32.mrf.mxu0  ;;  %7161 = vmatmul.mubr.msk.f32.gmra.mxu0 %vm579_vm2, %v11498_v26  ;;  %v6720_v44 = vpop.f32.mrf.mxu1  ;;  %7063 = vmatmul.mubr.msk.f32.gmra.mxu1 %vm579_vm2, %v11499_v50  ;;  %v11510_v26 = vld [vmem:[#allocation76_spill] sm:$0xff] }
 0x165   : > { %11496 = vst [vmem:[#allocation112_spill] sm:$0xff] %v9537_v6  ;;  %7163 = vmatprep.mubr.msk.f32.mxu0 %vm579_vm2, %v11500_v25  ;;  %v9546_v3 = vadd.f32 %v2151_v20, %v1475_v62  ;;  %v1490_v4 = vadd.f32 %v6720_v44, %v11502_v0  ;;  %7065 = vmatprep.mubr.msk.f32.mxu1 %vm579_vm2, %v11503_v8  ;;  %v11508_v20 = vld [vmem:[#allocation95_spill] sm:$0xff] }
 0x166   : > { %v2161_v21 = vpop.f32.mrf.mxu0  ;;  %v1484_v35 = vpop.f32.mrf.mxu1 }
 0x167   : > { %11501 = vst [vmem:[#allocation70_spill] sm:$0xff] %v9546_v3  ;;  %v9551_v27 = vadd.f32 %v6818_v29, %v1490_v4  ;;  %v1485_v18 = vadd.f32 %v1484_v35, %v11505_v63  ;;  %v11511_v29 = vld [vmem:[#allocation117_spill] sm:$0xff] }
 0x168   : > { %v6821_v5 = vpop.f32.mrf.mxu0  ;;  %7164 = vmatmul.mubr.msk.f32.gmra.mxu0 %vm579_vm2, %v11506_v33  ;;  %v6723_v38 = vpop.f32.mrf.mxu1  ;;  %7066 = vmatmul.mubr.msk.f32.gmra.mxu1 %vm579_vm2, %v11507_v16  ;;  %v11513_v35 = vld [vmem:[#allocation85_spill] sm:$0xff]  ;;  %v11515_v16 = vld [vmem:[#allocation118_spill] sm:$0xff] }
 0x169   : > { %11504 = vst [vmem:[#allocation63_spill] sm:$0xff] %v9551_v27  ;;  %7166 = vmatprep.mubr.msk.f32.mxu0 %vm579_vm2, %v11508_v20  ;;  %v9560_v62 = vadd.f32 %v2161_v21, %v1485_v18  ;;  %v1500_v44 = vadd.f32 %v6723_v38, %v11510_v26  ;;  %7068 = vmatprep.mubr.msk.f32.mxu1 %vm579_vm2, %v11511_v29  ;;  %v11516_v21 = vld [vmem:[#allocation12_spill] sm:$0xff]  ;;  %v11518_v38 = vld [vmem:[#allocation86_spill] sm:$0xff] }
 0x16a   : > { %v2171_v25 = vpop.f32.mrf.mxu0  ;;  %v1494_v0 = vpop.f32.mrf.mxu1  ;;  %v11523_v29 = vld [vmem:[#allocation120_spill] sm:$0xff] }
 0x16b   : > { %11509 = vst [vmem:[#allocation113_spill] sm:$0xff] %v9560_v62  ;;  %v9565_v4 = vadd.f32 %v6821_v5, %v1500_v44  ;;  %v1495_v63 = vadd.f32 %v1494_v0, %v11513_v35  ;;  %v11519_v5 = vld [vmem:[#allocation119_spill] sm:$0xff]  ;;  %v11521_v35 = vld [vmem:[#allocation96_spill] sm:$0xff]  ;;  %v11522_v62 = vld [vmem:[#allocation133_spill] sm:$0xff] }
 0x16c   : > { %v6824_v33 = vpop.f32.mrf.mxu0  ;;  %7167 = vmatmul.mubr.msk.f32.gmra.mxu0 %vm579_vm2, %v11514_v49  ;;  %v6726_v27 = vpop.f32.mrf.mxu1  ;;  %7069 = vmatmul.mubr.msk.f32.gmra.mxu1 %vm579_vm2, %v11515_v16 }
 0x16d   : > { %11512 = vst [vmem:[#allocation68_spill] sm:$0xff] %v9565_v4  ;;  %7169 = vmatprep.mubr.msk.f32.mxu0 %vm579_vm2, %v11516_v21  ;;  %v9574_v18 = vadd.f32 %v2171_v25, %v1495_v63  ;;  %v1510_v20 = vadd.f32 %v6726_v27, %v11518_v38  ;;  %7071 = vmatprep.mubr.msk.f32.mxu1 %vm579_vm2, %v11519_v5  ;;  %v11524_v25 = vld [vmem:[#allocation134_spill] sm:$0xff]  ;;  %v11526_v63 = vld [vmem:[#allocation101_spill] sm:$0xff] }
 0x16e   : > { %v2181_v26 = vpop.f32.mrf.mxu0  ;;  %v1504_v44 = vpop.f32.mrf.mxu1 }
 0x16f   : > { %11517 = vst [vmem:[#allocation77_spill] sm:$0xff] %v9574_v18  ;;  %v9579_v0 = vadd.f32 %v6824_v33, %v1510_v20  ;;  %v1505_v49 = vadd.f32 %v1504_v44, %v11521_v35  ;;  %v11527_v33 = vld [vmem:[#allocation121_spill] sm:$0xff]  ;;  %v11529_v35 = vld [vmem:[#allocation131_spill] sm:$0xff] }
 0x170   : > { %v6827_v4 = vpop.f32.mrf.mxu0  ;;  %7170 = vmatmul.mubr.msk.f32.gmra.mxu0 %vm579_vm2, %v11522_v62  ;;  %v6729_v16 = vpop.f32.mrf.mxu1  ;;  %7072 = vmatmul.mubr.msk.f32.gmra.mxu1 %vm579_vm2, %v11523_v29  ;;  %v11530_v18 = vld [vmem:[#allocation137_spill] sm:$0xff] }
 0x171   : > { %11520 = vst [vmem:[#allocation114_spill] sm:$0xff] %v9579_v0  ;;  %7172 = vmatprep.mubr.msk.f32.mxu0 %vm579_vm2, %v11524_v25  ;;  %v9588_v27 = vadd.f32 %v2181_v26, %v1505_v49  ;;  %v1520_v21 = vadd.f32 %v6729_v16, %v11526_v63  ;;  %7074 = vmatprep.mubr.msk.f32.mxu1 %vm579_vm2, %v11527_v33  ;;  %v11531_v25 = vld [vmem:[#allocation122_spill] sm:$0xff]  ;;  %v11534_v49 = vld [vmem:[#allocation132_spill] sm:$0xff]  ;;  %v11538_v33 = vld [vmem:[#allocation141_spill] sm:$0xff] }
 0x172   : > { %v2191_v38 = vpop.f32.mrf.mxu0  ;;  %v1514_v20 = vpop.f32.mrf.mxu1  ;;  %v11532_v26 = vld [vmem:[#allocation138_spill] sm:$0xff] }
 0x173   : > { %11525 = vst [vmem:[#allocation82_spill] sm:$0xff] %v9588_v27  ;;  %v9593_v44 = vadd.f32 %v6827_v4, %v1520_v21  ;;  %v1515_v62 = vadd.f32 %v1514_v20, %v11529_v35  ;;  %v11535_v21 = vld [vmem:[#allocation123_spill] sm:$0xff] }
 0x174   : > { %v6830_v0 = vpop.f32.mrf.mxu0  ;;  %7173 = vmatmul.mubr.msk.f32.gmra.mxu0 %vm579_vm2, %v11530_v18  ;;  %v6732_v29 = vpop.f32.mrf.mxu1  ;;  %7075 = vmatmul.mubr.msk.f32.gmra.mxu1 %vm579_vm2, %v11531_v25 }
 0x175   : > { %11528 = vst [vmem:[#allocation69_spill] sm:$0xff] %v9593_v44  ;;  %7175 = vmatprep.mubr.msk.f32.mxu0 %vm579_vm2, %v11532_v26  ;;  %v9602_v16 = vadd.f32 %v2191_v38, %v1515_v62  ;;  %v1530_v63 = vadd.f32 %v6732_v29, %v11534_v49  ;;  %7077 = vmatprep.mubr.msk.f32.mxu1 %vm579_vm2, %v11535_v21  ;;  %v11537_v44 = vld [vmem:[#allocation135_spill] sm:$0xff]  ;;  %v11539_v26 = vld [vmem:[#allocation124_spill] sm:$0xff] }
 0x176   : > { %v2201_v4 = vpop.f32.mrf.mxu0  ;;  %v1524_v20 = vpop.f32.mrf.mxu1  ;;  %v7505_v29 = vld [vmem:[%s7564_s21 + $0x108] sm:$0xff]  ;;  %v11541_v62 = vld [vmem:[#allocation136_spill] sm:$0xff] }
 0x177   : > { %11533 = vst [vmem:[#allocation115_spill] sm:$0xff] %v9602_v16  ;;  %v9607_v35 = vadd.f32 %v6830_v0, %v1530_v63  ;;  %v1525_v18 = vadd.f32 %v1524_v20, %v11537_v44  ;;  %v11542_v63 = vld [vmem:[#allocation125_spill] sm:$0xff]  ;;  %v7506_v21 = vld [vmem:[%s7564_s21 + $0x110] sm:$0xff] }
 0x178   : > { %v6833_v27 = vpop.f32.mrf.mxu0  ;;  %7176 = vmatmul.mubr.msk.f32.gmra.mxu0 %vm579_vm2, %v11538_v33  ;;  %v6735_v25 = vpop.f32.mrf.mxu1  ;;  %7078 = vmatmul.mubr.msk.f32.gmra.mxu1 %vm579_vm2, %v11539_v26  ;;  %v11544_v33 = vld [vmem:[#allocation139_spill] sm:$0xff] }
 0x179   : > { %11536 = vst [vmem:[#allocation74_spill] sm:$0xff] %v9607_v35  ;;  %7178 = vmatprep.mubr.msk.f32.mxu0 %vm579_vm2, %v7505_v29  ;;  %v9616_v38 = vadd.f32 %v2201_v4, %v1525_v18  ;;  %v1540_v0 = vadd.f32 %v6735_v25, %v11541_v62  ;;  %7080 = vmatprep.mubr.msk.f32.mxu1 %vm579_vm2, %v11542_v63  ;;  %v11545_v29 = vld [vmem:[#allocation126_spill] sm:$0xff]  ;;  %v11547_v18 = vld [vmem:[#allocation140_spill] sm:$0xff]  ;;  %v7508_v63 = vld [vmem:[%s7564_s21 + $0x128] sm:$0xff] }
 0x17a   : > { %v2211_v49 = vpop.f32.mrf.mxu0  ;;  %v1534_v44 = vpop.f32.mrf.mxu1  ;;  %v7507_v25 = vld [vmem:[%s7564_s21 + $0x120] sm:$0xff] }
 0x17b   : > { %11540 = vst [vmem:[#allocation91_spill] sm:$0xff] %v9616_v38  ;;  %v9621_v20 = vadd.f32 %v6833_v27, %v1540_v0  ;;  %v1535_v35 = vadd.f32 %v1534_v44, %v11544_v33  ;;  %v11548_v0 = vld [vmem:[#allocation127_spill] sm:$0xff] }
 0x17c   : > { %v6836_v16 = vpop.f32.mrf.mxu0  ;;  %7179 = vmatmul.mubr.msk.f32.gmra.mxu0 %vm579_vm2, %v7506_v21  ;;  %v6738_v26 = vpop.f32.mrf.mxu1  ;;  %7081 = vmatmul.mubr.msk.f32.gmra.mxu1 %vm579_vm2, %v11545_v29  ;;  %v11550_v21 = vld [vmem:[#allocation142_spill] sm:$0xff] }
 0x17d   : > { %11543 = vst [vmem:[#allocation95_spill] sm:$0xff] %v9621_v20  ;;  %7181 = vmatprep.mubr.msk.f32.mxu0 %vm579_vm2, %v7507_v25  ;;  %v9630_v4 = vadd.f32 %v2211_v49, %v1535_v35  ;;  %v1550_v27 = vadd.f32 %v6738_v26, %v11547_v18  ;;  %7083 = vmatprep.mubr.msk.f32.mxu1 %vm579_vm2, %v11548_v0  ;;  %v11551_v25 = vld [vmem:[#allocation128_spill] sm:$0xff]  ;;  %v7509_v35 = vld [vmem:[%s7564_s21 + $0x138] sm:$0xff]  ;;  %v11553_v49 = vld [vmem:[#allocation143_spill] sm:$0xff] }
 0x17e   : > { %v2221_v62 = vpop.f32.mrf.mxu0  ;;  %v1544_v44 = vpop.f32.mrf.mxu1  ;;  %v7510_v0 = vld [vmem:[%s7564_s21 + $0x140] sm:$0xff] }
 0x17f   : > { %11546 = vst [vmem:[#allocation76_spill] sm:$0xff] %v9630_v4  ;;  %v9635_v33 = vadd.f32 %v6836_v16, %v1550_v27  ;;  %v1545_v20 = vadd.f32 %v1544_v44, %v11550_v21  ;;  %v11554_v27 = vld [vmem:[#allocation129_spill] sm:$0xff] }
 0x180   : > { %v6839_v38 = vpop.f32.mrf.mxu0  ;;  %7182 = vmatmul.mubr.msk.f32.gmra.mxu0 %vm579_vm2, %v7508_v63  ;;  %v6741_v29 = vpop.f32.mrf.mxu1  ;;  %7084 = vmatmul.mubr.msk.f32.gmra.mxu1 %vm579_vm2, %v11551_v25  ;;  %v11556_v63 = vld [vmem:[#allocation144_spill] sm:$0xff] }
 0x181   : > { %11549 = vst [vmem:[#allocation85_spill] sm:$0xff] %v9635_v33  ;;  %7184 = vmatprep.mubr.msk.f32.mxu0 %vm579_vm2, %v7509_v35  ;;  %v9644_v26 = vadd.f32 %v2221_v62, %v1545_v20  ;;  %v1560_v16 = vadd.f32 %v6741_v29, %v11553_v49  ;;  %7086 = vmatprep.mubr.msk.f32.mxu1 %vm579_vm2, %v11554_v27  ;;  %v11557_v35 = vld [vmem:[#allocation83_spill] sm:$0xff]  ;;  %v7511_v20 = vld [vmem:[%s7564_s21 + $0x150] sm:$0xff]  ;;  %v11559_v62 = vld [vmem:[#allocation145_spill] sm:$0xff] }
 0x182   : > { %v2231_v18 = vpop.f32.mrf.mxu0  ;;  %v1554_v44 = vpop.f32.mrf.mxu1  ;;  %v7512_v27 = vld [vmem:[%s7564_s21 + $0x158] sm:$0xff] }
 0x183   : > { %11552 = vst [vmem:[#allocation9_spill] sm:$0xff] %v9644_v26  ;;  %v9649_v21 = vadd.f32 %v6839_v38, %v1560_v16  ;;  %v1555_v33 = vadd.f32 %v1554_v44, %v11556_v63  ;;  %v11560_v16 = vld [vmem:[#allocation84_spill] sm:$0xff] }
 0x184   : > { %v6842_v4 = vpop.f32.mrf.mxu0  ;;  %7185 = vmatmul.mubr.msk.f32.gmra.mxu0 %vm579_vm2, %v7510_v0  ;;  %v6744_v25 = vpop.f32.mrf.mxu1  ;;  %7087 = vmatmul.mubr.msk.f32.gmra.mxu1 %vm579_vm2, %v11557_v35  ;;  %v11562_v0 = vld [vmem:[#allocation146_spill] sm:$0xff] }
 0x185   : > { %11555 = vst [vmem:[#allocation12_spill] sm:$0xff] %v9649_v21  ;;  %7187 = vmatprep.mubr.msk.f32.mxu0 %vm579_vm2, %v7511_v20  ;;  %v9658_v29 = vadd.f32 %v2231_v18, %v1555_v33  ;;  %v1570_v38 = vadd.f32 %v6744_v25, %v11559_v62  ;;  %7089 = vmatprep.mubr.msk.f32.mxu1 %vm579_vm2, %v11560_v16  ;;  %v11563_v20 = vld [vmem:[#allocation89_spill] sm:$0xff]  ;;  %v7513_v33 = vld [vmem:[%s7564_s21 + $0x168] sm:$0xff] }
 0x186   : > { %v2241_v49 = vpop.f32.mrf.mxu0  ;;  %v1564_v44 = vpop.f32.mrf.mxu1  ;;  %v11565_v18 = vld [vmem:[#allocation149_spill] sm:$0xff] }
 0x187   : > { %11558 = vst [vmem:[#allocation86_spill] sm:$0xff] %v9658_v29  ;;  %v9663_v63 = vadd.f32 %v6842_v4, %v1570_v38  ;;  %v1565_v21 = vadd.f32 %v1564_v44, %v11562_v0  ;;  %v11566_v38 = vld [vmem:[#allocation93_spill] sm:$0xff]  ;;  %v11567_v44 = vld [vmem:[#allocation147_spill] sm:$0xff] }
 0x188   : > { %v6845_v26 = vpop.f32.mrf.mxu0  ;;  %7188 = vmatmul.mubr.msk.f32.gmra.mxu0 %vm579_vm2, %v7512_v27  ;;  %v6747_v35 = vpop.f32.mrf.mxu1  ;;  %7090 = vmatmul.mubr.msk.f32.gmra.mxu1 %vm579_vm2, %v11563_v20  ;;  %v3290_v0 = vrot.slane %v11567_v44, 2  ;;  %v11568_v27 = vld [vmem:[#allocation148_spill] sm:$0xff]  ;;  %v11570_v20 = vld [vmem:[#allocation151_spill] sm:$0xff] }
 0x189   : > { %11561 = vst [vmem:[#allocation96_spill] sm:$0xff] %v9663_v63  ;;  %7190 = vmatprep.mubr.msk.f32.mxu0 %vm579_vm2, %v7513_v33  ;;  %v9672_v25 = vadd.f32 %v2241_v49, %v1565_v21  ;;  %v1580_v62 = vadd.f32 %v6747_v35, %v11565_v18  ;;  %7092 = vmatprep.mubr.msk.f32.mxu1 %vm579_vm2, %v11566_v38  ;;  %v3291_v29 = vrot.slane %v11568_v27, 2  ;;  %v7514_v33 = vld [vmem:[%s7564_s21 + $0x170] sm:$0xff]  ;;  %v11571_v35 = vld [vmem:[#allocation94_spill] sm:$0xff] }
 0x18a   : > { %v2251_v4 = vpop.f32.mrf.mxu0  ;;  %v1574_v63 = vpop.f32.mrf.mxu1  ;;  %v11573_v18 = vld [vmem:[#allocation152_spill] sm:$0xff] }
 0x18b   : > { %11564 = vst [vmem:[#allocation133_spill] sm:$0xff] %v9672_v25  ;;  %v9679_v16 = vadd.f32 %v6845_v26, %v1580_v62  ;;  %v1575_v5 = vadd.f32 %v1574_v63, %v11570_v20  ;;  %v11574_v62 = vld [vmem:[#allocation130_spill] sm:$0xff]  ;;  %v9694_v63 = vld [vmem:[%s7564_s21 + $0x198] sm:$0xff]  ;;  %v9698_v38 = vsel %vm1613_vm3, %v3290_v0, %v3291_v29  ;;  %v11582_v0 = vld [vmem:[#allocation155_spill] sm:$0xff] }
 0x18c   : > { %v6848_v3 = vpop.f32.mrf.mxu0  ;;  %7191 = vmatmul.mubr.msk.f32.gmra.mxu0 %vm579_vm2, %v7514_v33  ;;  %v6750_v21 = vpop.f32.mrf.mxu1  ;;  %7093 = vmatmul.mubr.msk.f32.gmra.mxu1 %vm579_vm2, %v11571_v35  ;;  %v11575_v20 = vld [vmem:[#allocation150_spill] sm:$0xff]  ;;  %11576 = vst [vmem:[#allocation131_spill] sm:$0xff] %v9698_v38 }
 0x18d   : > { %11569 = vst [vmem:[#allocation134_spill] sm:$0xff] %v9679_v16  ;;  %7193 = vmatprep.mubr.msk.f32.mxu0 %vm579_vm2, %v11567_v44  ;;  %v9688_v49 = vadd.f32 %v2251_v4, %v1575_v5  ;;  %v1590_v25 = vadd.f32 %v6750_v21, %v11573_v18  ;;  %7095 = vmatprep.mubr.msk.f32.mxu1 %vm579_vm2, %v11574_v62  ;;  %v3293_v33 = vrot.slane %v11575_v20, 2  ;;  %v11578_v44 = vld [vmem:[#allocation154_spill] sm:$0xff] }
 0x18e   : > { %v2261_v26 = vpop.f32.mrf.mxu0  ;;  %v1584_v16 = vpop.f32.mrf.mxu1  ;;  %v11579_v21 = vld [vmem:[#allocation2_spill] sm:$0xff] }
 0x18f   : > { %11572 = vst [vmem:[#allocation101_spill] sm:$0xff] %v9688_v49  ;;  %v9700_v35 = vadd.f32 %v6848_v3, %v1590_v25  ;;  %v1585_v6 = vadd.f32 %v1584_v16, %v11578_v44  ;;  %v9710_v18 = vld [vmem:[%s7564_s21 + $0x1a0] sm:$0xff]  ;;  %v9718_v16 = vsel %vm1613_vm3, %v3291_v29, %v3293_v33 }
 0x190   : > { %v6851_v5 = vpop.f32.mrf.mxu0  ;;  %7194 = vmatmul.mubr.msk.f32.gmra.mxu0 %vm579_vm2, %v11568_v27  ;;  %v6753_v4 = vpop.f32.mrf.mxu1  ;;  %7096 = vmatmul.mubr.msk.f32.gmra.mxu1 %vm579_vm2, %v11579_v21  ;;  %11580 = vst [vmem:[#allocation138_spill] sm:$0xff] %v9710_v18  ;;  %11583 = vst [vmem:[#allocation135_spill] sm:$0xff] %v9718_v16  ;;  %v11587_v29 = vld [vmem:[#allocation158_spill] sm:$0xff] }
 0x191   : > { %11577 = vst [vmem:[#allocation137_spill] sm:$0xff] %v9700_v35  ;;  %7196 = vmatprep.mubr.msk.f32.mxu0 %vm579_vm2, %v9694_v63  ;;  %v9712_v20 = vadd.f32 %v2261_v26, %v1585_v6  ;;  %v1600_v3 = vadd.f32 %v6753_v4, %v11582_v0  ;;  %7098 = vmatprep.mubr.msk.f32.mxu1 %vm579_vm2, %v9698_v38  ;;  %v11585_v35 = vld [vmem:[#allocation157_spill] sm:$0xff]  ;;  %v11590_v38 = vld [vmem:[#allocation160_spill] sm:$0xff] }
 0x192   : > { %v2271_v25 = vpop.f32.mrf.mxu0  ;;  %v1594_v27 = vpop.f32.mrf.mxu1  ;;  %v11586_v26 = vld [vmem:[#allocation13_spill] sm:$0xff] }
 0x193   : > { %11581 = vst [vmem:[#allocation132_spill] sm:$0xff] %v9712_v20  ;;  %v9720_v44 = vadd.f32 %v6851_v5, %v1600_v3  ;;  %v1595_v21 = vadd.f32 %v1594_v27, %v11585_v35  ;;  %v11588_v5 = vld [vmem:[#allocation3_spill] sm:$0xff] }
 0x194   : > { %v6854_v49 = vpop.f32.mrf.mxu0  ;;  %7197 = vmatmul.mubr.msk.f32.gmra.mxu0 %vm579_vm2, %v9710_v18  ;;  %v6756_v6 = vpop.f32.mrf.mxu1  ;;  %7099 = vmatmul.mubr.msk.f32.gmra.mxu1 %vm579_vm2, %v9718_v16  ;;  %v11589_v27 = vld [vmem:[#allocation11_spill] sm:$0xff]  ;;  %v11591_v18 = vld [vmem:[#allocation4_spill] sm:$0xff] }
 0x195   : > { %11584 = vst [vmem:[#allocation141_spill] sm:$0xff] %v9720_v44  ;;  %7199 = vmatprep.mubr.msk.f32.mxu0 %vm579_vm2, %v11586_v26  ;;  %v9729_v4 = vadd.f32 %v2271_v25, %v1595_v21  ;;  %v1610_v33 = vadd.f32 %v6756_v6, %v11587_v29  ;;  %7101 = vmatprep.mubr.msk.f32.mxu1 %vm579_vm2, %v11588_v5  ;;  %v11592_v25 = vld [vmem:[#allocation159_spill] sm:$0xff] }
 0x196   : > { %v2281_v0 = vpop.f32.mrf.mxu0  ;;  %v1604_v35 = vpop.f32.mrf.mxu1 }
 0x197   : > { %v9734_v3 = vadd.f32 %v6854_v49, %v1610_v33  ;;  %v1605_v44 = vadd.f32 %v1604_v35, %v11589_v27  ;;  %v11593_v49 = vld [vmem:[#allocation5_spill] sm:$0xff]  ;;  %v11595_v35 = vld [vmem:[#allocation162_spill] sm:$0xff] }
 0x198   : > { %v6957_v20 = vpop.f32.mrf.mxu0  ;;  %7200 = vmatmul.mubr.msk.f32.gmra.mxu0 %vm579_vm2, %v11590_v38  ;;  %v6859_v16 = vpop.f32.mrf.mxu1  ;;  %7102 = vmatmul.mubr.msk.f32.gmra.mxu1 %vm579_vm2, %v11591_v18  ;;  %v11596_v27 = vld [vmem:[#allocation6_spill] sm:$0xff] }
 0x199   : > { %7202 = vmatprep.mubr.msk.f32.mxu0 %vm579_vm2, %v9198_v58  ;;  %v9743_v21 = vadd.f32 %v2281_v0, %v1605_v44  ;;  %v2755_v6 = vadd.f32 %v6859_v16, %v11592_v25  ;;  %7104 = vmatprep.mubr.msk.f32.mxu1 %vm579_vm2, %v11593_v49  ;;  %v11597_v16 = vld [vmem:[#allocation161_spill] sm:$0xff] }
 0x19a   : > { %v2907_v26 = vpop.f32.mrf.mxu0  ;;  %v2435_v29 = vpop.f32.mrf.mxu1 }
 0x19b   : > { %v9748_v33 = vadd.f32 %v6957_v20, %v2755_v6  ;;  %v2754_v38 = vadd.f32 %v2435_v29, %v9194_v42  ;;  %v11598_v20 = vld [vmem:[#allocation7_spill] sm:$0xff] }
 0x19c   : > { %v6960_v5 = vpop.f32.mrf.mxu0  ;;  %7203 = vmatmul.mubr.msk.f32.gmra.mxu0 %vm579_vm2, %v11595_v35  ;;  %v6862_v18 = vpop.f32.mrf.mxu1  ;;  %7105 = vmatmul.mubr.msk.f32.gmra.mxu1 %vm579_vm2, %v11596_v27  ;;  %v11600_v35 = vld [vmem:[#allocation164_spill] sm:$0xff] }
 0x19d   : > { %11594 = vst [vmem:[#allocation136_spill] sm:$0xff] %v9748_v33  ;;  %7205 = vmatprep.mubr.msk.f32.mxu0 %vm579_vm2, %v9218_v39  ;;  %v9757_v58 = vadd.f32 %v2907_v26, %v2754_v38  ;;  %v2757_v44 = vadd.f32 %v6862_v18, %v11597_v16  ;;  %7107 = vmatprep.mubr.msk.f32.mxu1 %vm579_vm2, %v11598_v20  ;;  %v11601_v27 = vld [vmem:[#allocation8_spill] sm:$0xff]  ;;  %v11602_v26 = vld [vmem:[#allocation163_spill] sm:$0xff] }
 0x19e   : > { %v2917_v0 = vpop.f32.mrf.mxu0  ;;  %v2445_v42 = vpop.f32.mrf.mxu1 }
 0x19f   : > { %v9762_v25 = vadd.f32 %v6960_v5, %v2757_v44  ;;  %v2756_v6 = vadd.f32 %v2445_v42, %v9214_v47  ;;  %v11603_v5 = vld [vmem:[#allocation10_spill] sm:$0xff] }
 0x1a0   : > { %v6963_v29 = vpop.f32.mrf.mxu0  ;;  %7206 = vmatmul.mubr.msk.f32.gmra.mxu0 %vm579_vm2, %v11600_v35  ;;  %v6865_v33 = vpop.f32.mrf.mxu1  ;;  %7108 = vmatmul.mubr.msk.f32.gmra.mxu1 %vm579_vm2, %v11601_v27  ;;  %v11605_v35 = vld [vmem:[#allocation166_spill] sm:$0xff] }
 0x1a1   : > { %11599 = vst [vmem:[#allocation139_spill] sm:$0xff] %v9762_v25  ;;  %7208 = vmatprep.mubr.msk.f32.mxu0 %vm579_vm2, %v9238_v60  ;;  %v9771_v39 = vadd.f32 %v2917_v0, %v2756_v6  ;;  %v2759_v38 = vadd.f32 %v6865_v33, %v11602_v26  ;;  %7110 = vmatprep.mubr.msk.f32.mxu1 %vm579_vm2, %v11603_v5  ;;  %v11606_v27 = vld [vmem:[#allocation14_spill] sm:$0xff]  ;;  %v11607_v33 = vld [vmem:[#allocation165_spill] sm:$0xff] }
 0x1a2   : > { %v2927_v18 = vpop.f32.mrf.mxu0  ;;  %v2455_v47 = vpop.f32.mrf.mxu1 }
 0x1a3   : > { %v9776_v16 = vadd.f32 %v6963_v29, %v2759_v38  ;;  %v2758_v44 = vadd.f32 %v2455_v47, %v9234_v37  ;;  %v11608_v29 = vld [vmem:[#allocation16_spill] sm:$0xff] }
 0x1a4   : > { %v6966_v42 = vpop.f32.mrf.mxu0  ;;  %7209 = vmatmul.mubr.msk.f32.gmra.mxu0 %vm579_vm2, %v11605_v35  ;;  %v6868_v25 = vpop.f32.mrf.mxu1  ;;  %7111 = vmatmul.mubr.msk.f32.gmra.mxu1 %vm579_vm2, %v11606_v27  ;;  %v11610_v35 = vld [vmem:[#allocation168_spill] sm:$0xff]  ;;  %v11611_v27 = vld [vmem:[#allocation17_spill] sm:$0xff] }
 0x1a5   : > { %11604 = vst [vmem:[#allocation140_spill] sm:$0xff] %v9776_v16  ;;  %7211 = vmatprep.mubr.msk.f32.mxu0 %vm579_vm2, %v9258_v56  ;;  %v9785_v60 = vadd.f32 %v2927_v18, %v2758_v44  ;;  %v2761_v0 = vadd.f32 %v6868_v25, %v11607_v33  ;;  %7113 = vmatprep.mubr.msk.f32.mxu1 %vm579_vm2, %v11608_v29  ;;  %v11612_v25 = vld [vmem:[#allocation167_spill] sm:$0xff] }
 0x1a6   : > { %v2937_v6 = vpop.f32.mrf.mxu0  ;;  %v2465_v37 = vpop.f32.mrf.mxu1 }
 0x1a7   : > { %v9790_v26 = vadd.f32 %v6966_v42, %v2761_v0  ;;  %v2760_v38 = vadd.f32 %v2465_v37, %v9254_v12  ;;  %v11613_v42 = vld [vmem:[#allocation20_spill] sm:$0xff] }
 0x1a8   : > { %v6969_v47 = vpop.f32.mrf.mxu0  ;;  %7212 = vmatmul.mubr.msk.f32.gmra.mxu0 %vm579_vm2, %v11610_v35  ;;  %v6871_v16 = vpop.f32.mrf.mxu1  ;;  %7114 = vmatmul.mubr.msk.f32.gmra.mxu1 %vm579_vm2, %v11611_v27  ;;  %v11615_v35 = vld [vmem:[#allocation170_spill] sm:$0xff]  ;;  %v11616_v27 = vld [vmem:[#allocation21_spill] sm:$0xff] }
 0x1a9   : > { %11609 = vst [vmem:[#allocation142_spill] sm:$0xff] %v9790_v26  ;;  %7214 = vmatprep.mubr.msk.f32.mxu0 %vm579_vm2, %v9278_v17  ;;  %v9799_v56 = vadd.f32 %v2937_v6, %v2760_v38  ;;  %v2763_v18 = vadd.f32 %v6871_v16, %v11612_v25  ;;  %7116 = vmatprep.mubr.msk.f32.mxu1 %vm579_vm2, %v11613_v42  ;;  %v11617_v16 = vld [vmem:[#allocation169_spill] sm:$0xff] }
 0x1aa   : > { %v2947_v44 = vpop.f32.mrf.mxu0  ;;  %v2475_v12 = vpop.f32.mrf.mxu1 }
 0x1ab   : > { %v9804_v33 = vadd.f32 %v6969_v47, %v2763_v18  ;;  %v2762_v0 = vadd.f32 %v2475_v12, %v9274_v53  ;;  %v11618_v47 = vld [vmem:[#allocation22_spill] sm:$0xff] }
 0x1ac   : > { %v6972_v37 = vpop.f32.mrf.mxu0  ;;  %7215 = vmatmul.mubr.msk.f32.gmra.mxu0 %vm579_vm2, %v11615_v35  ;;  %v6874_v26 = vpop.f32.mrf.mxu1  ;;  %7117 = vmatmul.mubr.msk.f32.gmra.mxu1 %vm579_vm2, %v11616_v27  ;;  %v11620_v35 = vld [vmem:[#allocation172_spill] sm:$0xff]  ;;  %v11621_v27 = vld [vmem:[#allocation25_spill] sm:$0xff] }
 0x1ad   : > { %11614 = vst [vmem:[#allocation143_spill] sm:$0xff] %v9804_v33  ;;  %7217 = vmatprep.mubr.msk.f32.mxu0 %vm579_vm2, %v9298_v32  ;;  %v9813_v17 = vadd.f32 %v2947_v44, %v2762_v0  ;;  %v2765_v6 = vadd.f32 %v6874_v26, %v11617_v16  ;;  %7119 = vmatprep.mubr.msk.f32.mxu1 %vm579_vm2, %v11618_v47  ;;  %v11622_v26 = vld [vmem:[#allocation171_spill] sm:$0xff] }
 0x1ae   : > { %v2957_v38 = vpop.f32.mrf.mxu0  ;;  %v2485_v53 = vpop.f32.mrf.mxu1 }
 0x1af   : > { %v9818_v25 = vadd.f32 %v6972_v37, %v2765_v6  ;;  %v2764_v18 = vadd.f32 %v2485_v53, %v9294_v48  ;;  %v11623_v37 = vld [vmem:[#allocation27_spill] sm:$0xff] }
 0x1b0   : > { %v6975_v12 = vpop.f32.mrf.mxu0  ;;  %7218 = vmatmul.mubr.msk.f32.gmra.mxu0 %vm579_vm2, %v11620_v35  ;;  %v6877_v33 = vpop.f32.mrf.mxu1  ;;  %7120 = vmatmul.mubr.msk.f32.gmra.mxu1 %vm579_vm2, %v11621_v27  ;;  %v11625_v35 = vld [vmem:[#allocation174_spill] sm:$0xff]  ;;  %v11626_v27 = vld [vmem:[#allocation28_spill] sm:$0xff] }
 0x1b1   : > { %11619 = vst [vmem:[#allocation144_spill] sm:$0xff] %v9818_v25  ;;  %7220 = vmatprep.mubr.msk.f32.mxu0 %vm579_vm2, %v9318_v30  ;;  %v9827_v32 = vadd.f32 %v2957_v38, %v2764_v18  ;;  %v2767_v44 = vadd.f32 %v6877_v33, %v11622_v26  ;;  %7122 = vmatprep.mubr.msk.f32.mxu1 %vm579_vm2, %v11623_v37  ;;  %v11627_v33 = vld [vmem:[#allocation173_spill] sm:$0xff] }
 0x1b2   : > { %v2967_v0 = vpop.f32.mrf.mxu0  ;;  %v2495_v48 = vpop.f32.mrf.mxu1 }
 0x1b3   : > { %v9832_v16 = vadd.f32 %v6975_v12, %v2767_v44  ;;  %v2766_v6 = vadd.f32 %v2495_v48, %v9314_v10  ;;  %v11628_v12 = vld [vmem:[#allocation32_spill] sm:$0xff] }
 0x1b4   : > { %v6978_v53 = vpop.f32.mrf.mxu0  ;;  %7221 = vmatmul.mubr.msk.f32.gmra.mxu0 %vm579_vm2, %v11625_v35  ;;  %v6880_v25 = vpop.f32.mrf.mxu1  ;;  %7123 = vmatmul.mubr.msk.f32.gmra.mxu1 %vm579_vm2, %v11626_v27  ;;  %v11630_v35 = vld [vmem:[#allocation176_spill] sm:$0xff]  ;;  %v11631_v27 = vld [vmem:[#allocation34_spill] sm:$0xff] }
 0x1b5   : > { %11624 = vst [vmem:[#allocation145_spill] sm:$0xff] %v9832_v16  ;;  %7223 = vmatprep.mubr.msk.f32.mxu0 %vm579_vm2, %v9338_v15  ;;  %v9841_v30 = vadd.f32 %v2967_v0, %v2766_v6  ;;  %v2769_v38 = vadd.f32 %v6880_v25, %v11627_v33  ;;  %7125 = vmatprep.mubr.msk.f32.mxu1 %vm579_vm2, %v11628_v12  ;;  %v11632_v25 = vld [vmem:[#allocation175_spill] sm:$0xff] }
 0x1b6   : > { %v2977_v18 = vpop.f32.mrf.mxu0  ;;  %v2505_v10 = vpop.f32.mrf.mxu1 }
 0x1b7   : > { %v9846_v26 = vadd.f32 %v6978_v53, %v2769_v38  ;;  %v2768_v44 = vadd.f32 %v2505_v10, %v9334_v40  ;;  %v11633_v53 = vld [vmem:[#allocation35_spill] sm:$0xff] }
 0x1b8   : > { %v6981_v48 = vpop.f32.mrf.mxu0  ;;  %7224 = vmatmul.mubr.msk.f32.gmra.mxu0 %vm579_vm2, %v11630_v35  ;;  %v6883_v16 = vpop.f32.mrf.mxu1  ;;  %7126 = vmatmul.mubr.msk.f32.gmra.mxu1 %vm579_vm2, %v11631_v27 }
 0x1b9   : > { %11629 = vst [vmem:[#allocation146_spill] sm:$0xff] %v9846_v26  ;;  %7226 = vmatprep.mubr.msk.f32.mxu0 %vm579_vm2, %v9358_v45  ;;  %v9855_v15 = vadd.f32 %v2977_v18, %v2768_v44  ;;  %v2771_v0 = vadd.f32 %v6883_v16, %v11632_v25  ;;  %7128 = vmatprep.mubr.msk.f32.mxu1 %vm579_vm2, %v11633_v53  ;;  %v11635_v26 = vld [vmem:[#allocation39_spill] sm:$0xff]  ;;  %v11637_v16 = vld [vmem:[#allocation177_spill] sm:$0xff] }
 0x1ba   : > { %v2987_v6 = vpop.f32.mrf.mxu0  ;;  %v2515_v40 = vpop.f32.mrf.mxu1 }
 0x1bb   : > { %v9860_v33 = vadd.f32 %v6981_v48, %v2771_v0  ;;  %v2770_v38 = vadd.f32 %v2515_v40, %v9354_v52  ;;  %v11638_v48 = vld [vmem:[#allocation41_spill] sm:$0xff]  ;;  %v11640_v40 = vld [vmem:[#allocation179_spill] sm:$0xff] }
 0x1bc   : > { %v6984_v10 = vpop.f32.mrf.mxu0  ;;  %7227 = vmatmul.mubr.msk.f32.gmra.mxu0 %vm579_vm2, %v9368_v11  ;;  %v6886_v35 = vpop.f32.mrf.mxu1  ;;  %7129 = vmatmul.mubr.msk.f32.gmra.mxu1 %vm579_vm2, %v11635_v26  ;;  %v11641_v26 = vld [vmem:[#allocation42_spill] sm:$0xff] }
 0x1bd   : > { %11634 = vst [vmem:[#allocation149_spill] sm:$0xff] %v9860_v33  ;;  %7229 = vmatprep.mubr.msk.f32.mxu0 %vm579_vm2, %v9378_v61  ;;  %v9869_v45 = vadd.f32 %v2987_v6, %v2770_v38  ;;  %v2773_v18 = vadd.f32 %v6886_v35, %v11637_v16  ;;  %7131 = vmatprep.mubr.msk.f32.mxu1 %vm579_vm2, %v11638_v48  ;;  %v11642_v61 = vld [vmem:[#allocation181_spill] sm:$0xff]  ;;  %v11644_v38 = vld [vmem:[#allocation178_spill] sm:$0xff]  ;;  %v11649_v48 = vld [vmem:[#allocation48_spill] sm:$0xff] }
 0x1be   : > { %v2997_v44 = vpop.f32.mrf.mxu0  ;;  %v2525_v52 = vpop.f32.mrf.mxu1 }
 0x1bf   : > { %11636 = vst [vmem:[#allocation147_spill] sm:$0xff] %v9869_v45  ;;  %v9874_v25 = vadd.f32 %v6984_v10, %v2773_v18  ;;  %v2772_v11 = vadd.f32 %v2525_v52, %v9374_v57  ;;  %v11645_v10 = vld [vmem:[#allocation46_spill] sm:$0xff]  ;;  %v11647_v52 = vld [vmem:[#allocation180_spill] sm:$0xff]  ;;  %v11648_v45 = vld [vmem:[#allocation183_spill] sm:$0xff] }
 0x1c0   : > { %v6987_v0 = vpop.f32.mrf.mxu0  ;;  %7230 = vmatmul.mubr.msk.f32.gmra.mxu0 %vm579_vm2, %v11640_v40  ;;  %v6889_v33 = vpop.f32.mrf.mxu1  ;;  %7132 = vmatmul.mubr.msk.f32.gmra.mxu1 %vm579_vm2, %v11641_v26 }
 0x1c1   : > { %11639 = vst [vmem:[#allocation148_spill] sm:$0xff] %v9874_v25  ;;  %7232 = vmatprep.mubr.msk.f32.mxu0 %vm579_vm2, %v11642_v61  ;;  %v9883_v6 = vadd.f32 %v2997_v44, %v2772_v11  ;;  %v2775_v35 = vadd.f32 %v6889_v33, %v11644_v38  ;;  %7134 = vmatprep.mubr.msk.f32.mxu1 %vm579_vm2, %v11645_v10  ;;  %v11650_v44 = vld [vmem:[#allocation182_spill] sm:$0xff] }
 0x1c2   : > { %v3007_v16 = vpop.f32.mrf.mxu0  ;;  %v2535_v57 = vpop.f32.mrf.mxu1 }
 0x1c3   : > { %11643 = vst [vmem:[#allocation151_spill] sm:$0xff] %v9883_v6  ;;  %v9888_v18 = vadd.f32 %v6987_v0, %v2775_v35  ;;  %v2774_v40 = vadd.f32 %v2535_v57, %v11647_v52  ;;  %v11651_v0 = vld [vmem:[#allocation49_spill] sm:$0xff]  ;;  %v11653_v57 = vld [vmem:[#allocation184_spill] sm:$0xff]  ;;  %v11655_v6 = vld [vmem:[#allocation54_spill] sm:$0xff] }
 0x1c4   : > { %v6990_v25 = vpop.f32.mrf.mxu0  ;;  %7233 = vmatmul.mubr.msk.f32.gmra.mxu0 %vm579_vm2, %v11648_v45  ;;  %v6892_v26 = vpop.f32.mrf.mxu1  ;;  %7135 = vmatmul.mubr.msk.f32.gmra.mxu1 %vm579_vm2, %v11649_v48 }
 0x1c5   : > { %11646 = vst [vmem:[#allocation152_spill] sm:$0xff] %v9888_v18  ;;  %7235 = vmatprep.mubr.msk.f32.mxu0 %vm579_vm2, %v9424_v1  ;;  %v9897_v33 = vadd.f32 %v3007_v16, %v2774_v40  ;;  %v2777_v11 = vadd.f32 %v6892_v26, %v11650_v44  ;;  %7137 = vmatprep.mubr.msk.f32.mxu1 %vm579_vm2, %v11651_v0  ;;  %v11654_v18 = vld [vmem:[#allocation187_spill] sm:$0xff]  ;;  %v11656_v26 = vld [vmem:[#allocation186_spill] sm:$0xff]  ;;  %v3295_v44 = vrot.slane %v9403_v46, 2 }
 0x1c6   : > { %v3017_v61 = vpop.f32.mrf.mxu0  ;;  %v2545_v38 = vpop.f32.mrf.mxu1 }
 0x1c7   : > { %v9902_v35 = vadd.f32 %v6990_v25, %v2777_v11  ;;  %v2776_v45 = vadd.f32 %v2545_v38, %v11653_v57  ;;  %v11657_v25 = vld [vmem:[#allocation55_spill] sm:$0xff] }
 0x1c8   : > { %v6993_v52 = vpop.f32.mrf.mxu0  ;;  %7236 = vmatmul.mubr.msk.f32.gmra.mxu0 %vm579_vm2, %v11654_v18  ;;  %v6895_v48 = vpop.f32.mrf.mxu1  ;;  %7138 = vmatmul.mubr.msk.f32.gmra.mxu1 %vm579_vm2, %v11655_v6  ;;  %v3296_v18 = vrot.slane %v9406_v28, 2 }
 0x1c9   : > { %11652 = vst [vmem:[#allocation130_spill] sm:$0xff] %v9902_v35  ;;  %7238 = vmatprep.mubr.msk.f32.mxu0 %vm579_vm2, %v9450_v59  ;;  %v9911_v1 = vadd.f32 %v3017_v61, %v2776_v45  ;;  %v2779_v16 = vadd.f32 %v6895_v48, %v11656_v26  ;;  %7140 = vmatprep.mubr.msk.f32.mxu1 %vm579_vm2, %v11657_v25  ;;  %v11659_v48 = vld [vmem:[#allocation56_spill] sm:$0xff] }
 0x1ca   : > { %v3027_v40 = vpop.f32.mrf.mxu0  ;;  %v2555_v11 = vpop.f32.mrf.mxu1  ;;  %v11660_v26 = vld [vmem:[#allocation60_spill] sm:$0xff] }
 0x1cb   : > { %v9918_v38 = vadd.f32 %v6993_v52, %v2779_v16  ;;  %v2778_v57 = vadd.f32 %v2555_v11, %v9446_v55  ;;  %v9933_v55 = vld [vmem:[%s7564_s21 + $0x348] sm:$0xff]  ;;  %v11661_v16 = vld [vmem:[#allocation185_spill] sm:$0xff] }
 0x1cc   : > { %v6996_v35 = vpop.f32.mrf.mxu0  ;;  %7239 = vmatmul.mubr.msk.f32.gmra.mxu0 %vm579_vm2, %v9463_v41  ;;  %v6898_v59 = vpop.f32.mrf.mxu1  ;;  %7141 = vmatmul.mubr.msk.f32.gmra.mxu1 %vm579_vm2, %v11659_v48  ;;  %v3298_v41 = vrot.slane %v11661_v16, 2 }
 0x1cd   : > { %11658 = vst [vmem:[#allocation150_spill] sm:$0xff] %v9918_v38  ;;  %7241 = vmatprep.mubr.msk.f32.mxu0 %vm579_vm2, %v9403_v46  ;;  %v9927_v61 = vadd.f32 %v3027_v40, %v2778_v57  ;;  %v2781_v45 = vadd.f32 %v6898_v59, %v9457_v54  ;;  %7143 = vmatprep.mubr.msk.f32.mxu1 %vm579_vm2, %v11660_v26  ;;  %v11663_v57 = vld [vmem:[#allocation62_spill] sm:$0xff]  ;;  %v9949_v59 = vld [vmem:[%s7564_s21 + $0x350] sm:$0xff] }
 0x1ce   : > { %v3037_v52 = vpop.f32.mrf.mxu0  ;;  %v2565_v11 = vpop.f32.mrf.mxu1  ;;  %v9937_v38 = vsel %vm1613_vm3, %v3295_v44, %v3296_v18 }
 0x1cf   : > { %v9939_v48 = vadd.f32 %v6996_v35, %v2781_v45  ;;  %v2780_v46 = vadd.f32 %v2565_v11, %v9472_v2  ;;  %v9957_v2 = vsel %vm1613_vm3, %v3296_v18, %v3298_v41 }
 0x1d0   : > { %v6999_v40 = vpop.f32.mrf.mxu0  ;;  %7242 = vmatmul.mubr.msk.f32.gmra.mxu0 %vm579_vm2, %v9406_v28  ;;  %v6901_v54 = vpop.f32.mrf.mxu1  ;;  %7144 = vmatmul.mubr.msk.f32.gmra.mxu1 %vm579_vm2, %v11663_v57 }
 0x1d1   : > { %11662 = vst [vmem:[#allocation154_spill] sm:$0xff] %v9939_v48  ;;  %7244 = vmatprep.mubr.msk.f32.mxu0 %vm579_vm2, %v9933_v55  ;;  %v9951_v16 = vadd.f32 %v3037_v52, %v2780_v46  ;;  %v2783_v35 = vadd.f32 %v6901_v54, %v9477_v13  ;;  %7146 = vmatprep.mubr.msk.f32.mxu1 %vm579_vm2, %v9937_v38  ;;  %v11665_v46 = vld [vmem:[#allocation15_spill] sm:$0xff] }
 0x1d2   : > { %v3047_v44 = vpop.f32.mrf.mxu0  ;;  %v2575_v28 = vpop.f32.mrf.mxu1 }
 0x1d3   : > { %v9959_v45 = vadd.f32 %v6999_v40, %v2783_v35  ;;  %v2782_v11 = vadd.f32 %v2575_v28, %v9486_v19 }
 0x1d4   : > { %v7002_v48 = vpop.f32.mrf.mxu0  ;;  %7245 = vmatmul.mubr.msk.f32.gmra.mxu0 %vm579_vm2, %v9949_v59  ;;  %v6904_v52 = vpop.f32.mrf.mxu1  ;;  %7147 = vmatmul.mubr.msk.f32.gmra.mxu1 %vm579_vm2, %v9957_v2 }
 0x1d5   : > { %11664 = vst [vmem:[#allocation155_spill] sm:$0xff] %v9959_v45  ;;  %7347 = vmatprep.mubr.msk.f32.mxu0 %vm579_vm2, %v8311_v34  ;;  %v9968_v13 = vadd.f32 %v3047_v44, %v2782_v11  ;;  %v2785_v18 = vadd.f32 %v6904_v52, %v9491_v9  ;;  %7249 = vmatprep.mubr.msk.f32.mxu1 %vm579_vm2, %v11665_v46  ;;  %v11666_v45 = vld [vmem:[#allocation19_spill] sm:$0xff] }
 0x1d6   : > { %v3057_v41 = vpop.f32.mrf.mxu0  ;;  %v2585_v19 = vpop.f32.mrf.mxu1  ;;  %v11669_v46 = vld [vmem:[#allocation31_spill] sm:$0xff] }
 0x1d7   : > { %v9973_v40 = vadd.f32 %v7002_v48, %v2785_v18  ;;  %v2784_v54 = vadd.f32 %v2585_v19, %v9500_v7  ;;  %v11667_v48 = vld [vmem:[#allocation24_spill] sm:$0xff]  ;;  %v11668_v18 = vld [vmem:[#allocation29_spill] sm:$0xff] }
 0x1d8   : > { %v7005_v35 = vpop.f32.mrf.mxu0  ;;  %7348 = vmatmul.mubr.msk.f32.vlgmr.msra.gmra.mxu0 %vm579_vm2, %v8331_v14  ;;  %v6907_v28 = vpop.f32.mrf.mxu1  ;;  %7250 = vmatmul.mubr.msk.f32.vlgmr.msra.gmra.mxu1 %vm579_vm2, %v11666_v45 }
 0x1d9   : > { %7350 = vmatprep.mubr.msk.f32.mxu0 %vm579_vm2, %v8337_v51  ;;  %v9982_v34 = vadd.f32 %v3057_v41, %v2784_v54  ;;  %v2787_v9 = vadd.f32 %v6907_v28, %v9509_v23  ;;  %7252 = vmatprep.mubr.msk.f32.mxu1 %vm579_vm2, %v11667_v48  ;;  %v11671_v28 = vld [vmem:[#allocation36_spill] sm:$0xff]  ;;  %v11674_v48 = vld [vmem:[#allocation38_spill] sm:$0xff] }
 0x1da   : > { %v3067_v44 = vpop.f32.mrf.mxu0  ;;  %v2595_v7 = vpop.f32.mrf.mxu1 }
 0x1db   : > { %v9987_v11 = vadd.f32 %v7005_v35, %v2787_v9  ;;  %v2786_v14 = vadd.f32 %v2595_v7, %v9518_v24 }
 0x1dc   : > { %v7008_v52 = vpop.f32.mrf.mxu0  ;;  %7351 = vmatmul.mubr.msk.f32.gmra.mxu0 %vm579_vm2, %v11492_v22  ;;  %v6910_v45 = vpop.f32.mrf.mxu1  ;;  %7253 = vmatmul.mubr.msk.f32.gmra.mxu1 %vm579_vm2, %v11668_v18 }
 0x1dd   : > { %7353 = vmatprep.mubr.msk.f32.mxu0 %vm579_vm2, %v11495_v36  ;;  %v9996_v51 = vadd.f32 %v3067_v44, %v2786_v14  ;;  %v2789_v23 = vadd.f32 %v6910_v45, %v9523_v43  ;;  %7255 = vmatprep.mubr.msk.f32.mxu1 %vm579_vm2, %v11669_v46  ;;  %v11673_v36 = vld [vmem:[#allocation112_spill] sm:$0xff]  ;;  %v11676_v14 = vld [vmem:[#allocation70_spill] sm:$0xff]  ;;  %v11681_v46 = vld [vmem:[#allocation63_spill] sm:$0xff] }
 0x1de   : > { %v3077_v41 = vpop.f32.mrf.mxu0  ;;  %v2605_v24 = vpop.f32.mrf.mxu1  ;;  %v11677_v45 = vld [vmem:[#allocation116_spill] sm:$0xff] }
 0x1df   : > { %v10001_v19 = vadd.f32 %v7008_v52, %v2789_v23  ;;  %v2788_v22 = vadd.f32 %v2605_v24, %v9532_v31  ;;  %v11678_v23 = vld [vmem:[#allocation43_spill] sm:$0xff] }
 0x1e0   : > { %v7011_v54 = vpop.f32.mrf.mxu0  ;;  %7354 = vmatmul.mubr.msk.f32.gmra.mxu0 %vm579_vm2, %v11499_v50  ;;  %v6913_v35 = vpop.f32.mrf.mxu1  ;;  %7256 = vmatmul.mubr.msk.f32.gmra.mxu1 %vm579_vm2, %v11671_v28 }
 0x1e1   : > { %11670 = vst [vmem:[#allocation157_spill] sm:$0xff] %v10001_v19  ;;  %7356 = vmatprep.mubr.msk.f32.mxu0 %vm579_vm2, %v11503_v8  ;;  %v10010_v43 = vadd.f32 %v3077_v41, %v2788_v22  ;;  %v2791_v9 = vadd.f32 %v6913_v35, %v11673_v36  ;;  %7258 = vmatprep.mubr.msk.f32.mxu1 %vm579_vm2, %v11674_v48  ;;  %v11679_v8 = vld [vmem:[#allocation117_spill] sm:$0xff]  ;;  %v11763_v19 = vld [vmem:[#allocation135_spill] sm:$0xff] }
 0x1e2   : > { %v3087_v44 = vpop.f32.mrf.mxu0  ;;  %v2615_v31 = vpop.f32.mrf.mxu1  ;;  %v11684_v36 = vld [vmem:[#allocation113_spill] sm:$0xff] }
 0x1e3   : > { %11672 = vst [vmem:[#allocation13_spill] sm:$0xff] %v10010_v43  ;;  %v10015_v7 = vadd.f32 %v7011_v54, %v2791_v9  ;;  %v2790_v50 = vadd.f32 %v2615_v31, %v11676_v14  ;;  %v11682_v54 = vld [vmem:[#allocation45_spill] sm:$0xff]  ;;  %v11685_v31 = vld [vmem:[#allocation118_spill] sm:$0xff] }
 0x1e4   : > { %v7014_v52 = vpop.f32.mrf.mxu0  ;;  %7357 = vmatmul.mubr.msk.f32.gmra.mxu0 %vm579_vm2, %v11677_v45  ;;  %v6916_v18 = vpop.f32.mrf.mxu1  ;;  %7259 = vmatmul.mubr.msk.f32.gmra.mxu1 %vm579_vm2, %v11678_v23  ;;  %v11686_v45 = vld [vmem:[#allocation50_spill] sm:$0xff] }
 0x1e5   : > { %11675 = vst [vmem:[#allocation158_spill] sm:$0xff] %v10015_v7  ;;  %7359 = vmatprep.mubr.msk.f32.mxu0 %vm579_vm2, %v11679_v8  ;;  %v10024_v41 = vadd.f32 %v3087_v44, %v2790_v50  ;;  %v2793_v24 = vadd.f32 %v6916_v18, %v11681_v46  ;;  %7261 = vmatprep.mubr.msk.f32.mxu1 %vm579_vm2, %v11682_v54  ;;  %v11687_v44 = vld [vmem:[#allocation119_spill] sm:$0xff]  ;;  %v11689_v18 = vld [vmem:[#allocation68_spill] sm:$0xff]  ;;  %v11692_v54 = vld [vmem:[#allocation77_spill] sm:$0xff] }
 0x1e6   : > { %v3097_v22 = vpop.f32.mrf.mxu0  ;;  %v2625_v35 = vpop.f32.mrf.mxu1 }
 0x1e7   : > { %11680 = vst [vmem:[#allocation3_spill] sm:$0xff] %v10024_v41  ;;  %v10029_v28 = vadd.f32 %v7014_v52, %v2793_v24  ;;  %v2792_v9 = vadd.f32 %v2625_v35, %v11684_v36  ;;  %v11690_v52 = vld [vmem:[#allocation52_spill] sm:$0xff]  ;;  %v11760_v41 = vld [vmem:[#allocation137_spill] sm:$0xff] }
 0x1e8   : > { %v7017_v48 = vpop.f32.mrf.mxu0  ;;  %7360 = vmatmul.mubr.msk.f32.gmra.mxu0 %vm579_vm2, %v11685_v31  ;;  %v6919_v14 = vpop.f32.mrf.mxu1  ;;  %7262 = vmatmul.mubr.msk.f32.gmra.mxu1 %vm579_vm2, %v11686_v45  ;;  %v11693_v31 = vld [vmem:[#allocation120_spill] sm:$0xff] }
 0x1e9   : > { %11683 = vst [vmem:[#allocation11_spill] sm:$0xff] %v10029_v28  ;;  %7362 = vmatprep.mubr.msk.f32.mxu0 %vm579_vm2, %v11687_v44  ;;  %v10038_v50 = vadd.f32 %v3097_v22, %v2792_v9  ;;  %v2795_v23 = vadd.f32 %v6919_v14, %v11689_v18  ;;  %7264 = vmatprep.mubr.msk.f32.mxu1 %vm579_vm2, %v11690_v52  ;;  %v11694_v28 = vld [vmem:[#allocation57_spill] sm:$0xff]  ;;  %v11697_v14 = vld [vmem:[#allocation114_spill] sm:$0xff] }
 0x1ea   : > { %v3107_v8 = vpop.f32.mrf.mxu0  ;;  %v2635_v46 = vpop.f32.mrf.mxu1  ;;  %v11695_v22 = vld [vmem:[#allocation121_spill] sm:$0xff] }
 0x1eb   : > { %11688 = vst [vmem:[#allocation160_spill] sm:$0xff] %v10038_v50  ;;  %v10043_v24 = vadd.f32 %v7017_v48, %v2795_v23  ;;  %v2794_v35 = vadd.f32 %v2635_v46, %v11692_v54  ;;  %v11698_v48 = vld [vmem:[#allocation59_spill] sm:$0xff]  ;;  %v11700_v46 = vld [vmem:[#allocation82_spill] sm:$0xff]  ;;  %v11702_v50 = vld [vmem:[#allocation64_spill] sm:$0xff] }
 0x1ec   : > { %v7020_v36 = vpop.f32.mrf.mxu0  ;;  %7363 = vmatmul.mubr.msk.f32.gmra.mxu0 %vm579_vm2, %v11693_v31  ;;  %v6922_v45 = vpop.f32.mrf.mxu1  ;;  %7265 = vmatmul.mubr.msk.f32.gmra.mxu1 %vm579_vm2, %v11694_v28 }
 0x1ed   : > { %11691 = vst [vmem:[#allocation4_spill] sm:$0xff] %v10043_v24  ;;  %7365 = vmatprep.mubr.msk.f32.mxu0 %vm579_vm2, %v11695_v22  ;;  %v10052_v9 = vadd.f32 %v3107_v8, %v2794_v35  ;;  %v2797_v44 = vadd.f32 %v6922_v45, %v11697_v14  ;;  %7267 = vmatprep.mubr.msk.f32.mxu1 %vm579_vm2, %v11698_v48  ;;  %v11701_v24 = vld [vmem:[#allocation122_spill] sm:$0xff]  ;;  %v11703_v8 = vld [vmem:[#allocation123_spill] sm:$0xff]  ;;  %v11705_v45 = vld [vmem:[#allocation69_spill] sm:$0xff] }
 0x1ee   : > { %v3117_v18 = vpop.f32.mrf.mxu0  ;;  %v2645_v23 = vpop.f32.mrf.mxu1 }
 0x1ef   : > { %11696 = vst [vmem:[#allocation159_spill] sm:$0xff] %v10052_v9  ;;  %v10057_v52 = vadd.f32 %v7020_v36, %v2797_v44  ;;  %v2796_v54 = vadd.f32 %v2645_v23, %v11700_v46  ;;  %v11706_v36 = vld [vmem:[#allocation66_spill] sm:$0xff]  ;;  %v11708_v23 = vld [vmem:[#allocation115_spill] sm:$0xff] }
 0x1f0   : > { %v7023_v31 = vpop.f32.mrf.mxu0  ;;  %7366 = vmatmul.mubr.msk.f32.gmra.mxu0 %vm579_vm2, %v11701_v24  ;;  %v6925_v28 = vpop.f32.mrf.mxu1  ;;  %7268 = vmatmul.mubr.msk.f32.gmra.mxu1 %vm579_vm2, %v11702_v50  ;;  %v11710_v9 = vld [vmem:[#allocation71_spill] sm:$0xff] }
 0x1f1   : > { %11699 = vst [vmem:[#allocation5_spill] sm:$0xff] %v10057_v52  ;;  %7368 = vmatprep.mubr.msk.f32.mxu0 %vm579_vm2, %v11703_v8  ;;  %v10066_v35 = vadd.f32 %v3117_v18, %v2796_v54  ;;  %v2799_v22 = vadd.f32 %v6925_v28, %v11705_v45  ;;  %7270 = vmatprep.mubr.msk.f32.mxu1 %vm579_vm2, %v11706_v36  ;;  %v11709_v52 = vld [vmem:[#allocation124_spill] sm:$0xff]  ;;  %v11711_v18 = vld [vmem:[#allocation125_spill] sm:$0xff]  ;;  %v11713_v28 = vld [vmem:[#allocation74_spill] sm:$0xff] }
 0x1f2   : > { %v3127_v14 = vpop.f32.mrf.mxu0  ;;  %v2655_v44 = vpop.f32.mrf.mxu1 }
 0x1f3   : > { %11704 = vst [vmem:[#allocation162_spill] sm:$0xff] %v10066_v35  ;;  %v10071_v48 = vadd.f32 %v7023_v31, %v2799_v22  ;;  %v2798_v24 = vadd.f32 %v2655_v44, %v11708_v23  ;;  %v11714_v31 = vld [vmem:[#allocation73_spill] sm:$0xff]  ;;  %v11716_v44 = vld [vmem:[#allocation91_spill] sm:$0xff]  ;;  %v11718_v35 = vld [vmem:[#allocation78_spill] sm:$0xff] }
 0x1f4   : > { %v7026_v46 = vpop.f32.mrf.mxu0  ;;  %7369 = vmatmul.mubr.msk.f32.gmra.mxu0 %vm579_vm2, %v11709_v52  ;;  %v6928_v50 = vpop.f32.mrf.mxu1  ;;  %7271 = vmatmul.mubr.msk.f32.gmra.mxu1 %vm579_vm2, %v11710_v9 }
 0x1f5   : > { %11707 = vst [vmem:[#allocation161_spill] sm:$0xff] %v10071_v48  ;;  %7371 = vmatprep.mubr.msk.f32.mxu0 %vm579_vm2, %v11711_v18  ;;  %v10080_v54 = vadd.f32 %v3127_v14, %v2798_v24  ;;  %v2801_v8 = vadd.f32 %v6928_v50, %v11713_v28  ;;  %7273 = vmatprep.mubr.msk.f32.mxu1 %vm579_vm2, %v11714_v31  ;;  %v11717_v48 = vld [vmem:[#allocation126_spill] sm:$0xff]  ;;  %v11719_v14 = vld [vmem:[#allocation127_spill] sm:$0xff] }
 0x1f6   : > { %v3137_v45 = vpop.f32.mrf.mxu0  ;;  %v2665_v22 = vpop.f32.mrf.mxu1  ;;  %v11721_v50 = vld [vmem:[#allocation95_spill] sm:$0xff] }
 0x1f7   : > { %11712 = vst [vmem:[#allocation7_spill] sm:$0xff] %v10080_v54  ;;  %v10085_v36 = vadd.f32 %v7026_v46, %v2801_v8  ;;  %v2800_v52 = vadd.f32 %v2665_v22, %v11716_v44  ;;  %v11722_v46 = vld [vmem:[#allocation80_spill] sm:$0xff]  ;;  %v11726_v54 = vld [vmem:[#allocation87_spill] sm:$0xff] }
 0x1f8   : > { %v7029_v23 = vpop.f32.mrf.mxu0  ;;  %7372 = vmatmul.mubr.msk.f32.gmra.mxu0 %vm579_vm2, %v11717_v48  ;;  %v6931_v9 = vpop.f32.mrf.mxu1  ;;  %7274 = vmatmul.mubr.msk.f32.gmra.mxu1 %vm579_vm2, %v11718_v35  ;;  %v11724_v22 = vld [vmem:[#allocation76_spill] sm:$0xff] }
 0x1f9   : > { %11715 = vst [vmem:[#allocation164_spill] sm:$0xff] %v10085_v36  ;;  %7374 = vmatprep.mubr.msk.f32.mxu0 %vm579_vm2, %v11719_v14  ;;  %v10094_v24 = vadd.f32 %v3137_v45, %v2800_v52  ;;  %v2803_v18 = vadd.f32 %v6931_v9, %v11721_v50  ;;  %7276 = vmatprep.mubr.msk.f32.mxu1 %vm579_vm2, %v11722_v46  ;;  %v11725_v36 = vld [vmem:[#allocation128_spill] sm:$0xff]  ;;  %v11727_v45 = vld [vmem:[#allocation129_spill] sm:$0xff] }
 0x1fa   : > { %v3147_v28 = vpop.f32.mrf.mxu0  ;;  %v2675_v8 = vpop.f32.mrf.mxu1  ;;  %v11729_v9 = vld [vmem:[#allocation85_spill] sm:$0xff] }
 0x1fb   : > { %11720 = vst [vmem:[#allocation163_spill] sm:$0xff] %v10094_v24  ;;  %v10099_v31 = vadd.f32 %v7029_v23, %v2803_v18  ;;  %v2802_v48 = vadd.f32 %v2675_v8, %v11724_v22  ;;  %v11730_v23 = vld [vmem:[#allocation90_spill] sm:$0xff]  ;;  %v11732_v8 = vld [vmem:[#allocation9_spill] sm:$0xff] }
 0x1fc   : > { %v7032_v44 = vpop.f32.mrf.mxu0  ;;  %7375 = vmatmul.mubr.msk.f32.gmra.mxu0 %vm579_vm2, %v11725_v36  ;;  %v6934_v35 = vpop.f32.mrf.mxu1  ;;  %7277 = vmatmul.mubr.msk.f32.gmra.mxu1 %vm579_vm2, %v11726_v54  ;;  %v11734_v24 = vld [vmem:[#allocation97_spill] sm:$0xff] }
 0x1fd   : > { %11723 = vst [vmem:[#allocation10_spill] sm:$0xff] %v10099_v31  ;;  %7377 = vmatprep.mubr.msk.f32.mxu0 %vm579_vm2, %v11727_v45  ;;  %v10108_v52 = vadd.f32 %v3147_v28, %v2802_v48  ;;  %v2805_v14 = vadd.f32 %v6934_v35, %v11729_v9  ;;  %7279 = vmatprep.mubr.msk.f32.mxu1 %vm579_vm2, %v11730_v23  ;;  %v11733_v31 = vld [vmem:[#allocation83_spill] sm:$0xff]  ;;  %v11735_v28 = vld [vmem:[#allocation84_spill] sm:$0xff] }
 0x1fe   : > { %v3157_v50 = vpop.f32.mrf.mxu0  ;;  %v2685_v18 = vpop.f32.mrf.mxu1  ;;  %v11737_v35 = vld [vmem:[#allocation12_spill] sm:$0xff] }
 0x1ff   : > { %11728 = vst [vmem:[#allocation166_spill] sm:$0xff] %v10108_v52  ;;  %v10113_v46 = vadd.f32 %v7032_v44, %v2805_v14  ;;  %v2804_v36 = vadd.f32 %v2685_v18, %v11732_v8  ;;  %v11738_v44 = vld [vmem:[#allocation99_spill] sm:$0xff]  ;;  %v11740_v18 = vld [vmem:[#allocation86_spill] sm:$0xff] }
 0x200   : > { %v7035_v22 = vpop.f32.mrf.mxu0  ;;  %7378 = vmatmul.mubr.msk.f32.gmra.mxu0 %vm579_vm2, %v11733_v31  ;;  %v6937_v54 = vpop.f32.mrf.mxu1  ;;  %7280 = vmatmul.mubr.msk.f32.gmra.mxu1 %vm579_vm2, %v11734_v24  ;;  %v11742_v52 = vld [vmem:[#allocation102_spill] sm:$0xff] }
 0x201   : > { %11731 = vst [vmem:[#allocation165_spill] sm:$0xff] %v10113_v46  ;;  %7380 = vmatprep.mubr.msk.f32.mxu0 %vm579_vm2, %v11735_v28  ;;  %v10122_v48 = vadd.f32 %v3157_v50, %v2804_v36  ;;  %v2807_v45 = vadd.f32 %v6937_v54, %v11737_v35  ;;  %7282 = vmatprep.mubr.msk.f32.mxu1 %vm579_vm2, %v11738_v44  ;;  %v11741_v46 = vld [vmem:[#allocation89_spill] sm:$0xff]  ;;  %v11745_v54 = vld [vmem:[#allocation96_spill] sm:$0xff] }
 0x202   : > { %v3167_v9 = vpop.f32.mrf.mxu0  ;;  %v2695_v14 = vpop.f32.mrf.mxu1  ;;  %v11743_v50 = vld [vmem:[#allocation93_spill] sm:$0xff] }
 0x203   : > { %11736 = vst [vmem:[#allocation16_spill] sm:$0xff] %v10122_v48  ;;  %v10127_v23 = vadd.f32 %v7035_v22, %v2807_v45  ;;  %v2806_v31 = vadd.f32 %v2695_v14, %v11740_v18  ;;  %v11746_v22 = vld [vmem:[#allocation104_spill] sm:$0xff] }
 0x204   : > { %v7038_v8 = vpop.f32.mrf.mxu0  ;;  %7381 = vmatmul.mubr.msk.f32.gmra.mxu0 %vm579_vm2, %v11741_v46  ;;  %v6940_v24 = vpop.f32.mrf.mxu1  ;;  %7283 = vmatmul.mubr.msk.f32.gmra.mxu1 %vm579_vm2, %v11742_v52  ;;  %v11748_v46 = vld [vmem:[#allocation133_spill] sm:$0xff] }
 0x205   : > { %11739 = vst [vmem:[#allocation168_spill] sm:$0xff] %v10127_v23  ;;  %7383 = vmatprep.mubr.msk.f32.mxu0 %vm579_vm2, %v11743_v50  ;;  %v10136_v36 = vadd.f32 %v3167_v9, %v2806_v31  ;;  %v2809_v28 = vadd.f32 %v6940_v24, %v11745_v54  ;;  %7285 = vmatprep.mubr.msk.f32.mxu1 %vm579_vm2, %v11746_v22  ;;  %v11749_v23 = vld [vmem:[#allocation94_spill] sm:$0xff]  ;;  %v4696_v9 = vrot.slane %v9694_v63, 2 }
 0x206   : > { %v3177_v35 = vpop.f32.mrf.mxu0  ;;  %v2705_v45 = vpop.f32.mrf.mxu1  ;;  %v11750_v50 = vld [vmem:[#allocation106_spill] sm:$0xff] }
 0x207   : > { %11744 = vst [vmem:[#allocation167_spill] sm:$0xff] %v10136_v36  ;;  %v10141_v44 = vadd.f32 %v7038_v8, %v2809_v28  ;;  %v2808_v14 = vadd.f32 %v2705_v45, %v11748_v46  ;;  %v11752_v24 = vld [vmem:[#allocation134_spill] sm:$0xff]  ;;  %v11753_v28 = vld [vmem:[#allocation108_spill] sm:$0xff]  ;;  %v4226_v46 = vrot.slane %v9694_v63, 1 }
 0x208   : > { %v7041_v18 = vpop.f32.mrf.mxu0  ;;  %7384 = vmatmul.mubr.msk.f32.gmra.mxu0 %vm579_vm2, %v11749_v23  ;;  %v6943_v52 = vpop.f32.mrf.mxu1  ;;  %7286 = vmatmul.mubr.msk.f32.gmra.mxu1 %vm579_vm2, %v11750_v50  ;;  %v11754_v22 = vld [vmem:[#allocation138_spill] sm:$0xff]  ;;  %v258_v23 = vld [vmem:[%s7564_s21 + $0x1a8] sm:$0x3] }
 0x209   : > { %11747 = vst [vmem:[#allocation20_spill] sm:$0xff] %v10141_v44  ;;  %7386 = vmatprep.mubr.msk.f32.mxu0 %vm579_vm2, %v11574_v62  ;;  %v10151_v31 = vadd.f32 %v3177_v35, %v2808_v14  ;;  %v2811_v8 = vadd.f32 %v6943_v52, %v11752_v24  ;;  %7288 = vmatprep.mubr.msk.f32.mxu1 %vm579_vm2, %v11753_v28  ;;  %v4697_v45 = vrot.slane %v11754_v22, 2  ;;  %v4227_v50 = vrot.slane %v11754_v22, 1  ;;  %v11756_v62 = vld [vmem:[#allocation101_spill] sm:$0xff]  ;;  %v11757_v14 = vld [vmem:[#allocation2_spill] sm:$0xff]  ;;  %v11759_v28 = vld [vmem:[#allocation131_spill] sm:$0xff] }
 0x20a   : > { %v3187_v54 = vpop.f32.mrf.mxu0  ;;  %v2715_v44 = vpop.f32.mrf.mxu1  ;;  %v11758_v24 = vld [vmem:[#allocation110_spill] sm:$0xff] }
 0x20b   : > { %11751 = vst [vmem:[#allocation170_spill] sm:$0xff] %v10151_v31  ;;  %v10160_v36 = vadd.f32 %v7041_v18, %v2811_v8  ;;  %v2810_v48 = vadd.f32 %v2715_v44, %v11756_v62  ;;  %v4699_v31 = vrot.slane %v258_v23, 2  ;;  %v11761_v8 = vld [vmem:[#allocation153_spill] sm:$0xff]  ;;  %v4698_v44 = vsel %vm1613_vm3, %v4696_v9, %v4697_v45 }
 0x20c   : > { %v7044_v35 = vpop.f32.mrf.mxu0  ;;  %7387 = vmatmul.mubr.msk.f32.gmra.mxu0 %vm579_vm2, %v11757_v14  ;;  %v6946_v52 = vpop.f32.mrf.mxu1  ;;  %7289 = vmatmul.mubr.msk.f32.gmra.mxu1 %vm579_vm2, %v11758_v24  ;;  %v4229_v62 = vrot.slane %v258_v23, 1  ;;  %v11762_v24 = vld [vmem:[#allocation132_spill] sm:$0xff]  ;;  %v11765_v23 = vld [vmem:[#allocation141_spill] sm:$0xff] }
 0x20d   : > { %11755 = vst [vmem:[#allocation169_spill] sm:$0xff] %v10160_v36  ;;  %7389 = vmatprep.mubr.msk.f32.mxu0 %vm579_vm2, %v11759_v28  ;;  %v10169_v63 = vadd.f32 %v3187_v54, %v2810_v48  ;;  %v2813_v22 = vadd.f32 %v6946_v52, %v11760_v41  ;;  %7291 = vmatprep.mubr.msk.f32.mxu1 %vm579_vm2, %v11761_v8  ;;  %v11764_v41 = vld [vmem:[#allocation156_spill] sm:$0xff] }
 0x20e   : > { %v3197_v18 = vpop.f32.mrf.mxu0  ;;  %v2725_v14 = vpop.f32.mrf.mxu1  ;;  %v4228_v36 = vsel %vm418_vm1, %v4226_v46, %v4227_v50  ;;  %v4700_v9 = vsel %vm1613_vm3, %v4697_v45, %v4699_v31  ;;  %v4230_v52 = vsel %vm418_vm1, %v4227_v50, %v4229_v62  ;;  %v11766_v45 = vld [vmem:[#allocation18_spill] sm:$0xff] }
 0x20f   : > { %v10176_v7 = vadd.f32 %v7044_v35, %v2813_v22  ;;  %v2812_v43 = vadd.f32 %v2725_v14, %v11762_v24  ;;  %v11767_v24 = vld [vmem:[#allocation6_spill] sm:$0xff] }
 0x210   : > { %v7047_v28 = vpop.f32.mrf.mxu0  ;;  %7390 = vmatmul.mubr.msk.f32.gmra.mxu0 %vm579_vm2, %v11763_v19  ;;  %v6949_v48 = vpop.f32.mrf.mxu1  ;;  %7292 = vmatmul.mubr.msk.f32.gmra.mxu1 %vm579_vm2, %v11764_v41 }
 0x211   : > { %7392 = vmatprep.mubr.msk.f32.mxu0 %vm579_vm2, %v4698_v44  ;;  %v10185_v54 = vadd.f32 %v3197_v18, %v2812_v43  ;;  %v2815_v46 = vadd.f32 %v6949_v48, %v11765_v23  ;;  %7294 = vmatprep.mubr.msk.f32.mxu1 %vm579_vm2, %v4228_v36  ;;  %v11768_v48 = vld [vmem:[#allocation23_spill] sm:$0xff]  ;;  %v11770_v23 = vld [vmem:[#allocation26_spill] sm:$0xff] }
 0x212   : > { %v3207_v35 = vpop.f32.mrf.mxu0  ;;  %v2735_v22 = vpop.f32.mrf.mxu1 }
 0x213   : > { %v10190_v8 = vadd.f32 %v7047_v28, %v2815_v46  ;;  %v2814_v19 = vadd.f32 %v2735_v22, %v9729_v4  ;;  %v11771_v22 = vld [vmem:[#allocation8_spill] sm:$0xff] }
 0x214   : > { %v7050_v14 = vpop.f32.mrf.mxu0  ;;  %7393 = vmatmul.mubr.msk.f32.gmra.mxu0 %vm579_vm2, %v4700_v9  ;;  %v6952_v44 = vpop.f32.mrf.mxu1  ;;  %7295 = vmatmul.mubr.msk.f32.gmra.mxu1 %vm579_vm2, %v4230_v52 }
 0x215   : > { %7395 = vmatprep.mubr.msk.f32.mxu0 %vm579_vm2, %v11593_v49  ;;  %v10197_v43 = vadd.f32 %v3207_v35, %v2814_v19  ;;  %v2817_v36 = vadd.f32 %v6952_v44, %v9734_v3  ;;  %7297 = vmatprep.mubr.msk.f32.mxu1 %vm579_vm2, %v11766_v45  ;;  %v11769_v49 = vld [vmem:[#allocation136_spill] sm:$0xff]  ;;  %v11773_v44 = vld [vmem:[#allocation139_spill] sm:$0xff]  ;;  %v11774_v45 = vld [vmem:[#allocation33_spill] sm:$0xff] }
 0x216   : > { %v3217_v31 = vpop.f32.mrf.mxu0  ;;  %v2745_v50 = vpop.f32.mrf.mxu1 }
 0x217   : > { %v10202_v18 = vadd.f32 %v7050_v14, %v2817_v36  ;;  %v2816_v4 = vadd.f32 %v2745_v50, %v9743_v21  ;;  %v11772_v14 = vld [vmem:[#allocation30_spill] sm:$0xff] }
 0x218   : > { %v7153_v62 = vpop.f32.mrf.mxu0  ;;  %7396 = vmatmul.mubr.msk.f32.gmra.mxu0 %vm579_vm2, %v11767_v24  ;;  %v7055_v28 = vpop.f32.mrf.mxu1  ;;  %7298 = vmatmul.mubr.msk.f32.gmra.mxu1 %vm579_vm2, %v11768_v48  ;;  %v11775_v24 = vld [vmem:[#allocation14_spill] sm:$0xff]  ;;  %v11776_v48 = vld [vmem:[#allocation37_spill] sm:$0xff] }
 0x219   : > { %7398 = vmatprep.mubr.msk.f32.mxu0 %vm579_vm2, %v11598_v20  ;;  %v10211_v3 = vadd.f32 %v3217_v31, %v2816_v4  ;;  %v3697_v41 = vadd.f32 %v7055_v28, %v11769_v49  ;;  %7300 = vmatprep.mubr.msk.f32.mxu1 %vm579_vm2, %v11770_v23  ;;  %v11777_v49 = vld [vmem:[#allocation140_spill] sm:$0xff] }
 0x21a   : > { %v3841_v9 = vpop.f32.mrf.mxu0  ;;  %v3377_v21 = vpop.f32.mrf.mxu1  ;;  %v11778_v23 = vld [vmem:[#allocation40_spill] sm:$0xff] }
 0x21b   : > { %v10216_v46 = vadd.f32 %v7153_v62, %v3697_v41  ;;  %v3696_v35 = vadd.f32 %v3377_v21, %v9757_v58 }
 0x21c   : > { %v7156_v52 = vpop.f32.mrf.mxu0  ;;  %7399 = vmatmul.mubr.msk.f32.gmra.mxu0 %vm579_vm2, %v11771_v22  ;;  %v7058_v19 = vpop.f32.mrf.mxu1  ;;  %7301 = vmatmul.mubr.msk.f32.gmra.mxu1 %vm579_vm2, %v11772_v14  ;;  %v11779_v22 = vld [vmem:[#allocation17_spill] sm:$0xff]  ;;  %v11780_v14 = vld [vmem:[#allocation44_spill] sm:$0xff] }
 0x21d   : > { %7401 = vmatprep.mubr.msk.f32.mxu0 %vm579_vm2, %v11603_v5  ;;  %v10225_v20 = vadd.f32 %v3841_v9, %v3696_v35  ;;  %v3699_v36 = vadd.f32 %v7058_v19, %v11773_v44  ;;  %7303 = vmatprep.mubr.msk.f32.mxu1 %vm579_vm2, %v11774_v45  ;;  %v11781_v44 = vld [vmem:[#allocation142_spill] sm:$0xff]  ;;  %v11782_v45 = vld [vmem:[#allocation47_spill] sm:$0xff] }
 0x21e   : > { %v3851_v31 = vpop.f32.mrf.mxu0  ;;  %v3387_v58 = vpop.f32.mrf.mxu1 }
 0x21f   : > { %v10230_v50 = vadd.f32 %v7156_v52, %v3699_v36  ;;  %v3698_v4 = vadd.f32 %v3387_v58, %v9771_v39 }
 0x220   : > { %v7159_v62 = vpop.f32.mrf.mxu0  ;;  %7402 = vmatmul.mubr.msk.f32.gmra.mxu0 %vm579_vm2, %v11775_v24  ;;  %v7061_v28 = vpop.f32.mrf.mxu1  ;;  %7304 = vmatmul.mubr.msk.f32.gmra.mxu1 %vm579_vm2, %v11776_v48  ;;  %v11783_v24 = vld [vmem:[#allocation21_spill] sm:$0xff]  ;;  %v11784_v48 = vld [vmem:[#allocation51_spill] sm:$0xff] }
 0x221   : > { %7404 = vmatprep.mubr.msk.f32.mxu0 %vm579_vm2, %v11608_v29  ;;  %v10239_v5 = vadd.f32 %v3851_v31, %v3698_v4  ;;  %v3701_v41 = vadd.f32 %v7061_v28, %v11777_v49  ;;  %7306 = vmatprep.mubr.msk.f32.mxu1 %vm579_vm2, %v11778_v23  ;;  %v11785_v49 = vld [vmem:[#allocation143_spill] sm:$0xff]  ;;  %v11786_v23 = vld [vmem:[#allocation53_spill] sm:$0xff] }
 0x222   : > { %v3861_v9 = vpop.f32.mrf.mxu0  ;;  %v3397_v39 = vpop.f32.mrf.mxu1 }
 0x223   : > { %v10244_v21 = vadd.f32 %v7159_v62, %v3701_v41  ;;  %v3700_v35 = vadd.f32 %v3397_v39, %v9785_v60 }
 0x224   : > { %v7162_v52 = vpop.f32.mrf.mxu0  ;;  %7405 = vmatmul.mubr.msk.f32.gmra.mxu0 %vm579_vm2, %v11779_v22  ;;  %v7064_v19 = vpop.f32.mrf.mxu1  ;;  %7307 = vmatmul.mubr.msk.f32.gmra.mxu1 %vm579_vm2, %v11780_v14  ;;  %v11787_v22 = vld [vmem:[#allocation25_spill] sm:$0xff]  ;;  %v11788_v14 = vld [vmem:[#allocation58_spill] sm:$0xff] }
 0x225   : > { %7407 = vmatprep.mubr.msk.f32.mxu0 %vm579_vm2, %v11613_v42  ;;  %v10253_v29 = vadd.f32 %v3861_v9, %v3700_v35  ;;  %v3703_v36 = vadd.f32 %v7064_v19, %v11781_v44  ;;  %7309 = vmatprep.mubr.msk.f32.mxu1 %vm579_vm2, %v11782_v45  ;;  %v11789_v44 = vld [vmem:[#allocation144_spill] sm:$0xff]  ;;  %v11790_v45 = vld [vmem:[#allocation61_spill] sm:$0xff] }
 0x226   : > { %v3871_v31 = vpop.f32.mrf.mxu0  ;;  %v3407_v60 = vpop.f32.mrf.mxu1 }
 0x227   : > { %v10258_v58 = vadd.f32 %v7162_v52, %v3703_v36  ;;  %v3702_v4 = vadd.f32 %v3407_v60, %v9799_v56 }
 0x228   : > { %v7165_v62 = vpop.f32.mrf.mxu0  ;;  %7408 = vmatmul.mubr.msk.f32.gmra.mxu0 %vm579_vm2, %v11783_v24  ;;  %v7067_v28 = vpop.f32.mrf.mxu1  ;;  %7310 = vmatmul.mubr.msk.f32.gmra.mxu1 %vm579_vm2, %v11784_v48  ;;  %v11791_v24 = vld [vmem:[#allocation28_spill] sm:$0xff]  ;;  %v11792_v48 = vld [vmem:[#allocation65_spill] sm:$0xff] }
 0x229   : > { %7410 = vmatprep.mubr.msk.f32.mxu0 %vm579_vm2, %v11618_v47  ;;  %v10267_v42 = vadd.f32 %v3871_v31, %v3702_v4  ;;  %v3705_v41 = vadd.f32 %v7067_v28, %v11785_v49  ;;  %7312 = vmatprep.mubr.msk.f32.mxu1 %vm579_vm2, %v11786_v23  ;;  %v11793_v49 = vld [vmem:[#allocation145_spill] sm:$0xff]  ;;  %v11794_v23 = vld [vmem:[#allocation67_spill] sm:$0xff] }
 0x22a   : > { %v3881_v9 = vpop.f32.mrf.mxu0  ;;  %v3417_v56 = vpop.f32.mrf.mxu1 }
 0x22b   : > { %v10272_v39 = vadd.f32 %v7165_v62, %v3705_v41  ;;  %v3704_v35 = vadd.f32 %v3417_v56, %v9813_v17 }
 0x22c   : > { %v7168_v52 = vpop.f32.mrf.mxu0  ;;  %7411 = vmatmul.mubr.msk.f32.gmra.mxu0 %vm579_vm2, %v11787_v22  ;;  %v7070_v19 = vpop.f32.mrf.mxu1  ;;  %7313 = vmatmul.mubr.msk.f32.gmra.mxu1 %vm579_vm2, %v11788_v14  ;;  %v11796_v14 = vld [vmem:[#allocation146_spill] sm:$0xff] }
 0x22d   : > { %7413 = vmatprep.mubr.msk.f32.mxu0 %vm579_vm2, %v11623_v37  ;;  %v10281_v47 = vadd.f32 %v3881_v9, %v3704_v35  ;;  %v3707_v36 = vadd.f32 %v7070_v19, %v11789_v44  ;;  %7315 = vmatprep.mubr.msk.f32.mxu1 %vm579_vm2, %v11790_v45  ;;  %v11795_v19 = vld [vmem:[#allocation72_spill] sm:$0xff] }
 0x22e   : > { %v3891_v31 = vpop.f32.mrf.mxu0  ;;  %v3427_v17 = vpop.f32.mrf.mxu1 }
 0x22f   : > { %v10286_v60 = vadd.f32 %v7168_v52, %v3707_v36  ;;  %v3706_v4 = vadd.f32 %v3427_v17, %v9827_v32 }
 0x230   : > { %v7171_v62 = vpop.f32.mrf.mxu0  ;;  %7414 = vmatmul.mubr.msk.f32.gmra.mxu0 %vm579_vm2, %v11791_v24  ;;  %v7073_v28 = vpop.f32.mrf.mxu1  ;;  %7316 = vmatmul.mubr.msk.f32.gmra.mxu1 %vm579_vm2, %v11792_v48  ;;  %v11799_v24 = vld [vmem:[#allocation79_spill] sm:$0xff]  ;;  %v11801_v48 = vld [vmem:[#allocation149_spill] sm:$0xff] }
 0x231   : > { %7416 = vmatprep.mubr.msk.f32.mxu0 %vm579_vm2, %v11628_v12  ;;  %v10295_v37 = vadd.f32 %v3891_v31, %v3706_v4  ;;  %v3709_v41 = vadd.f32 %v7073_v28, %v11793_v49  ;;  %7318 = vmatprep.mubr.msk.f32.mxu1 %vm579_vm2, %v11794_v23  ;;  %v11797_v31 = vld [vmem:[#allocation75_spill] sm:$0xff] }
 0x232   : > { %v3901_v9 = vpop.f32.mrf.mxu0  ;;  %v3437_v32 = vpop.f32.mrf.mxu1  ;;  %v11798_v4 = vld [vmem:[#allocation39_spill] sm:$0xff] }
 0x233   : > { %v10300_v56 = vadd.f32 %v7171_v62, %v3709_v41  ;;  %v3708_v35 = vadd.f32 %v3437_v32, %v9841_v30  ;;  %v11803_v32 = vld [vmem:[#allocation147_spill] sm:$0xff] }
 0x234   : > { %v7174_v52 = vpop.f32.mrf.mxu0  ;;  %7417 = vmatmul.mubr.msk.f32.gmra.mxu0 %vm579_vm2, %v11631_v27  ;;  %v7076_v22 = vpop.f32.mrf.mxu1  ;;  %7319 = vmatmul.mubr.msk.f32.gmra.mxu1 %vm579_vm2, %v11795_v19 }
 0x235   : > { %7419 = vmatprep.mubr.msk.f32.mxu0 %vm579_vm2, %v11633_v53  ;;  %v10309_v12 = vadd.f32 %v3901_v9, %v3708_v35  ;;  %v3711_v44 = vadd.f32 %v7076_v22, %v11796_v14  ;;  %7321 = vmatprep.mubr.msk.f32.mxu1 %vm579_vm2, %v11797_v31  ;;  %v11800_v53 = vld [vmem:[#allocation41_spill] sm:$0xff]  ;;  %v11804_v22 = vld [vmem:[#allocation42_spill] sm:$0xff]  ;;  %v11805_v14 = vld [vmem:[#allocation88_spill] sm:$0xff] }
 0x236   : > { %v3911_v36 = vpop.f32.mrf.mxu0  ;;  %v3447_v30 = vpop.f32.mrf.mxu1  ;;  %v11802_v9 = vld [vmem:[#allocation81_spill] sm:$0xff] }
 0x237   : > { %v10314_v45 = vadd.f32 %v7174_v52, %v3711_v44  ;;  %v3710_v27 = vadd.f32 %v3447_v30, %v9855_v15 }
 0x238   : > { %v7177_v17 = vpop.f32.mrf.mxu0  ;;  %7420 = vmatmul.mubr.msk.f32.gmra.mxu0 %vm579_vm2, %v11798_v4  ;;  %v7079_v62 = vpop.f32.mrf.mxu1  ;;  %7322 = vmatmul.mubr.msk.f32.gmra.mxu1 %vm579_vm2, %v11799_v24 }
 0x239   : > { %7422 = vmatprep.mubr.msk.f32.mxu0 %vm579_vm2, %v11800_v53  ;;  %v10323_v28 = vadd.f32 %v3911_v36, %v3710_v27  ;;  %v3713_v49 = vadd.f32 %v7079_v62, %v11801_v48  ;;  %7324 = vmatprep.mubr.msk.f32.mxu1 %vm579_vm2, %v11802_v9  ;;  %v11806_v36 = vld [vmem:[#allocation148_spill] sm:$0xff]  ;;  %v11808_v62 = vld [vmem:[#allocation151_spill] sm:$0xff]  ;;  %v11810_v9 = vld [vmem:[#allocation98_spill] sm:$0xff] }
 0x23a   : > { %v3921_v41 = vpop.f32.mrf.mxu0  ;;  %v3457_v15 = vpop.f32.mrf.mxu1  ;;  %v11807_v27 = vld [vmem:[#allocation92_spill] sm:$0xff] }
 0x23b   : > { %v10328_v23 = vadd.f32 %v7177_v17, %v3713_v49  ;;  %v3712_v35 = vadd.f32 %v3457_v15, %v11803_v32  ;;  %v11809_v48 = vld [vmem:[#allocation48_spill] sm:$0xff] }
 0x23c   : > { %v7180_v52 = vpop.f32.mrf.mxu0  ;;  %7423 = vmatmul.mubr.msk.f32.gmra.mxu0 %vm579_vm2, %v11804_v22  ;;  %v7082_v19 = vpop.f32.mrf.mxu1  ;;  %7325 = vmatmul.mubr.msk.f32.gmra.mxu1 %vm579_vm2, %v11805_v14 }
 0x23d   : > { %7425 = vmatprep.mubr.msk.f32.mxu0 %vm579_vm2, %v11645_v10  ;;  %v10337_v44 = vadd.f32 %v3921_v41, %v3712_v35  ;;  %v3715_v31 = vadd.f32 %v7082_v19, %v11806_v36  ;;  %7327 = vmatprep.mubr.msk.f32.mxu1 %vm579_vm2, %v11807_v27  ;;  %v11811_v41 = vld [vmem:[#allocation152_spill] sm:$0xff] }
 0x23e   : > { %v3931_v30 = vpop.f32.mrf.mxu0  ;;  %v3467_v17 = vpop.f32.mrf.mxu1  ;;  %v11812_v35 = vld [vmem:[#allocation100_spill] sm:$0xff] }
 0x23f   : > { %v10342_v4 = vadd.f32 %v7180_v52, %v3715_v31  ;;  %v3714_v24 = vadd.f32 %v3467_v17, %v11808_v62  ;;  %v11813_v31 = vld [vmem:[#allocation103_spill] sm:$0xff]  ;;  %v11815_v62 = vld [vmem:[#allocation105_spill] sm:$0xff] }
 0x240   : > { %v7183_v53 = vpop.f32.mrf.mxu0  ;;  %7426 = vmatmul.mubr.msk.f32.gmra.mxu0 %vm579_vm2, %v11809_v48  ;;  %v7085_v49 = vpop.f32.mrf.mxu1  ;;  %7328 = vmatmul.mubr.msk.f32.gmra.mxu1 %vm579_vm2, %v11810_v9  ;;  %v11816_v48 = vld [vmem:[#allocation56_spill] sm:$0xff]  ;;  %v4701_v9 = vrot.slane %v9933_v55, 2 }
 0x241   : > { %7428 = vmatprep.mubr.msk.f32.mxu0 %vm579_vm2, %v11651_v0  ;;  %v10351_v10 = vadd.f32 %v3931_v30, %v3714_v24  ;;  %v3717_v15 = vadd.f32 %v7085_v49, %v11811_v41  ;;  %7330 = vmatprep.mubr.msk.f32.mxu1 %vm579_vm2, %v11812_v35  ;;  %v11814_v30 = vld [vmem:[#allocation130_spill] sm:$0xff] }
 0x242   : > { %v3941_v32 = vpop.f32.mrf.mxu0  ;;  %v3477_v52 = vpop.f32.mrf.mxu1 }
 0x243   : > { %v10356_v22 = vadd.f32 %v7183_v53, %v3717_v15  ;;  %v3716_v19 = vadd.f32 %v3477_v52, %v9897_v33  ;;  %v11818_v15 = vld [vmem:[#allocation150_spill] sm:$0xff]  ;;  %v11819_v52 = vld [vmem:[#allocation109_spill] sm:$0xff] }
 0x244   : > { %v7186_v14 = vpop.f32.mrf.mxu0  ;;  %7429 = vmatmul.mubr.msk.f32.gmra.mxu0 %vm579_vm2, %v11655_v6  ;;  %v7088_v36 = vpop.f32.mrf.mxu1  ;;  %7331 = vmatmul.mubr.msk.f32.gmra.mxu1 %vm579_vm2, %v11813_v31  ;;  %v4232_v31 = vrot.slane %v9949_v59, 1 }
 0x245   : > { %7431 = vmatprep.mubr.msk.f32.mxu0 %vm579_vm2, %v11657_v25  ;;  %v10365_v0 = vadd.f32 %v3941_v32, %v3716_v19  ;;  %v3719_v27 = vadd.f32 %v7088_v36, %v11814_v30  ;;  %7333 = vmatprep.mubr.msk.f32.mxu1 %vm579_vm2, %v11815_v62  ;;  %v11817_v25 = vld [vmem:[#allocation107_spill] sm:$0xff]  ;;  %v312_v19 = vld [vmem:[%s7564_s21 + $0x358] sm:$0x3] }
 0x246   : > { %v3951_v17 = vpop.f32.mrf.mxu0  ;;  %v3487_v33 = vpop.f32.mrf.mxu1  ;;  %v11820_v62 = vld [vmem:[#allocation111_spill] sm:$0xff] }
 0x247   : > { %v10370_v24 = vadd.f32 %v7186_v14, %v3719_v27  ;;  %v3718_v6 = vadd.f32 %v3487_v33, %v9911_v1  ;;  %v4702_v1 = vrot.slane %v9949_v59, 2  ;;  %v4231_v14 = vrot.slane %v9933_v55, 1 }
 0x248   : > { %v7189_v53 = vpop.f32.mrf.mxu0  ;;  %7432 = vmatmul.mubr.msk.f32.gmra.mxu0 %vm579_vm2, %v11816_v48  ;;  %v7091_v49 = vpop.f32.mrf.mxu1  ;;  %7334 = vmatmul.mubr.msk.f32.gmra.mxu1 %vm579_vm2, %v11817_v25  ;;  %v4704_v33 = vrot.slane %v312_v19, 2  ;;  %v11822_v48 = vld [vmem:[#allocation188_spill] sm:$0xff] }
 0x249   : > { %7434 = vmatprep.mubr.msk.f32.mxu0 %vm579_vm2, %v11660_v26  ;;  %v10380_v41 = vadd.f32 %v3951_v17, %v3718_v6  ;;  %v3721_v32 = vadd.f32 %v7091_v49, %v11818_v15  ;;  %7336 = vmatprep.mubr.msk.f32.mxu1 %vm579_vm2, %v11819_v52  ;;  %v11821_v6 = vld [vmem:[#allocation154_spill] sm:$0xff]  ;;  %v4234_v49 = vrot.slane %v312_v19, 1  ;;  %v4233_v25 = vsel %vm418_vm1, %v4231_v14, %v4232_v31  ;;  %v11823_v52 = vld [vmem:[#allocation189_spill] sm:$0xff] }
 0x24a   : > { %v3961_v35 = vpop.f32.mrf.mxu0  ;;  %v3497_v36 = vpop.f32.mrf.mxu1 }
 0x24b   : > { %v10389_v30 = vadd.f32 %v7189_v53, %v3721_v32  ;;  %v3720_v26 = vadd.f32 %v3497_v36, %v9927_v61  ;;  %v4703_v61 = vsel %vm1613_vm3, %v4701_v9, %v4702_v1  ;;  %v4705_v9 = vsel %vm1613_vm3, %v4702_v1, %v4704_v33  ;;  %v11824_v36 = vld [vmem:[#allocation155_spill] sm:$0xff] }
 0x24c   : > { %v7192_v27 = vpop.f32.mrf.mxu0  ;;  %7435 = vmatmul.mubr.msk.f32.gmra.mxu0 %vm579_vm2, %v11663_v57  ;;  %v7094_v17 = vpop.f32.mrf.mxu1  ;;  %7337 = vmatmul.mubr.msk.f32.gmra.mxu1 %vm579_vm2, %v11820_v62 }
 0x24d   : > { %7437 = vmatprep.mubr.msk.f32.mxu0 %vm579_vm2, %v9937_v38  ;;  %v10398_v55 = vadd.f32 %v3961_v35, %v3720_v26  ;;  %v3723_v59 = vadd.f32 %v7094_v17, %v11821_v6  ;;  %7339 = vmatprep.mubr.msk.f32.mxu1 %vm579_vm2, %v11822_v48 }
 0x24e   : > { %v3971_v53 = vpop.f32.mrf.mxu0  ;;  %v3507_v57 = vpop.f32.mrf.mxu1 }
 0x24f   : > { %v10405_v15 = vadd.f32 %v7192_v27, %v3723_v59  ;;  %v3722_v32 = vadd.f32 %v3507_v57, %v9951_v16  ;;  %v4235_v16 = vsel %vm418_vm1, %v4232_v31, %v4234_v49 }
 0x250   : > { %v7195_v38 = vpop.f32.mrf.mxu0  ;;  %7438 = vmatmul.mubr.msk.f32.gmra.mxu0 %vm579_vm2, %v9957_v2  ;;  %v7097_v35 = vpop.f32.mrf.mxu1  ;;  %7340 = vmatmul.mubr.msk.f32.gmra.mxu1 %vm579_vm2, %v11823_v52 }
 0x251   : > { %7440 = vmatprep.mubr.msk.f32.mxu0 %vm579_vm2, %v4703_v61  ;;  %v10414_v19 = vadd.f32 %v3971_v53, %v3722_v32  ;;  %v3725_v14 = vadd.f32 %v7097_v35, %v11824_v36  ;;  %7342 = vmatprep.mubr.msk.f32.mxu1 %vm579_vm2, %v4233_v25  ;;  %v11825_v36 = vld [vmem:[#allocation157_spill] sm:$0xff] }
 0x252   : > { %v3981_v26 = vpop.f32.mrf.mxu0  ;;  %v3517_v27 = vpop.f32.mrf.mxu1 }
 0x253   : > { %v10419_v17 = vadd.f32 %v7195_v38, %v3725_v14  ;;  %v3724_v2 = vadd.f32 %v3517_v27, %v9968_v13  ;;  %v11826_v27 = vld [vmem:[#allocation13_spill] sm:$0xff] }
 0x254   : > { %v7198_v62 = vpop.f32.mrf.mxu0  ;;  %7441 = vmatmul.mubr.msk.f32.gmra.mxu0 %vm579_vm2, %v4705_v9  ;;  %v7100_v6 = vpop.f32.mrf.mxu1  ;;  %7343 = vmatmul.mubr.msk.f32.gmra.mxu1 %vm579_vm2, %v4235_v16 }
 0x255   : > { %v10424_v1 = vadd.f32 %v3981_v26, %v3724_v2  ;;  %v3727_v33 = vadd.f32 %v7100_v6, %v9973_v40 }
 0x256   : > { %v3991_v59 = vpop.f32.mrf.mxu0  ;;  %v3527_v53 = vpop.f32.mrf.mxu1 }
 0x257   : > { %v10427_v48 = vadd.f32 %v7198_v62, %v3727_v33  ;;  %v3726_v31 = vadd.f32 %v3527_v53, %v9982_v34  ;;  %v11827_v33 = vld [vmem:[#allocation158_spill] sm:$0xff] }
 0x258   : > { %v7201_v61 = vpop.f32.mrf.mxu0  ;;  %v7103_v49 = vpop.f32.mrf.mxu1 }
 0x259   : > { %v10430_v57 = vadd.f32 %v3991_v59, %v3726_v31  ;;  %v3729_v13 = vadd.f32 %v7103_v49, %v9987_v11 }
 0x25a   : > { %v4001_v25 = vpop.f32.mrf.mxu0  ;;  %v3537_v32 = vpop.f32.mrf.mxu1 }
 0x25b   : > { %v10433_v38 = vadd.f32 %v7201_v61, %v3729_v13  ;;  %v3728_v35 = vadd.f32 %v3537_v32, %v9996_v51  ;;  %v11828_v61 = vld [vmem:[#allocation3_spill] sm:$0xff] }
 0x25c   : > { %v7204_v52 = vpop.f32.mrf.mxu0  ;;  %v7106_v40 = vpop.f32.mrf.mxu1 }
 0x25d   : > { %v10436_v9 = vadd.f32 %v4001_v25, %v3728_v35  ;;  %v3731_v14 = vadd.f32 %v7106_v40, %v11825_v36  ;;  %v11830_v35 = vld [vmem:[#allocation11_spill] sm:$0xff] }
 0x25e   : > { %v4011_v26 = vpop.f32.mrf.mxu0  ;;  %v3547_v34 = vpop.f32.mrf.mxu1 }
 0x25f   : > { %v10439_v16 = vadd.f32 %v7204_v52, %v3731_v14  ;;  %v3730_v2 = vadd.f32 %v3547_v34, %v11826_v27 }
 0x260   : > { %v7207_v62 = vpop.f32.mrf.mxu0  ;;  %v7109_v11 = vpop.f32.mrf.mxu1 }
 0x261   : > { %v10442_v6 = vadd.f32 %v4011_v26, %v3730_v2  ;;  %v3733_v59 = vadd.f32 %v7109_v11, %v11827_v33  ;;  %v11832_v26 = vld [vmem:[#allocation160_spill] sm:$0xff] }
 0x262   : > { %v4021_v53 = vpop.f32.mrf.mxu0  ;;  %v3557_v51 = vpop.f32.mrf.mxu1 }
 0x263   : > { %v10445_v31 = vadd.f32 %v7207_v62, %v3733_v59  ;;  %v3732_v49 = vadd.f32 %v3557_v51, %v11828_v61  ;;  %v11834_v62 = vld [vmem:[#allocation4_spill] sm:$0xff] }
 0x264   : > { %v7210_v13 = vpop.f32.mrf.mxu0  ;;  %v7112_v25 = vpop.f32.mrf.mxu1 }
 0x265   : > { %v10448_v32 = vadd.f32 %v4021_v53, %v3732_v49  ;;  %v3735_v52 = vadd.f32 %v7112_v25, %v11830_v35  ;;  %v11836_v53 = vld [vmem:[#allocation159_spill] sm:$0xff] }
 0x266   : > { %v4031_v40 = vpop.f32.mrf.mxu0  ;;  %v3567_v36 = vpop.f32.mrf.mxu1 }
 0x267   : > { %11829 = vst [vmem:[#allocation22_spill] sm:$0xff] %v10448_v32  ;;  %v10451_v14 = vadd.f32 %v7210_v13, %v3735_v52  ;;  %v3734_v34 = vadd.f32 %v3567_v36, %v11832_v26  ;;  %v11838_v13 = vld [vmem:[#allocation5_spill] sm:$0xff] }
 0x268   : > { %v7213_v27 = vpop.f32.mrf.mxu0  ;;  %v7115_v2 = vpop.f32.mrf.mxu1 }
 0x269   : > { %11831 = vst [vmem:[#allocation172_spill] sm:$0xff] %v10451_v14  ;;  %v10454_v11 = vadd.f32 %v4031_v40, %v3734_v34  ;;  %v3737_v33 = vadd.f32 %v7115_v2, %v11834_v62  ;;  %v11840_v40 = vld [vmem:[#allocation162_spill] sm:$0xff] }
 0x26a   : > { %v4041_v59 = vpop.f32.mrf.mxu0  ;;  %v3577_v51 = vpop.f32.mrf.mxu1 }
 0x26b   : > { %11833 = vst [vmem:[#allocation171_spill] sm:$0xff] %v10454_v11  ;;  %v10457_v61 = vadd.f32 %v7213_v27, %v3737_v33  ;;  %v3736_v49 = vadd.f32 %v3577_v51, %v11836_v53  ;;  %v11842_v27 = vld [vmem:[#allocation161_spill] sm:$0xff] }
 0x26c   : > { %v7216_v32 = vpop.f32.mrf.mxu0  ;;  %v7118_v25 = vpop.f32.mrf.mxu1 }
 0x26d   : > { %11835 = vst [vmem:[#allocation27_spill] sm:$0xff] %v10457_v61  ;;  %v10460_v35 = vadd.f32 %v4041_v59, %v3736_v49  ;;  %v3739_v52 = vadd.f32 %v7118_v25, %v11838_v13  ;;  %v11844_v59 = vld [vmem:[#allocation7_spill] sm:$0xff] }
 0x26e   : > { %v4051_v14 = vpop.f32.mrf.mxu0  ;;  %v3587_v36 = vpop.f32.mrf.mxu1 }
 0x26f   : > { %11837 = vst [vmem:[#allocation174_spill] sm:$0xff] %v10460_v35  ;;  %v10463_v26 = vadd.f32 %v7216_v32, %v3739_v52  ;;  %v3738_v34 = vadd.f32 %v3587_v36, %v11840_v40  ;;  %v11846_v32 = vld [vmem:[#allocation164_spill] sm:$0xff] }
 0x270   : > { %v7219_v11 = vpop.f32.mrf.mxu0  ;;  %v7121_v2 = vpop.f32.mrf.mxu1 }
 0x271   : > { %11839 = vst [vmem:[#allocation173_spill] sm:$0xff] %v10463_v26  ;;  %v10466_v62 = vadd.f32 %v4051_v14, %v3738_v34  ;;  %v3741_v33 = vadd.f32 %v7121_v2, %v11842_v27  ;;  %v11848_v14 = vld [vmem:[#allocation163_spill] sm:$0xff] }
 0x272   : > { %v4061_v61 = vpop.f32.mrf.mxu0  ;;  %v3597_v51 = vpop.f32.mrf.mxu1 }
 0x273   : > { %11841 = vst [vmem:[#allocation32_spill] sm:$0xff] %v10466_v62  ;;  %v10469_v53 = vadd.f32 %v7219_v11, %v3741_v33  ;;  %v3740_v49 = vadd.f32 %v3597_v51, %v11844_v59  ;;  %v11850_v11 = vld [vmem:[#allocation10_spill] sm:$0xff] }
 0x274   : > { %v7222_v35 = vpop.f32.mrf.mxu0  ;;  %v7124_v25 = vpop.f32.mrf.mxu1 }
 0x275   : > { %11843 = vst [vmem:[#allocation176_spill] sm:$0xff] %v10469_v53  ;;  %v10472_v13 = vadd.f32 %v4061_v61, %v3740_v49  ;;  %v3743_v52 = vadd.f32 %v7124_v25, %v11846_v32  ;;  %v11852_v61 = vld [vmem:[#allocation166_spill] sm:$0xff] }
 0x276   : > { %v4071_v26 = vpop.f32.mrf.mxu0  ;;  %v3607_v36 = vpop.f32.mrf.mxu1 }
 0x277   : > { %11845 = vst [vmem:[#allocation34_spill] sm:$0xff] %v10472_v13  ;;  %v10475_v40 = vadd.f32 %v7222_v35, %v3743_v52  ;;  %v3742_v34 = vadd.f32 %v3607_v36, %v11848_v14  ;;  %v11854_v35 = vld [vmem:[#allocation165_spill] sm:$0xff] }
 0x278   : > { %v7225_v62 = vpop.f32.mrf.mxu0  ;;  %v7127_v2 = vpop.f32.mrf.mxu1 }
 0x279   : > { %11847 = vst [vmem:[#allocation175_spill] sm:$0xff] %v10475_v40  ;;  %v10478_v27 = vadd.f32 %v4071_v26, %v3742_v34  ;;  %v3745_v33 = vadd.f32 %v7127_v2, %v11850_v11  ;;  %v11856_v26 = vld [vmem:[#allocation16_spill] sm:$0xff] }
 0x27a   : > { %v4081_v53 = vpop.f32.mrf.mxu0  ;;  %v3617_v51 = vpop.f32.mrf.mxu1 }
 0x27b   : > { %11849 = vst [vmem:[#allocation35_spill] sm:$0xff] %v10478_v27  ;;  %v10481_v59 = vadd.f32 %v7225_v62, %v3745_v33  ;;  %v3744_v49 = vadd.f32 %v3617_v51, %v11852_v61  ;;  %v11858_v62 = vld [vmem:[#allocation168_spill] sm:$0xff] }
 0x27c   : > { %v7228_v13 = vpop.f32.mrf.mxu0  ;;  %v7130_v25 = vpop.f32.mrf.mxu1 }
 0x27d   : > { %11851 = vst [vmem:[#allocation177_spill] sm:$0xff] %v10481_v59  ;;  %v10484_v32 = vadd.f32 %v4081_v53, %v3744_v49  ;;  %v3747_v52 = vadd.f32 %v7130_v25, %v11854_v35  ;;  %v11860_v53 = vld [vmem:[#allocation167_spill] sm:$0xff] }
 0x27e   : > { %v4091_v40 = vpop.f32.mrf.mxu0  ;;  %v3627_v36 = vpop.f32.mrf.mxu1 }
 0x27f   : > { %11853 = vst [vmem:[#allocation179_spill] sm:$0xff] %v10484_v32  ;;  %v10487_v14 = vadd.f32 %v7228_v13, %v3747_v52  ;;  %v3746_v34 = vadd.f32 %v3627_v36, %v11856_v26  ;;  %v11861_v13 = vld [vmem:[#allocation20_spill] sm:$0xff] }
 0x280   : > { %v7231_v27 = vpop.f32.mrf.mxu0  ;;  %v7133_v2 = vpop.f32.mrf.mxu1 }
 0x281   : > { %11855 = vst [vmem:[#allocation181_spill] sm:$0xff] %v10487_v14  ;;  %v10490_v11 = vadd.f32 %v4091_v40, %v3746_v34  ;;  %v3749_v33 = vadd.f32 %v7133_v2, %v11858_v62  ;;  %v11862_v40 = vld [vmem:[#allocation170_spill] sm:$0xff] }
 0x282   : > { %v4101_v59 = vpop.f32.mrf.mxu0  ;;  %v3637_v51 = vpop.f32.mrf.mxu1 }
 0x283   : > { %11857 = vst [vmem:[#allocation178_spill] sm:$0xff] %v10490_v11  ;;  %v10493_v61 = vadd.f32 %v7231_v27, %v3749_v33  ;;  %v3748_v49 = vadd.f32 %v3637_v51, %v11860_v53  ;;  %v11863_v27 = vld [vmem:[#allocation169_spill] sm:$0xff] }
 0x284   : > { %v7234_v32 = vpop.f32.mrf.mxu0  ;;  %v7136_v25 = vpop.f32.mrf.mxu1 }
 0x285   : > { %11859 = vst [vmem:[#allocation46_spill] sm:$0xff] %v10493_v61  ;;  %v10496_v35 = vadd.f32 %v4101_v59, %v3748_v49  ;;  %v3751_v52 = vadd.f32 %v7136_v25, %v11861_v13 }
 0x286   : > { %v4111_v14 = vpop.f32.mrf.mxu0  ;;  %v3647_v36 = vpop.f32.mrf.mxu1 }
 0x287   : > { %v10499_v26 = vadd.f32 %v7234_v32, %v3751_v52  ;;  %v3750_v34 = vadd.f32 %v3647_v36, %v11862_v40 }
 0x288   : > { %v7237_v11 = vpop.f32.mrf.mxu0  ;;  %v7139_v2 = vpop.f32.mrf.mxu1 }
 0x289   : > { %v10502_v62 = vadd.f32 %v4111_v14, %v3750_v34  ;;  %v3753_v33 = vadd.f32 %v7139_v2, %v11863_v27 }
 0x28a   : > { %v4121_v61 = vpop.f32.mrf.mxu0  ;;  %v3657_v51 = vpop.f32.mrf.mxu1 }
 0x28b   : > { %v10505_v53 = vadd.f32 %v7237_v11, %v3753_v33  ;;  %v3752_v59 = vadd.f32 %v3657_v51, %v10169_v63 }
 0x28c   : > { %v7240_v49 = vpop.f32.mrf.mxu0  ;;  %v7142_v25 = vpop.f32.mrf.mxu1 }
 0x28d   : > { %v10508_v13 = vadd.f32 %v4121_v61, %v3752_v59  ;;  %v3755_v32 = vadd.f32 %v7142_v25, %v10176_v7 }
 0x28e   : > { %v4131_v52 = vpop.f32.mrf.mxu0  ;;  %v3667_v36 = vpop.f32.mrf.mxu1 }
 0x28f   : > { %v10511_v40 = vadd.f32 %v7240_v49, %v3755_v32  ;;  %v3754_v14 = vadd.f32 %v3667_v36, %v10185_v54 }
 0x290   : > { %v7243_v34 = vpop.f32.mrf.mxu0  ;;  %v7145_v2 = vpop.f32.mrf.mxu1 }
 0x291   : > { %v10514_v27 = vadd.f32 %v4131_v52, %v3754_v14  ;;  %v3757_v11 = vadd.f32 %v7145_v2, %v10190_v8 }
 0x292   : > { %v4141_v63 = vpop.f32.mrf.mxu0  ;;  %v3677_v33 = vpop.f32.mrf.mxu1 }
 0x293   : > { %v10517_v61 = vadd.f32 %v7243_v34, %v3757_v11  ;;  %v3756_v7 = vadd.f32 %v3677_v33, %v10197_v43  ;;  %v10534_v11 = vld [vmem:[%s199_s24] ss:$0 sm:$0xff] }
 0x294   : > { %v7246_v51 = vpop.f32.mrf.mxu0  ;;  %v7148_v59 = vpop.f32.mrf.mxu1 }
 0x295   : > { %v10520_v49 = vadd.f32 %v4141_v63, %v3756_v7  ;;  %v3759_v54 = vadd.f32 %v7148_v59, %v10202_v18 }
 0x296   : > { %v4151_v25 = vpop.f32.mrf.mxu0  ;;  %v3687_v32 = vpop.f32.mrf.mxu1 }
 0x297   : > { %v10523_v36 = vadd.f32 %v7246_v51, %v3759_v54  ;;  %v3758_v52 = vadd.f32 %v3687_v32, %v10211_v3 }
 0x298   : > { %v7349_v8 = vpop.f32.mrf.mxu0  ;;  %v7251_v14 = vpop.f32.mrf.mxu1 }
 0x299   : > { %v10530_v34 = vadd.f32 %v4151_v25, %v3758_v52  ;;  %v4633_v43 = vadd.f32 %v7251_v14, %v10216_v46 }
 0x29a   : > { %v4783_v2 = vpop.f32.mrf.mxu0  ;;  %v4313_v18 = vpop.f32.mrf.mxu1 }
 0x29b   : > { %v5103_v63 = vadd.f32 %v7349_v8, %v4633_v43  ;;  %v4632_v33 = vadd.f32 %v4313_v18, %v10225_v20 }
 0x29c   : > { %v7352_v7 = vpop.f32.mrf.mxu0  ;;  %v7254_v3 = vpop.f32.mrf.mxu1 }
 0x29d   : > { %v5174_v46 = vadd.f32 %v10534_v11, %v5103_v63  ;;  %v5102_v51 = vadd.f32 %v4783_v2, %v4632_v33  ;;  %v4635_v59 = vadd.f32 %v7254_v3, %v10230_v50 }
 0x29e   : > { %v4793_v54 = vpop.f32.mrf.mxu0  ;;  %v4323_v25 = vpop.f32.mrf.mxu1 }
 0x29f   : > { %5239 = vst.msk [vmem:[%s10540_s28 + $0x8] sm:$0xff] %vm5237_vm4, %v5174_v46  ;;  %v5173_v20 = vadd.f32 %v10534_v11, %v5102_v51  ;;  %v5105_v32 = vadd.f32 %v7352_v7, %v4635_v59  ;;  %v4634_v52 = vadd.f32 %v4323_v25, %v10239_v5 }
 0x2a0   : > { %v7355_v8 = vpop.f32.mrf.mxu0  ;;  %v7257_v14 = vpop.f32.mrf.mxu1 }
 0x2a1   : > { %5238 = vst.msk [vmem:[%s10540_s28] sm:$0xff] %vm5237_vm4, %v5173_v20  ;;  %v5176_v43 = vadd.f32 %v10534_v11, %v5105_v32  ;;  %v5104_v2 = vadd.f32 %v4793_v54, %v4634_v52  ;;  %v4637_v50 = vadd.f32 %v7257_v14, %v10244_v21 }
 0x2a2   : > { %v4803_v18 = vpop.f32.mrf.mxu0  ;;  %v4333_v63 = vpop.f32.mrf.mxu1 }
 0x2a3   : > { %5241 = vst.msk [vmem:[%s10540_s28 + $0x18] sm:$0xff] %vm5237_vm4, %v5176_v43  ;;  %v5175_v33 = vadd.f32 %v10534_v11, %v5104_v2  ;;  %v5107_v7 = vadd.f32 %v7355_v8, %v4637_v50  ;;  %v4636_v5 = vadd.f32 %v4333_v63, %v10253_v29 }
 0x2a4   : > { %v7358_v3 = vpop.f32.mrf.mxu0  ;;  %v7260_v46 = vpop.f32.mrf.mxu1 }
 0x2a5   : > { %5240 = vst.msk [vmem:[%s10540_s28 + $0x10] sm:$0xff] %vm5237_vm4, %v5175_v33  ;;  %v5178_v51 = vadd.f32 %v10534_v11, %v5107_v7  ;;  %v5106_v59 = vadd.f32 %v4803_v18, %v4636_v5  ;;  %v4639_v21 = vadd.f32 %v7260_v46, %v10258_v58 }
 0x2a6   : > { %v4813_v54 = vpop.f32.mrf.mxu0  ;;  %v4343_v25 = vpop.f32.mrf.mxu1 }
 0x2a7   : > { %5243 = vst.msk [vmem:[%s10540_s28 + $0x28] sm:$0xff] %vm5237_vm4, %v5178_v51  ;;  %v5177_v20 = vadd.f32 %v10534_v11, %v5106_v59  ;;  %v5109_v32 = vadd.f32 %v7358_v3, %v4639_v21  ;;  %v4638_v29 = vadd.f32 %v4343_v25, %v10267_v42 }
 0x2a8   : > { %v7361_v52 = vpop.f32.mrf.mxu0  ;;  %v7263_v8 = vpop.f32.mrf.mxu1 }
 0x2a9   : > { %5242 = vst.msk [vmem:[%s10540_s28 + $0x20] sm:$0xff] %vm5237_vm4, %v5177_v20  ;;  %v5180_v14 = vadd.f32 %v10534_v11, %v5109_v32  ;;  %v5108_v43 = vadd.f32 %v4813_v54, %v4638_v29  ;;  %v4641_v58 = vadd.f32 %v7263_v8, %v10272_v39 }
 0x2aa   : > { %v4823_v2 = vpop.f32.mrf.mxu0  ;;  %v4353_v50 = vpop.f32.mrf.mxu1 }
 0x2ab   : > { %5245 = vst.msk [vmem:[%s10540_s28 + $0x38] sm:$0xff] %vm5237_vm4, %v5180_v14  ;;  %v5179_v18 = vadd.f32 %v10534_v11, %v5108_v43  ;;  %v5111_v63 = vadd.f32 %v7361_v52, %v4641_v58  ;;  %v4640_v42 = vadd.f32 %v4353_v50, %v10281_v47 }
 0x2ac   : > { %v7364_v33 = vpop.f32.mrf.mxu0  ;;  %v7266_v7 = vpop.f32.mrf.mxu1 }
 0x2ad   : > { %5244 = vst.msk [vmem:[%s10540_s28 + $0x30] sm:$0xff] %vm5237_vm4, %v5179_v18  ;;  %v5182_v5 = vadd.f32 %v10534_v11, %v5111_v63  ;;  %v5110_v3 = vadd.f32 %v4823_v2, %v4640_v42  ;;  %v4643_v39 = vadd.f32 %v7266_v7, %v10286_v60 }
 0x2ae   : > { %v4833_v46 = vpop.f32.mrf.mxu0  ;;  %v4363_v51 = vpop.f32.mrf.mxu1 }
 0x2af   : > { %5247 = vst.msk [vmem:[%s10540_s28 + $0x48] sm:$0xff] %vm5237_vm4, %v5182_v5  ;;  %v5181_v59 = vadd.f32 %v10534_v11, %v5110_v3  ;;  %v5113_v21 = vadd.f32 %v7364_v33, %v4643_v39  ;;  %v4642_v47 = vadd.f32 %v4363_v51, %v10295_v37 }
 0x2b0   : > { %v7367_v54 = vpop.f32.mrf.mxu0  ;;  %v7269_v25 = vpop.f32.mrf.mxu1 }
 0x2b1   : > { %5246 = vst.msk [vmem:[%s10540_s28 + $0x40] sm:$0xff] %vm5237_vm4, %v5181_v59  ;;  %v5184_v20 = vadd.f32 %v10534_v11, %v5113_v21  ;;  %v5112_v32 = vadd.f32 %v4833_v46, %v4642_v47  ;;  %v4645_v60 = vadd.f32 %v7269_v25, %v10300_v56 }
 0x2b2   : > { %v4843_v29 = vpop.f32.mrf.mxu0  ;;  %v4373_v52 = vpop.f32.mrf.mxu1 }
 0x2b3   : > { %5249 = vst.msk [vmem:[%s10540_s28 + $0x58] sm:$0xff] %vm5237_vm4, %v5184_v20  ;;  %v5183_v8 = vadd.f32 %v10534_v11, %v5112_v32  ;;  %v5115_v14 = vadd.f32 %v7367_v54, %v4645_v60  ;;  %v4644_v37 = vadd.f32 %v4373_v52, %v10309_v12 }
 0x2b4   : > { %v7370_v43 = vpop.f32.mrf.mxu0  ;;  %v7272_v58 = vpop.f32.mrf.mxu1 }
 0x2b5   : > { %5248 = vst.msk [vmem:[%s10540_s28 + $0x50] sm:$0xff] %vm5237_vm4, %v5183_v8  ;;  %v5186_v2 = vadd.f32 %v10534_v11, %v5115_v14  ;;  %v5114_v50 = vadd.f32 %v4843_v29, %v4644_v37  ;;  %v4647_v56 = vadd.f32 %v7272_v58, %v10314_v45 }
 0x2b6   : > { %v4853_v18 = vpop.f32.mrf.mxu0  ;;  %v4383_v63 = vpop.f32.mrf.mxu1 }
 0x2b7   : > { %5251 = vst.msk [vmem:[%s10540_s28 + $0x68] sm:$0xff] %vm5237_vm4, %v5186_v2  ;;  %v5185_v42 = vadd.f32 %v10534_v11, %v5114_v50  ;;  %v5117_v33 = vadd.f32 %v7370_v43, %v4647_v56  ;;  %v4646_v12 = vadd.f32 %v4383_v63, %v10323_v28 }
 0x2b8   : > { %v7373_v7 = vpop.f32.mrf.mxu0  ;;  %v7275_v5 = vpop.f32.mrf.mxu1 }
 0x2b9   : > { %5250 = vst.msk [vmem:[%s10540_s28 + $0x60] sm:$0xff] %vm5237_vm4, %v5185_v42  ;;  %v5188_v3 = vadd.f32 %v10534_v11, %v5117_v33  ;;  %v5116_v39 = vadd.f32 %v4853_v18, %v4646_v12  ;;  %v4649_v45 = vadd.f32 %v7275_v5, %v10328_v23 }
 0x2ba   : > { %v4863_v46 = vpop.f32.mrf.mxu0  ;;  %v4393_v51 = vpop.f32.mrf.mxu1 }
 0x2bb   : > { %5253 = vst.msk [vmem:[%s10540_s28 + $0x78] sm:$0xff] %vm5237_vm4, %v5188_v3  ;;  %v5187_v59 = vadd.f32 %v10534_v11, %v5116_v39  ;;  %v5119_v21 = vadd.f32 %v7373_v7, %v4649_v45  ;;  %v4648_v28 = vadd.f32 %v4393_v51, %v10337_v44 }
 0x2bc   : > { %v7376_v47 = vpop.f32.mrf.mxu0  ;;  %v7278_v54 = vpop.f32.mrf.mxu1 }
 0x2bd   : > { %5252 = vst.msk [vmem:[%s10540_s28 + $0x70] sm:$0xff] %vm5237_vm4, %v5187_v59  ;;  %v5190_v25 = vadd.f32 %v10534_v11, %v5119_v21  ;;  %v5118_v20 = vadd.f32 %v4863_v46, %v4648_v28  ;;  %v4651_v23 = vadd.f32 %v7278_v54, %v10342_v4 }
 0x2be   : > { %v4873_v32 = vpop.f32.mrf.mxu0  ;;  %v4403_v60 = vpop.f32.mrf.mxu1 }
 0x2bf   : > { %5255 = vst.msk [vmem:[%s10540_s28 + $0x88] sm:$0xff] %vm5237_vm4, %v5190_v25  ;;  %v5189_v29 = vadd.f32 %v10534_v11, %v5118_v20  ;;  %v5121_v52 = vadd.f32 %v7376_v47, %v4651_v23  ;;  %v4650_v44 = vadd.f32 %v4403_v60, %v10351_v10 }
 0x2c0   : > { %v7379_v8 = vpop.f32.mrf.mxu0  ;;  %v7281_v14 = vpop.f32.mrf.mxu1 }
 0x2c1   : > { %5254 = vst.msk [vmem:[%s10540_s28 + $0x80] sm:$0xff] %vm5237_vm4, %v5189_v29  ;;  %v5192_v37 = vadd.f32 %v10534_v11, %v5121_v52  ;;  %v5120_v43 = vadd.f32 %v4873_v32, %v4650_v44  ;;  %v4653_v4 = vadd.f32 %v7281_v14, %v10356_v22 }
 0x2c2   : > { %v4883_v58 = vpop.f32.mrf.mxu0  ;;  %v4413_v2 = vpop.f32.mrf.mxu1 }
 0x2c3   : > { %5257 = vst.msk [vmem:[%s10540_s28 + $0x98] sm:$0xff] %vm5237_vm4, %v5192_v37  ;;  %v5191_v50 = vadd.f32 %v10534_v11, %v5120_v43  ;;  %v5123_v56 = vadd.f32 %v7379_v8, %v4653_v4  ;;  %v4652_v10 = vadd.f32 %v4413_v2, %v10365_v0 }
 0x2c4   : > { %v7382_v18 = vpop.f32.mrf.mxu0  ;;  %v7284_v63 = vpop.f32.mrf.mxu1 }
 0x2c5   : > { %5256 = vst.msk [vmem:[%s10540_s28 + $0x90] sm:$0xff] %vm5237_vm4, %v5191_v50  ;;  %v5194_v42 = vadd.f32 %v10534_v11, %v5123_v56  ;;  %v5122_v33 = vadd.f32 %v4883_v58, %v4652_v10  ;;  %v4655_v22 = vadd.f32 %v7284_v63, %v10370_v24 }
 0x2c6   : > { %v4893_v12 = vpop.f32.mrf.mxu0  ;;  %v4423_v7 = vpop.f32.mrf.mxu1 }
 0x2c7   : > { %5259 = vst.msk [vmem:[%s10540_s28 + $0xa8] sm:$0xff] %vm5237_vm4, %v5194_v42  ;;  %v5193_v5 = vadd.f32 %v10534_v11, %v5122_v33  ;;  %v5125_v3 = vadd.f32 %v7382_v18, %v4655_v22  ;;  %v4654_v0 = vadd.f32 %v4423_v7, %v10380_v41 }
 0x2c8   : > { %v7385_v39 = vpop.f32.mrf.mxu0  ;;  %v7287_v45 = vpop.f32.mrf.mxu1 }
 0x2c9   : > { %5258 = vst.msk [vmem:[%s10540_s28 + $0xa0] sm:$0xff] %vm5237_vm4, %v5193_v5  ;;  %v5196_v46 = vadd.f32 %v10534_v11, %v5125_v3  ;;  %v5124_v51 = vadd.f32 %v4893_v12, %v4654_v0  ;;  %v4657_v24 = vadd.f32 %v7287_v45, %v10389_v30 }
 0x2ca   : > { %v4903_v59 = vpop.f32.mrf.mxu0  ;;  %v4433_v21 = vpop.f32.mrf.mxu1 }
 0x2cb   : > { %5261 = vst.msk [vmem:[%s10540_s28 + $0xb8] sm:$0xff] %vm5237_vm4, %v5196_v46  ;;  %v5195_v28 = vadd.f32 %v10534_v11, %v5124_v51  ;;  %v5127_v47 = vadd.f32 %v7385_v39, %v4657_v24  ;;  %v4656_v41 = vadd.f32 %v4433_v21, %v10398_v55 }
 0x2cc   : > { %v7388_v54 = vpop.f32.mrf.mxu0  ;;  %v7290_v25 = vpop.f32.mrf.mxu1 }
 0x2cd   : > { %5260 = vst.msk [vmem:[%s10540_s28 + $0xb0] sm:$0xff] %vm5237_vm4, %v5195_v28  ;;  %v5198_v20 = vadd.f32 %v10534_v11, %v5127_v47  ;;  %v5126_v23 = vadd.f32 %v4903_v59, %v4656_v41  ;;  %v4659_v30 = vadd.f32 %v7290_v25, %v10405_v15 }
 0x2ce   : > { %v4913_v32 = vpop.f32.mrf.mxu0  ;;  %v4443_v60 = vpop.f32.mrf.mxu1 }
 0x2cf   : > { %5263 = vst.msk [vmem:[%s10540_s28 + $0xc8] sm:$0xff] %vm5237_vm4, %v5198_v20  ;;  %v5197_v29 = vadd.f32 %v10534_v11, %v5126_v23  ;;  %v5129_v52 = vadd.f32 %v7388_v54, %v4659_v30  ;;  %v4658_v55 = vadd.f32 %v4443_v60, %v10414_v19 }
 0x2d0   : > { %v7391_v44 = vpop.f32.mrf.mxu0  ;;  %v7293_v8 = vpop.f32.mrf.mxu1 }
 0x2d1   : > { %5262 = vst.msk [vmem:[%s10540_s28 + $0xc0] sm:$0xff] %vm5237_vm4, %v5197_v29  ;;  %v5200_v14 = vadd.f32 %v10534_v11, %v5129_v52  ;;  %v5128_v37 = vadd.f32 %v4913_v32, %v4658_v55  ;;  %v4661_v15 = vadd.f32 %v7293_v8, %v10419_v17  ;;  %v11864_v55 = vld [vmem:[#allocation22_spill] sm:$0xff] }
 0x2d2   : > { %v4923_v43 = vpop.f32.mrf.mxu0  ;;  %v4453_v4 = vpop.f32.mrf.mxu1 }
 0x2d3   : > { %5265 = vst.msk [vmem:[%s10540_s28 + $0xd8] sm:$0xff] %vm5237_vm4, %v5200_v14  ;;  %v5199_v58 = vadd.f32 %v10534_v11, %v5128_v37  ;;  %v5131_v2 = vadd.f32 %v7391_v44, %v4661_v15  ;;  %v4660_v19 = vadd.f32 %v4453_v4, %v10424_v1  ;;  %v11865_v15 = vld [vmem:[#allocation172_spill] sm:$0xff] }
 0x2d4   : > { %v7394_v50 = vpop.f32.mrf.mxu0  ;;  %v7296_v56 = vpop.f32.mrf.mxu1 }
 0x2d5   : > { %5264 = vst.msk [vmem:[%s10540_s28 + $0xd0] sm:$0xff] %vm5237_vm4, %v5199_v58  ;;  %v5202_v10 = vadd.f32 %v10534_v11, %v5131_v2  ;;  %v5130_v18 = vadd.f32 %v4923_v43, %v4660_v19  ;;  %v4663_v17 = vadd.f32 %v7296_v56, %v10427_v48  ;;  %v11866_v19 = vld [vmem:[#allocation171_spill] sm:$0xff] }
 0x2d6   : > { %v4933_v63 = vpop.f32.mrf.mxu0  ;;  %v4463_v42 = vpop.f32.mrf.mxu1 }
 0x2d7   : > { %5267 = vst.msk [vmem:[%s10540_s28 + $0xe8] sm:$0xff] %vm5237_vm4, %v5202_v10  ;;  %v5201_v33 = vadd.f32 %v10534_v11, %v5130_v18  ;;  %v5133_v22 = vadd.f32 %v7394_v50, %v4663_v17  ;;  %v4662_v1 = vadd.f32 %v4463_v42, %v10430_v57 }
 0x2d8   : > { %v7397_v12 = vpop.f32.mrf.mxu0  ;;  %v7299_v7 = vpop.f32.mrf.mxu1 }
 0x2d9   : > { %5266 = vst.msk [vmem:[%s10540_s28 + $0xe0] sm:$0xff] %vm5237_vm4, %v5201_v33  ;;  %v5204_v5 = vadd.f32 %v10534_v11, %v5133_v22  ;;  %v5132_v3 = vadd.f32 %v4933_v63, %v4662_v1  ;;  %v4665_v48 = vadd.f32 %v7299_v7, %v10433_v38  ;;  %v11867_v63 = vld [vmem:[#allocation27_spill] sm:$0xff]  ;;  %v11868_v7 = vld [vmem:[#allocation174_spill] sm:$0xff] }
 0x2da   : > { %v4943_v0 = vpop.f32.mrf.mxu0  ;;  %v4473_v39 = vpop.f32.mrf.mxu1 }
 0x2db   : > { %5269 = vst.msk [vmem:[%s10540_s28 + $0xf8] sm:$0xff] %vm5237_vm4, %v5204_v5  ;;  %v5203_v45 = vadd.f32 %v10534_v11, %v5132_v3  ;;  %v5135_v46 = vadd.f32 %v7397_v12, %v4665_v48  ;;  %v4664_v57 = vadd.f32 %v4473_v39, %v10436_v9 }
 0x2dc   : > { %v7400_v51 = vpop.f32.mrf.mxu0  ;;  %v7302_v24 = vpop.f32.mrf.mxu1 }
 0x2dd   : > { %5268 = vst.msk [vmem:[%s10540_s28 + $0xf0] sm:$0xff] %vm5237_vm4, %v5203_v45  ;;  %v5206_v59 = vadd.f32 %v10534_v11, %v5135_v46  ;;  %v5134_v21 = vadd.f32 %v4943_v0, %v4664_v57  ;;  %v4667_v38 = vadd.f32 %v7302_v24, %v10439_v16  ;;  %v11869_v45 = vld [vmem:[#allocation173_spill] sm:$0xff] }
 0x2de   : > { %v4953_v28 = vpop.f32.mrf.mxu0  ;;  %v4483_v47 = vpop.f32.mrf.mxu1 }
 0x2df   : > { %5271 = vst.msk [vmem:[%s10540_s28 + $0x108] sm:$0xff] %vm5237_vm4, %v5206_v59  ;;  %v5205_v41 = vadd.f32 %v10534_v11, %v5134_v21  ;;  %v5137_v54 = vadd.f32 %v7400_v51, %v4667_v38  ;;  %v4666_v9 = vadd.f32 %v4483_v47, %v10442_v6  ;;  %v11870_v21 = vld [vmem:[#allocation32_spill] sm:$0xff] }
 0x2e0   : > { %v7403_v25 = vpop.f32.mrf.mxu0  ;;  %v7305_v20 = vpop.f32.mrf.mxu1 }
 0x2e1   : > { %5270 = vst.msk [vmem:[%s10540_s28 + $0x100] sm:$0xff] %vm5237_vm4, %v5205_v41  ;;  %v5208_v23 = vadd.f32 %v10534_v11, %v5137_v54  ;;  %v5136_v30 = vadd.f32 %v4953_v28, %v4666_v9  ;;  %v4669_v16 = vadd.f32 %v7305_v20, %v10445_v31  ;;  %v11871_v9 = vld [vmem:[#allocation176_spill] sm:$0xff] }
 0x2e2   : > { %v4963_v32 = vpop.f32.mrf.mxu0  ;;  %v4493_v60 = vpop.f32.mrf.mxu1 }
 0x2e3   : > { %5273 = vst.msk [vmem:[%s10540_s28 + $0x118] sm:$0xff] %vm5237_vm4, %v5208_v23  ;;  %v5207_v29 = vadd.f32 %v10534_v11, %v5136_v30  ;;  %v5139_v52 = vadd.f32 %v7403_v25, %v4669_v16  ;;  %v4668_v6 = vadd.f32 %v4493_v60, %v11864_v55 }
 0x2e4   : > { %v7406_v44 = vpop.f32.mrf.mxu0  ;;  %v7308_v8 = vpop.f32.mrf.mxu1 }
 0x2e5   : > { %5272 = vst.msk [vmem:[%s10540_s28 + $0x110] sm:$0xff] %vm5237_vm4, %v5207_v29  ;;  %v5210_v14 = vadd.f32 %v10534_v11, %v5139_v52  ;;  %v5138_v37 = vadd.f32 %v4963_v32, %v4668_v6  ;;  %v4671_v31 = vadd.f32 %v7308_v8, %v11865_v15  ;;  %v11872_v32 = vld [vmem:[#allocation34_spill] sm:$0xff] }
 0x2e6   : > { %v4973_v43 = vpop.f32.mrf.mxu0  ;;  %v4503_v4 = vpop.f32.mrf.mxu1 }
 0x2e7   : > { %5275 = vst.msk [vmem:[%s10540_s28 + $0x128] sm:$0xff] %vm5237_vm4, %v5210_v14  ;;  %v5209_v58 = vadd.f32 %v10534_v11, %v5138_v37  ;;  %v5141_v2 = vadd.f32 %v7406_v44, %v4671_v31  ;;  %v4670_v50 = vadd.f32 %v4503_v4, %v11866_v19  ;;  %v11873_v44 = vld [vmem:[#allocation175_spill] sm:$0xff] }
 0x2e8   : > { %v7409_v56 = vpop.f32.mrf.mxu0  ;;  %v7311_v10 = vpop.f32.mrf.mxu1 }
 0x2e9   : > { %5274 = vst.msk [vmem:[%s10540_s28 + $0x120] sm:$0xff] %vm5237_vm4, %v5209_v58  ;;  %v5212_v18 = vadd.f32 %v10534_v11, %v5141_v2  ;;  %v5140_v17 = vadd.f32 %v4973_v43, %v4670_v50  ;;  %v4673_v42 = vadd.f32 %v7311_v10, %v11867_v63  ;;  %v11874_v43 = vld [vmem:[#allocation35_spill] sm:$0xff] }
 0x2ea   : > { %v4983_v33 = vpop.f32.mrf.mxu0  ;;  %v4513_v22 = vpop.f32.mrf.mxu1 }
 0x2eb   : > { %5277 = vst.msk [vmem:[%s10540_s28 + $0x138] sm:$0xff] %vm5237_vm4, %v5212_v18  ;;  %v5211_v1 = vadd.f32 %v10534_v11, %v5140_v17  ;;  %v5143_v12 = vadd.f32 %v7409_v56, %v4673_v42  ;;  %v4672_v5 = vadd.f32 %v4513_v22, %v11868_v7  ;;  %v11875_v56 = vld [vmem:[#allocation177_spill] sm:$0xff] }
 0x2ec   : > { %v7412_v3 = vpop.f32.mrf.mxu0  ;;  %v7314_v48 = vpop.f32.mrf.mxu1 }
 0x2ed   : > { %5276 = vst.msk [vmem:[%s10540_s28 + $0x130] sm:$0xff] %vm5237_vm4, %v5211_v1  ;;  %v5214_v0 = vadd.f32 %v10534_v11, %v5143_v12  ;;  %v5142_v39 = vadd.f32 %v4983_v33, %v4672_v5  ;;  %v4675_v46 = vadd.f32 %v7314_v48, %v11869_v45  ;;  %v11876_v33 = vld [vmem:[#allocation179_spill] sm:$0xff] }
 0x2ee   : > { %v4993_v57 = vpop.f32.mrf.mxu0  ;;  %v4523_v51 = vpop.f32.mrf.mxu1 }
 0x2ef   : > { %5279 = vst.msk [vmem:[%s10540_s28 + $0x148] sm:$0xff] %vm5237_vm4, %v5214_v0  ;;  %v5213_v24 = vadd.f32 %v10534_v11, %v5142_v39  ;;  %v5145_v59 = vadd.f32 %v7412_v3, %v4675_v46  ;;  %v4674_v38 = vadd.f32 %v4523_v51, %v11870_v21  ;;  %v11877_v3 = vld [vmem:[#allocation181_spill] sm:$0xff] }
 0x2f0   : > { %v7415_v28 = vpop.f32.mrf.mxu0  ;;  %v7317_v47 = vpop.f32.mrf.mxu1 }
 0x2f1   : > { %5278 = vst.msk [vmem:[%s10540_s28 + $0x140] sm:$0xff] %vm5237_vm4, %v5213_v24  ;;  %v5216_v41 = vadd.f32 %v10534_v11, %v5145_v59  ;;  %v5144_v54 = vadd.f32 %v4993_v57, %v4674_v38  ;;  %v4677_v25 = vadd.f32 %v7317_v47, %v11871_v9  ;;  %v11878_v57 = vld [vmem:[#allocation178_spill] sm:$0xff] }
 0x2f2   : > { %v5003_v20 = vpop.f32.mrf.mxu0  ;;  %v4533_v23 = vpop.f32.mrf.mxu1 }
 0x2f3   : > { %5281 = vst.msk [vmem:[%s10540_s28 + $0x158] sm:$0xff] %vm5237_vm4, %v5216_v41  ;;  %v5215_v30 = vadd.f32 %v10534_v11, %v5144_v54  ;;  %v5147_v16 = vadd.f32 %v7415_v28, %v4677_v25  ;;  %v4676_v60 = vadd.f32 %v4533_v23, %v11872_v32  ;;  %v11879_v28 = vld [vmem:[#allocation46_spill] sm:$0xff] }
 0x2f4   : > { %v7418_v29 = vpop.f32.mrf.mxu0  ;;  %v7320_v52 = vpop.f32.mrf.mxu1 }
 0x2f5   : > { %5280 = vst.msk [vmem:[%s10540_s28 + $0x150] sm:$0xff] %vm5237_vm4, %v5215_v30  ;;  %v5218_v55 = vadd.f32 %v10534_v11, %v5147_v16  ;;  %v5146_v6 = vadd.f32 %v5003_v20, %v4676_v60  ;;  %v4679_v8 = vadd.f32 %v7320_v52, %v11873_v44 }
 0x2f6   : > { %v5013_v14 = vpop.f32.mrf.mxu0  ;;  %v4543_v37 = vpop.f32.mrf.mxu1 }
 0x2f7   : > { %5283 = vst.msk [vmem:[%s10540_s28 + $0x168] sm:$0xff] %vm5237_vm4, %v5218_v55  ;;  %v5217_v15 = vadd.f32 %v10534_v11, %v5146_v6  ;;  %v5149_v31 = vadd.f32 %v7418_v29, %v4679_v8  ;;  %v4678_v4 = vadd.f32 %v4543_v37, %v11874_v43 }
 0x2f8   : > { %v7421_v58 = vpop.f32.mrf.mxu0  ;;  %v7323_v2 = vpop.f32.mrf.mxu1 }
 0x2f9   : > { %5282 = vst.msk [vmem:[%s10540_s28 + $0x160] sm:$0xff] %vm5237_vm4, %v5217_v15  ;;  %v5220_v19 = vadd.f32 %v10534_v11, %v5149_v31  ;;  %v5148_v50 = vadd.f32 %v5013_v14, %v4678_v4  ;;  %v4681_v10 = vadd.f32 %v7323_v2, %v11875_v56 }
 0x2fa   : > { %v5023_v18 = vpop.f32.mrf.mxu0  ;;  %v4553_v17 = vpop.f32.mrf.mxu1 }
 0x2fb   : > { %5285 = vst.msk [vmem:[%s10540_s28 + $0x178] sm:$0xff] %vm5237_vm4, %v5220_v19  ;;  %v5219_v63 = vadd.f32 %v10534_v11, %v5148_v50  ;;  %v5151_v42 = vadd.f32 %v7421_v58, %v4681_v10  ;;  %v4680_v22 = vadd.f32 %v4553_v17, %v11876_v33 }
 0x2fc   : > { %v7424_v1 = vpop.f32.mrf.mxu0  ;;  %v7326_v12 = vpop.f32.mrf.mxu1 }
 0x2fd   : > { %5284 = vst.msk [vmem:[%s10540_s28 + $0x170] sm:$0xff] %vm5237_vm4, %v5219_v63  ;;  %v5222_v7 = vadd.f32 %v10534_v11, %v5151_v42  ;;  %v5150_v5 = vadd.f32 %v5023_v18, %v4680_v22  ;;  %v4683_v48 = vadd.f32 %v7326_v12, %v11877_v3 }
 0x2fe   : > { %v5033_v0 = vpop.f32.mrf.mxu0  ;;  %v4563_v39 = vpop.f32.mrf.mxu1 }
 0x2ff   : > { %5287 = vst.msk [vmem:[%s10540_s28 + $0x188] sm:$0xff] %vm5237_vm4, %v5222_v7  ;;  %v5221_v45 = vadd.f32 %v10534_v11, %v5150_v5  ;;  %v5153_v46 = vadd.f32 %v7424_v1, %v4683_v48  ;;  %v4682_v51 = vadd.f32 %v4563_v39, %v11878_v57 }
 0x300   : > { %v7427_v24 = vpop.f32.mrf.mxu0  ;;  %v7329_v59 = vpop.f32.mrf.mxu1 }
 0x301   : > { %5286 = vst.msk [vmem:[%s10540_s28 + $0x180] sm:$0xff] %vm5237_vm4, %v5221_v45  ;;  %v5224_v21 = vadd.f32 %v10534_v11, %v5153_v46  ;;  %v5152_v38 = vadd.f32 %v5033_v0, %v4682_v51  ;;  %v4685_v47 = vadd.f32 %v7329_v59, %v11879_v28 }
 0x302   : > { %v5043_v41 = vpop.f32.mrf.mxu0  ;;  %v4573_v54 = vpop.f32.mrf.mxu1 }
 0x303   : > { %5289 = vst.msk [vmem:[%s10540_s28 + $0x198] sm:$0xff] %vm5237_vm4, %v5224_v21  ;;  %v5223_v9 = vadd.f32 %v10534_v11, %v5152_v38  ;;  %v5155_v25 = vadd.f32 %v7427_v24, %v4685_v47  ;;  %v4684_v20 = vadd.f32 %v4573_v54, %v10496_v35 }
 0x304   : > { %v7430_v23 = vpop.f32.mrf.mxu0  ;;  %v7332_v30 = vpop.f32.mrf.mxu1 }
 0x305   : > { %5288 = vst.msk [vmem:[%s10540_s28 + $0x190] sm:$0xff] %vm5237_vm4, %v5223_v9  ;;  %v5226_v16 = vadd.f32 %v10534_v11, %v5155_v25  ;;  %v5154_v32 = vadd.f32 %v5043_v41, %v4684_v20  ;;  %v4687_v60 = vadd.f32 %v7332_v30, %v10499_v26 }
 0x306   : > { %v5053_v29 = vpop.f32.mrf.mxu0  ;;  %v4583_v52 = vpop.f32.mrf.mxu1 }
 0x307   : > { %5291 = vst.msk [vmem:[%s10540_s28 + $0x1a8] sm:$0xff] %vm5237_vm4, %v5226_v16  ;;  %v5225_v55 = vadd.f32 %v10534_v11, %v5154_v32  ;;  %v5157_v6 = vadd.f32 %v7430_v23, %v4687_v60  ;;  %v4686_v35 = vadd.f32 %v4583_v52, %v10502_v62 }
 0x308   : > { %v7433_v44 = vpop.f32.mrf.mxu0  ;;  %v7335_v8 = vpop.f32.mrf.mxu1 }
 0x309   : > { %5290 = vst.msk [vmem:[%s10540_s28 + $0x1a0] sm:$0xff] %vm5237_vm4, %v5225_v55  ;;  %v5228_v14 = vadd.f32 %v10534_v11, %v5157_v6  ;;  %v5156_v37 = vadd.f32 %v5053_v29, %v4686_v35  ;;  %v4689_v26 = vadd.f32 %v7335_v8, %v10505_v53 }
 0x30a   : > { %v5063_v15 = vpop.f32.mrf.mxu0  ;;  %v4593_v31 = vpop.f32.mrf.mxu1 }
 0x30b   : > { %5293 = vst.msk [vmem:[%s10540_s28 + $0x1b8] sm:$0xff] %vm5237_vm4, %v5228_v14  ;;  %v5227_v43 = vadd.f32 %v10534_v11, %v5156_v37  ;;  %v5159_v4 = vadd.f32 %v7433_v44, %v4689_v26  ;;  %v4688_v62 = vadd.f32 %v4593_v31, %v10508_v13 }
 0x30c   : > { %v7436_v58 = vpop.f32.mrf.mxu0  ;;  %v7338_v2 = vpop.f32.mrf.mxu1 }
 0x30d   : > { %5292 = vst.msk [vmem:[%s10540_s28 + $0x1b0] sm:$0xff] %vm5237_vm4, %v5227_v43  ;;  %v5230_v19 = vadd.f32 %v10534_v11, %v5159_v4  ;;  %v5158_v50 = vadd.f32 %v5063_v15, %v4688_v62  ;;  %v4691_v53 = vadd.f32 %v7338_v2, %v10511_v40 }
 0x30e   : > { %v5073_v56 = vpop.f32.mrf.mxu0  ;;  %v4603_v10 = vpop.f32.mrf.mxu1 }
 0x30f   : > { %5295 = vst.msk [vmem:[%s10540_s28 + $0x1c8] sm:$0xff] %vm5237_vm4, %v5230_v19  ;;  %v5229_v18 = vadd.f32 %v10534_v11, %v5158_v50  ;;  %v5161_v17 = vadd.f32 %v7436_v58, %v4691_v53  ;;  %v4690_v13 = vadd.f32 %v4603_v10, %v10514_v27 }
 0x310   : > { %v7439_v63 = vpop.f32.mrf.mxu0  ;;  %v7341_v42 = vpop.f32.mrf.mxu1 }
 0x311   : > { %5294 = vst.msk [vmem:[%s10540_s28 + $0x1c0] sm:$0xff] %vm5237_vm4, %v5229_v18  ;;  %v5232_v33 = vadd.f32 %v10534_v11, %v5161_v17  ;;  %v5160_v22 = vadd.f32 %v5073_v56, %v4690_v13  ;;  %v4693_v40 = vadd.f32 %v7341_v42, %v10517_v61 }
 0x312   : > { %v5083_v1 = vpop.f32.mrf.mxu0  ;;  %v4613_v12 = vpop.f32.mrf.mxu1 }
 0x313   : > { %5297 = vst.msk [vmem:[%s10540_s28 + $0x1d8] sm:$0xff] %vm5237_vm4, %v5232_v33  ;;  %v5231_v7 = vadd.f32 %v10534_v11, %v5160_v22  ;;  %v5163_v5 = vadd.f32 %v7439_v63, %v4693_v40  ;;  %v4692_v27 = vadd.f32 %v4613_v12, %v10520_v49 }
 0x314   : > { %v7344_v3 = vpop.f32.mrf.mxu1  ;;  %v7442_v48 = vpop.f32.mrf.mxu0 }
 0x315   : > { %5296 = vst.msk [vmem:[%s10540_s28 + $0x1d0] sm:$0xff] %vm5237_vm4, %v5231_v7  ;;  %v5234_v0 = vadd.f32 %v10534_v11, %v5163_v5  ;;  %v5162_v39 = vadd.f32 %v5083_v1, %v4692_v27  ;;  %v4695_v61 = vadd.f32 %v7344_v3, %v10523_v36 }
 0x316   : > { %v4623_v45 = vpop.f32.mrf.mxu1  ;;  %v5093_v49 = vpop.f32.mrf.mxu0 }
 0x317   : > { %5299 = vst.msk [vmem:[%s10540_s28 + $0x1e8] sm:$0xff] %vm5237_vm4, %v5234_v0  ;;  %v5233_v46 = vadd.f32 %v10534_v11, %v5162_v39  ;;  %v5165_v57 = vadd.f32 %v7442_v48, %v4695_v61  ;;  %v4694_v51 = vadd.f32 %v4623_v45, %v10530_v34 }
 0x319   : > { %5298 = vst.msk [vmem:[%s10540_s28 + $0x1e0] sm:$0xff] %vm5237_vm4, %v5233_v46  ;;  %v5236_v24 = vadd.f32 %v10534_v11, %v5165_v57  ;;  %v5164_v59 = vadd.f32 %v5093_v49, %v4694_v51 }
 0x31b   : > { %5301 = vst.msk [vmem:[%s10540_s28 + $0x1f8] sm:$0xff] %vm5237_vm4, %v5236_v24  ;;  %v5235_v21 = vadd.f32 %v10534_v11, %v5164_v59 }
 0x31d   : > { %5300 = vst.msk [vmem:[%s10540_s28 + $0x1f0] sm:$0xff] %vm5237_vm4, %v5235_v21 }
 0x31e PF: > { %s13_s12 = sadd.s32 1, %s7521_s12  }
 0x31f   : > { %p10_p4 = scmp.ge.s32.totalorder %s13_s12, 4  }
 0x321   :  { %12 = sbr.rel (!%p10_p4) target bundleno = 1 (0x1), region = 68 }

</bundles_post_ra>
